<compile_context>
chip_gen: v6e
topology: v6e:2x2x1
jax: 0.10.0
libtpu: 0.0.40
codegen_flags: <defaults>
</compile_context>

<pallas_src>
import functools

import numpy as np
import jax
import jax.numpy as jnp
from jax.experimental import pallas as pl
from jax.experimental.pallas import tpu as pltpu

LEAKY_SLOPE = 0.01
BN_EPS = 1e-5


# ----------------------------------------------------------------------------
# wrapper-side prep (raw input only): zero-pad + stride-2 phase decomposition
# ----------------------------------------------------------------------------
def _phase_split(x, pad):
    """Zero-pad spatial dims by `pad`, split into the 4 stride-2 phases:
    out[:, p0*2+p1, u, v, :] == padded[:, 2*u+p0, 2*v+p1, :]."""
    n, h, w, c = x.shape
    hp, wp = h + 2 * pad, w + 2 * pad
    he, we = ((hp + 1) // 2) * 2, ((wp + 1) // 2) * 2
    xp = jnp.pad(x, ((0, 0), (pad, pad + he - hp), (pad, pad + we - wp), (0, 0)))
    xp = xp.reshape(n, he // 2, 2, we // 2, 2, c)
    xp = jnp.transpose(xp, (0, 2, 4, 1, 3, 5))          # (N, 2, 2, Hh, Wh, C)
    return xp.reshape(n, 4, he // 2, we // 2, c)         # (N, 4, Hh, Wh, C)


def _fuse_stem_params(pa, pb, pc):
    """Merge conv_a(3x3,p1) / conv_b(5x5,p2) / conv_c(7x7,p3) into one
    7x7/pad=3 conv with 192 output channels (centers kept aligned)."""
    w7 = jnp.zeros((7, 7, 1, 192), jnp.float32)
    w7 = w7.at[2:5, 2:5, :, 0:64].set(pa["w"])      # 3x3, pad 1 -> offset 2
    w7 = w7.at[1:6, 1:6, :, 64:128].set(pb["w"])    # 5x5, pad 2 -> offset 1
    w7 = w7.at[:, :, :, 128:192].set(pc["w"])       # 7x7, pad 3 -> offset 0
    scale = jnp.concatenate([pa["scale"], pb["scale"], pc["scale"]], axis=-1)
    shift = jnp.concatenate([pa["shift"], pb["shift"], pc["shift"]], axis=-1)
    return w7.reshape(49, 192).astype(jnp.bfloat16), scale, shift


# ----------------------------------------------------------------------------
# in-kernel helpers (all static Python loops over tiny, trace-time extents)
# ----------------------------------------------------------------------------
def _pool2x2_rows(y, H, W):
    """y: (H*W, C) row-major feature matrix (f32).  2x2/s2 max-pool.
    Returns [H//2][W//2] list of (1, C) f32 rows (pure VPU maxima)."""
    out = []
    for r in range(H // 2):
        row = []
        for c in range(W // 2):
            i0 = (2 * r) * W + 2 * c
            i1 = (2 * r + 1) * W + 2 * c
            m = jnp.maximum(jnp.maximum(y[i0:i0 + 1], y[i0 + 1:i0 + 2]),
                            jnp.maximum(y[i1:i1 + 1], y[i1 + 1:i1 + 2]))
            row.append(m)
        out.append(row)
    return out


def _conv3x3_s2_p1(rows, w_flat, scale, shift):
    """3x3 / stride-2 / pad-1 conv + folded BN + LeakyReLU as ONE im2col matmul.
    rows: [Hin][Win] of (1, Cin) f32 rows (in registers/VMEM).
    w_flat: (9*Cin, Cout) bf16, ordering (kh, kw, cin).
    Returns ((Ho*Wo, Cout) f32, Ho, Wo)."""
    Hin, Win = len(rows), len(rows[0])
    Cin = rows[0][0].shape[-1]
    Ho = (Hin + 2 - 3) // 2 + 1
    Wo = (Win + 2 - 3) // 2 + 1
    zero = jnp.zeros((1, Cin), jnp.float32)
    prows = []
    for oi in range(Ho):
        for oj in range(Wo):
            taps = []
            for kh in range(3):
                for kw in range(3):
                    r, c = 2 * oi + kh - 1, 2 * oj + kw - 1
                    taps.append(rows[r][c] if (0 <= r < Hin and 0 <= c < Win)
                                else zero)
            prows.append(jnp.concatenate(taps, axis=-1))      # (1, 9*Cin)
    patch = jnp.concatenate(prows, axis=0)                    # (Ho*Wo, 9*Cin)
    acc = jnp.dot(patch.astype(jnp.bfloat16), w_flat,         # single MXU dot
                  preferred_element_type=jnp.float32)
    y = acc * scale + shift                                   # f32 epilogue
    return jnp.where(y > 0, y, LEAKY_SLOPE * y), Ho, Wo


# ----------------------------------------------------------------------------
# the single fused Pallas kernel (one image per grid step)
# ----------------------------------------------------------------------------
def _light_encoder_kernel(xp_ref, w1_ref, s1_ref, b1_ref,
                          w2_ref, s2_ref, b2_ref,
                          w3_ref, s3_ref, b3_ref,
                          o_ref, *, Ho1, Wo1):
    # xp_ref : (4, Hh, Wh, 1)   stride-2 phases of the zero-padded (pad=3) input
    # w1_ref : (49, 192) bf16   merged 7x7 stem weight (im2col-flat)
    # w2_ref : (1728, 128) bf16 ; w3_ref : (1152, 64) bf16
    # s*/b*  : (1, Cout) f32    folded conv-bias + BatchNorm (inference) affine
    # o_ref  : (Ho3, Wo3, 64)

    # ---- merged stem (conv_a | conv_b | conv_c) as ONE im2col matmul --------
    # im2col column t = kh*7 + kw; padded[2i+kh, 2j+kw] == phase[p][i+kh//2, j+kw//2]
    cols = []
    for kh in range(7):
        for kw in range(7):
            p = (kh % 2) * 2 + (kw % 2)
            tap = xp_ref[p, pl.ds(kh // 2, Ho1), pl.ds(kw // 2, Wo1), :]  # (Ho1,Wo1,1)
            cols.append(tap.reshape(Ho1 * Wo1, 1))
    patch1 = jnp.concatenate(cols, axis=-1)                    # (Ho1*Wo1, 49) f32
    y1 = jnp.dot(patch1.astype(jnp.bfloat16), w1_ref[...],
                 preferred_element_type=jnp.float32)           # (Ho1*Wo1, 192)
    y1 = y1 * s1_ref[...] + b1_ref[...]
    y1 = jnp.where(y1 > 0, y1, LEAKY_SLOPE * y1)

    # ---- fused 2x2 max-pool + conv2 (single matmul, K = 9*192 = 1728) -------
    rows1 = _pool2x2_rows(y1, Ho1, Wo1)
    y2, H2, W2 = _conv3x3_s2_p1(rows1, w2_ref[...], s2_ref[...], b2_ref[...])

    # ---- fused 2x2 max-pool + conv3 (single matmul, K = 9*128 = 1152) -------
    rows2 = _pool2x2_rows(y2, H2, W2)
    y3, H3, W3 = _conv3x3_s2_p1(rows2, w3_ref[...], s3_ref[...], b3_ref[...])

    # single store of the final slab (only HBM write of the whole chain)
    for i in range(H3):
        o_ref[i] = y3[i * W3:(i + 1) * W3, :].astype(o_ref.dtype)


# ----------------------------------------------------------------------------
# wrapper: one pallas_call for the whole forward pass
# ----------------------------------------------------------------------------
def light_encoder_forward(x, params):
    """x: (N, H, W, 1) NHWC float32; returns (N, H//16, W//16, 64)."""
    N, H, W, Cin = x.shape
    assert Cin == 1
    # TODO(synk): MaxPool2d floor-mode for odd intermediate sizes not handled;
    #             H and W must be multiples of 16 (true for the module's use).
    assert H % 16 == 0 and W % 16 == 0

    Ho1, Wo1 = H // 2, W // 2                       # stem output (7x7, s2, p3)
    Hp1, Wp1 = Ho1 // 2, Wo1 // 2                   # after pool 1
    Ho2, Wo2 = (Hp1 - 1) // 2 + 1, (Wp1 - 1) // 2 + 1
    Hp2, Wp2 = Ho2 // 2, Wo2 // 2                   # after pool 2
    Ho3, Wo3 = (Hp2 - 1) // 2 + 1, (Wp2 - 1) // 2 + 1

    # ---- one-time tiny prep feeding the single kernel ----
    xp = _phase_split(x, 3)                         # (N, 4, Hh, Wh, 1)
    _, _, Hh, Wh, _ = xp.shape
    w1f, s1, b1 = _fuse_stem_params(params["conv_a"], params["conv_b"],
                                    params["conv_c"])
    w2f = params["conv2"]["w"].reshape(9 * 192, 128).astype(jnp.bfloat16)
    w3f = params["conv3"]["w"].reshape(9 * 128, 64).astype(jnp.bfloat16)
    s2, b2 = params["conv2"]["scale"], params["conv2"]["shift"]
    s3, b3 = params["conv3"]["scale"], params["conv3"]["shift"]

    kernel = functools.partial(_light_encoder_kernel, Ho1=Ho1, Wo1=Wo1)
    return pl.pallas_call(
        kernel,
        out_shape=jax.ShapeDtypeStruct((N, Ho3, Wo3, 64), jnp.float32),
        grid=(N,),
        in_specs=[
            pl.BlockSpec((None, 4, Hh, Wh, 1), lambda n: (n, 0, 0, 0, 0)),
            pl.BlockSpec((49, 192), lambda n: (0, 0)),
            pl.BlockSpec((1, 192), lambda n: (0, 0)),
            pl.BlockSpec((1, 192), lambda n: (0, 0)),
            pl.BlockSpec((9 * 192, 128), lambda n: (0, 0)),
            pl.BlockSpec((1, 128), lambda n: (0, 0)),
            pl.BlockSpec((1, 128), lambda n: (0, 0)),
            pl.BlockSpec((9 * 128, 64), lambda n: (0, 0)),
            pl.BlockSpec((1, 64), lambda n: (0, 0)),
            pl.BlockSpec((1, 64), lambda n: (0, 0)),
        ],
        out_specs=pl.BlockSpec((None, Ho3, Wo3, 64), lambda n: (n, 0, 0, 0)),
        compiler_params=pltpu.CompilerParams(
            dimension_semantics=("parallel",)),     # batch over both v7x TCs
    )(xp, w1f, s1, b1, w2f, s2, b2, w3f, s3, b3)


# ----------------------------------------------------------------------------
# deterministic parameter init (shapes from LightEncoder.__init__)
# ----------------------------------------------------------------------------
def _init_conv_bn(key, cin, cout, k):
    kw_, kb, kg, kbe, km, kv = jax.random.split(key, 6)
    fan_in = cin * k * k
    w = jax.random.normal(kw_, (k, k, cin, cout), jnp.float32) / np.sqrt(fan_in)
    b = 0.1 * jax.random.normal(kb, (cout,), jnp.float32)
    gamma = 1.0 + 0.1 * jax.random.normal(kg, (cout,), jnp.float32)
    beta = 0.1 * jax.random.normal(kbe, (cout,), jnp.float32)
    mean = 0.1 * jax.random.normal(km, (cout,), jnp.float32)
    var = 1.0 + 0.1 * jnp.abs(jax.random.normal(kv, (cout,), jnp.float32))
    scale = gamma / jnp.sqrt(var + BN_EPS)                 # fold BN
    shift = beta + (b - mean) * scale                      # fold conv bias + BN
    return dict(w=w, scale=scale.reshape(1, cout), shift=shift.reshape(1, cout))


def init_params(key):
    ka, kb_, kc, k2, k3 = jax.random.split(key, 5)
    return dict(
        conv_a=_init_conv_bn(ka, 1, 64, 3),      # Conv2d(1, 64, 3, s=2, p=1)
        conv_b=_init_conv_bn(kb_, 1, 64, 5),     # Conv2d(1, 64, 5, s=2, p=2)
        conv_c=_init_conv_bn(kc, 1, 64, 7),      # Conv2d(1, 64, 7, s=2, p=3)
        conv2=_init_conv_bn(k2, 192, 128, 3),    # Conv2d(192, 128, 3, s=2, p=1)
        conv3=_init_conv_bn(k3, 128, 64, 3),     # Conv2d(128, 64, 3, s=2, p=1)
    )


# ----------------------------------------------------------------------------
# pure-JAX reference (same bf16-at-MXU / f32-accumulate numerics as the kernel)
# ----------------------------------------------------------------------------
def _ref_conv_bn_lrelu(x, p, pad):
    y = jax.lax.conv_general_dilated(
        x.astype(jnp.bfloat16), p["w"].astype(jnp.bfloat16),
        window_strides=(2, 2), padding=[(pad, pad), (pad, pad)],
        dimension_numbers=("NHWC", "HWIO", "NHWC"),
        preferred_element_type=jnp.float32)
    y = y * p["scale"].reshape(1, 1, 1, -1) + p["shift"].reshape(1, 1, 1, -1)
    return jnp.where(y > 0, y, LEAKY_SLOPE * y)


def _ref_maxpool(x):
    return jax.lax.reduce_window(x, -jnp.inf, jax.lax.max,
                                 (1, 2, 2, 1), (1, 2, 2, 1), "VALID")


def reference_forward(x, params):
    a = _ref_conv_bn_lrelu(x, params["conv_a"], 1)
    b = _ref_conv_bn_lrelu(x, params["conv_b"], 2)
    c = _ref_conv_bn_lrelu(x, params["conv_c"], 3)
    y = jnp.concatenate([a, b, c], axis=-1)
    y = _ref_maxpool(y)
    y = _ref_conv_bn_lrelu(y, params["conv2"], 1)
    y = _ref_maxpool(y)
    y = _ref_conv_bn_lrelu(y, params["conv3"], 1)
    return y


# ----------------------------------------------------------------------------
if __name__ == "__main__":
    key = jax.random.PRNGKey(0)
    kx, kp = jax.random.split(key)

    N, H, W = 2, 16, 16
    # PyTorch-style NCHW input (input_dimension=1), transposed to NHWC.
    x_nchw = jax.random.normal(kx, (N, 1, H, W), jnp.float32)
    x = jnp.transpose(x_nchw, (0, 2, 3, 1))      # (2, 16, 16, 1)

    params = init_params(kp)

    out = jax.jit(lambda inp: light_encoder_forward(inp, params))(x)
    out = jax.block_until_ready(out)
    assert out.shape == (N, 1, 1, 64), out.shape  # NHWC of PyTorch (N, 64, 1, 1)

    ref = jax.block_until_ready(reference_forward(x, params))
    # bf16 MXU inputs (f32 accumulate) in both paths; tolerance covers the few
    # bf16 rounding-boundary flips that can differ between the two pipelines.
    np.testing.assert_allclose(np.asarray(out), np.asarray(ref),
                               rtol=1e-3, atol=1e-3)

    print("KERNEL_OK")
</pallas_src>

<mosaic_0001>
module attributes {stable_mosaic.version = 11 : i64} {
  func.func @_light_encoder_kernel(%arg0: i32, %arg1: memref<1x4x11x11x1xf32, #tpu.memory_space<vmem>>, %arg2: memref<49x192xbf16, #tpu.memory_space<vmem>>, %arg3: memref<1x192xf32, #tpu.memory_space<vmem>>, %arg4: memref<1x192xf32, #tpu.memory_space<vmem>>, %arg5: memref<1728x128xbf16, #tpu.memory_space<vmem>>, %arg6: memref<1x128xf32, #tpu.memory_space<vmem>>, %arg7: memref<1x128xf32, #tpu.memory_space<vmem>>, %arg8: memref<1152x64xbf16, #tpu.memory_space<vmem>>, %arg9: memref<1x64xf32, #tpu.memory_space<vmem>>, %arg10: memref<1x64xf32, #tpu.memory_space<vmem>>, %arg11: memref<1x1x1x64xf32, #tpu.memory_space<vmem>>) attributes {dimension_semantics = [#tpu.dimension_semantics<parallel>], iteration_bounds = array<i64: 2>, scalar_prefetch = 0 : i64, scratch_operands = 0 : i64, tpu.core_type = #tpu.core_type<tc>, window_params = [{transform_indices = @transform_0, window_bounds = array<i64: 1, 4, 11, 11, 1>}, {pipeline_mode = #tpu.pipeline_mode<synchronous>, transform_indices = @transform_1, window_bounds = array<i64: 49, 192>}, {pipeline_mode = #tpu.pipeline_mode<synchronous>, transform_indices = @transform_2, window_bounds = array<i64: 1, 192>}, {pipeline_mode = #tpu.pipeline_mode<synchronous>, transform_indices = @transform_3, window_bounds = array<i64: 1, 192>}, {pipeline_mode = #tpu.pipeline_mode<synchronous>, transform_indices = @transform_4, window_bounds = array<i64: 1728, 128>}, {pipeline_mode = #tpu.pipeline_mode<synchronous>, transform_indices = @transform_5, window_bounds = array<i64: 1, 128>}, {pipeline_mode = #tpu.pipeline_mode<synchronous>, transform_indices = @transform_6, window_bounds = array<i64: 1, 128>}, {pipeline_mode = #tpu.pipeline_mode<synchronous>, transform_indices = @transform_7, window_bounds = array<i64: 1152, 64>}, {pipeline_mode = #tpu.pipeline_mode<synchronous>, transform_indices = @transform_8, window_bounds = array<i64: 1, 64>}, {pipeline_mode = #tpu.pipeline_mode<synchronous>, transform_indices = @transform_9, window_bounds = array<i64: 1, 64>}, {transform_indices = @transform_10, window_bounds = array<i64: 1, 1, 1, 64>}]} {
    %c0 = arith.constant 0 : index
    %c0_0 = arith.constant 0 : index
    %c0_1 = arith.constant 0 : index
    %c0_2 = arith.constant 0 : index
    %c0_3 = arith.constant 0 : index
    %0 = vector.load %arg1[%c0, %c0_0, %c0_1, %c0_2, %c0_3] : memref<1x4x11x11x1xf32, #tpu.memory_space<vmem>>, vector<1x1x8x8x1xf32>
    %1 = vector.shape_cast %0 : vector<1x1x8x8x1xf32> to vector<8x8x1xf32>
    %2 = vector.shape_cast %1 : vector<8x8x1xf32> to vector<64x1xf32>
    %c0_4 = arith.constant 0 : index
    %c1 = arith.constant 1 : index
    %c0_5 = arith.constant 0 : index
    %c0_6 = arith.constant 0 : index
    %c0_7 = arith.constant 0 : index
    %3 = vector.load %arg1[%c0_4, %c1, %c0_5, %c0_6, %c0_7] : memref<1x4x11x11x1xf32, #tpu.memory_space<vmem>>, vector<1x1x8x8x1xf32>
    %4 = vector.shape_cast %3 : vector<1x1x8x8x1xf32> to vector<8x8x1xf32>
    %5 = vector.shape_cast %4 : vector<8x8x1xf32> to vector<64x1xf32>
    %c0_8 = arith.constant 0 : index
    %c0_9 = arith.constant 0 : index
    %c0_10 = arith.constant 0 : index
    %c1_11 = arith.constant 1 : index
    %c0_12 = arith.constant 0 : index
    %6 = vector.load %arg1[%c0_8, %c0_9, %c0_10, %c1_11, %c0_12] : memref<1x4x11x11x1xf32, #tpu.memory_space<vmem>>, vector<1x1x8x8x1xf32>
    %7 = vector.shape_cast %6 : vector<1x1x8x8x1xf32> to vector<8x8x1xf32>
    %8 = vector.shape_cast %7 : vector<8x8x1xf32> to vector<64x1xf32>
    %c0_13 = arith.constant 0 : index
    %c1_14 = arith.constant 1 : index
    %c0_15 = arith.constant 0 : index
    %c1_16 = arith.constant 1 : index
    %c0_17 = arith.constant 0 : index
    %9 = vector.load %arg1[%c0_13, %c1_14, %c0_15, %c1_16, %c0_17] : memref<1x4x11x11x1xf32, #tpu.memory_space<vmem>>, vector<1x1x8x8x1xf32>
    %10 = vector.shape_cast %9 : vector<1x1x8x8x1xf32> to vector<8x8x1xf32>
    %11 = vector.shape_cast %10 : vector<8x8x1xf32> to vector<64x1xf32>
    %c0_18 = arith.constant 0 : index
    %c0_19 = arith.constant 0 : index
    %c0_20 = arith.constant 0 : index
    %c2 = arith.constant 2 : index
    %c0_21 = arith.constant 0 : index
    %12 = vector.load %arg1[%c0_18, %c0_19, %c0_20, %c2, %c0_21] : memref<1x4x11x11x1xf32, #tpu.memory_space<vmem>>, vector<1x1x8x8x1xf32>
    %13 = vector.shape_cast %12 : vector<1x1x8x8x1xf32> to vector<8x8x1xf32>
    %14 = vector.shape_cast %13 : vector<8x8x1xf32> to vector<64x1xf32>
    %c0_22 = arith.constant 0 : index
    %c1_23 = arith.constant 1 : index
    %c0_24 = arith.constant 0 : index
    %c2_25 = arith.constant 2 : index
    %c0_26 = arith.constant 0 : index
    %15 = vector.load %arg1[%c0_22, %c1_23, %c0_24, %c2_25, %c0_26] : memref<1x4x11x11x1xf32, #tpu.memory_space<vmem>>, vector<1x1x8x8x1xf32>
    %16 = vector.shape_cast %15 : vector<1x1x8x8x1xf32> to vector<8x8x1xf32>
    %17 = vector.shape_cast %16 : vector<8x8x1xf32> to vector<64x1xf32>
    %c0_27 = arith.constant 0 : index
    %c0_28 = arith.constant 0 : index
    %c0_29 = arith.constant 0 : index
    %c3 = arith.constant 3 : index
    %c0_30 = arith.constant 0 : index
    %18 = vector.load %arg1[%c0_27, %c0_28, %c0_29, %c3, %c0_30] : memref<1x4x11x11x1xf32, #tpu.memory_space<vmem>>, vector<1x1x8x8x1xf32>
    %19 = vector.shape_cast %18 : vector<1x1x8x8x1xf32> to vector<8x8x1xf32>
    %20 = vector.shape_cast %19 : vector<8x8x1xf32> to vector<64x1xf32>
    %c0_31 = arith.constant 0 : index
    %c2_32 = arith.constant 2 : index
    %c0_33 = arith.constant 0 : index
    %c0_34 = arith.constant 0 : index
    %c0_35 = arith.constant 0 : index
    %21 = vector.load %arg1[%c0_31, %c2_32, %c0_33, %c0_34, %c0_35] : memref<1x4x11x11x1xf32, #tpu.memory_space<vmem>>, vector<1x1x8x8x1xf32>
    %22 = vector.shape_cast %21 : vector<1x1x8x8x1xf32> to vector<8x8x1xf32>
    %23 = vector.shape_cast %22 : vector<8x8x1xf32> to vector<64x1xf32>
    %c0_36 = arith.constant 0 : index
    %c3_37 = arith.constant 3 : index
    %c0_38 = arith.constant 0 : index
    %c0_39 = arith.constant 0 : index
    %c0_40 = arith.constant 0 : index
    %24 = vector.load %arg1[%c0_36, %c3_37, %c0_38, %c0_39, %c0_40] : memref<1x4x11x11x1xf32, #tpu.memory_space<vmem>>, vector<1x1x8x8x1xf32>
    %25 = vector.shape_cast %24 : vector<1x1x8x8x1xf32> to vector<8x8x1xf32>
    %26 = vector.shape_cast %25 : vector<8x8x1xf32> to vector<64x1xf32>
    %c0_41 = arith.constant 0 : index
    %c2_42 = arith.constant 2 : index
    %c0_43 = arith.constant 0 : index
    %c1_44 = arith.constant 1 : index
    %c0_45 = arith.constant 0 : index
    %27 = vector.load %arg1[%c0_41, %c2_42, %c0_43, %c1_44, %c0_45] : memref<1x4x11x11x1xf32, #tpu.memory_space<vmem>>, vector<1x1x8x8x1xf32>
    %28 = vector.shape_cast %27 : vector<1x1x8x8x1xf32> to vector<8x8x1xf32>
    %29 = vector.shape_cast %28 : vector<8x8x1xf32> to vector<64x1xf32>
    %c0_46 = arith.constant 0 : index
    %c3_47 = arith.constant 3 : index
    %c0_48 = arith.constant 0 : index
    %c1_49 = arith.constant 1 : index
    %c0_50 = arith.constant 0 : index
    %30 = vector.load %arg1[%c0_46, %c3_47, %c0_48, %c1_49, %c0_50] : memref<1x4x11x11x1xf32, #tpu.memory_space<vmem>>, vector<1x1x8x8x1xf32>
    %31 = vector.shape_cast %30 : vector<1x1x8x8x1xf32> to vector<8x8x1xf32>
    %32 = vector.shape_cast %31 : vector<8x8x1xf32> to vector<64x1xf32>
    %c0_51 = arith.constant 0 : index
    %c2_52 = arith.constant 2 : index
    %c0_53 = arith.constant 0 : index
    %c2_54 = arith.constant 2 : index
    %c0_55 = arith.constant 0 : index
    %33 = vector.load %arg1[%c0_51, %c2_52, %c0_53, %c2_54, %c0_55] : memref<1x4x11x11x1xf32, #tpu.memory_space<vmem>>, vector<1x1x8x8x1xf32>
    %34 = vector.shape_cast %33 : vector<1x1x8x8x1xf32> to vector<8x8x1xf32>
    %35 = vector.shape_cast %34 : vector<8x8x1xf32> to vector<64x1xf32>
    %c0_56 = arith.constant 0 : index
    %c3_57 = arith.constant 3 : index
    %c0_58 = arith.constant 0 : index
    %c2_59 = arith.constant 2 : index
    %c0_60 = arith.constant 0 : index
    %36 = vector.load %arg1[%c0_56, %c3_57, %c0_58, %c2_59, %c0_60] : memref<1x4x11x11x1xf32, #tpu.memory_space<vmem>>, vector<1x1x8x8x1xf32>
    %37 = vector.shape_cast %36 : vector<1x1x8x8x1xf32> to vector<8x8x1xf32>
    %38 = vector.shape_cast %37 : vector<8x8x1xf32> to vector<64x1xf32>
    %c0_61 = arith.constant 0 : index
    %c2_62 = arith.constant 2 : index
    %c0_63 = arith.constant 0 : index
    %c3_64 = arith.constant 3 : index
    %c0_65 = arith.constant 0 : index
    %39 = vector.load %arg1[%c0_61, %c2_62, %c0_63, %c3_64, %c0_65] : memref<1x4x11x11x1xf32, #tpu.memory_space<vmem>>, vector<1x1x8x8x1xf32>
    %40 = vector.shape_cast %39 : vector<1x1x8x8x1xf32> to vector<8x8x1xf32>
    %41 = vector.shape_cast %40 : vector<8x8x1xf32> to vector<64x1xf32>
    %c0_66 = arith.constant 0 : index
    %c0_67 = arith.constant 0 : index
    %c1_68 = arith.constant 1 : index
    %c0_69 = arith.constant 0 : index
    %c0_70 = arith.constant 0 : index
    %42 = vector.load %arg1[%c0_66, %c0_67, %c1_68, %c0_69, %c0_70] : memref<1x4x11x11x1xf32, #tpu.memory_space<vmem>>, vector<1x1x8x8x1xf32>
    %43 = vector.shape_cast %42 : vector<1x1x8x8x1xf32> to vector<8x8x1xf32>
    %44 = vector.shape_cast %43 : vector<8x8x1xf32> to vector<64x1xf32>
    %c0_71 = arith.constant 0 : index
    %c1_72 = arith.constant 1 : index
    %c1_73 = arith.constant 1 : index
    %c0_74 = arith.constant 0 : index
    %c0_75 = arith.constant 0 : index
    %45 = vector.load %arg1[%c0_71, %c1_72, %c1_73, %c0_74, %c0_75] : memref<1x4x11x11x1xf32, #tpu.memory_space<vmem>>, vector<1x1x8x8x1xf32>
    %46 = vector.shape_cast %45 : vector<1x1x8x8x1xf32> to vector<8x8x1xf32>
    %47 = vector.shape_cast %46 : vector<8x8x1xf32> to vector<64x1xf32>
    %c0_76 = arith.constant 0 : index
    %c0_77 = arith.constant 0 : index
    %c1_78 = arith.constant 1 : index
    %c1_79 = arith.constant 1 : index
    %c0_80 = arith.constant 0 : index
    %48 = vector.load %arg1[%c0_76, %c0_77, %c1_78, %c1_79, %c0_80] : memref<1x4x11x11x1xf32, #tpu.memory_space<vmem>>, vector<1x1x8x8x1xf32>
    %49 = vector.shape_cast %48 : vector<1x1x8x8x1xf32> to vector<8x8x1xf32>
    %50 = vector.shape_cast %49 : vector<8x8x1xf32> to vector<64x1xf32>
    %c0_81 = arith.constant 0 : index
    %c1_82 = arith.constant 1 : index
    %c1_83 = arith.constant 1 : index
    %c1_84 = arith.constant 1 : index
    %c0_85 = arith.constant 0 : index
    %51 = vector.load %arg1[%c0_81, %c1_82, %c1_83, %c1_84, %c0_85] : memref<1x4x11x11x1xf32, #tpu.memory_space<vmem>>, vector<1x1x8x8x1xf32>
    %52 = vector.shape_cast %51 : vector<1x1x8x8x1xf32> to vector<8x8x1xf32>
    %53 = vector.shape_cast %52 : vector<8x8x1xf32> to vector<64x1xf32>
    %c0_86 = arith.constant 0 : index
    %c0_87 = arith.constant 0 : index
    %c1_88 = arith.constant 1 : index
    %c2_89 = arith.constant 2 : index
    %c0_90 = arith.constant 0 : index
    %54 = vector.load %arg1[%c0_86, %c0_87, %c1_88, %c2_89, %c0_90] : memref<1x4x11x11x1xf32, #tpu.memory_space<vmem>>, vector<1x1x8x8x1xf32>
    %55 = vector.shape_cast %54 : vector<1x1x8x8x1xf32> to vector<8x8x1xf32>
    %56 = vector.shape_cast %55 : vector<8x8x1xf32> to vector<64x1xf32>
    %c0_91 = arith.constant 0 : index
    %c1_92 = arith.constant 1 : index
    %c1_93 = arith.constant 1 : index
    %c2_94 = arith.constant 2 : index
    %c0_95 = arith.constant 0 : index
    %57 = vector.load %arg1[%c0_91, %c1_92, %c1_93, %c2_94, %c0_95] : memref<1x4x11x11x1xf32, #tpu.memory_space<vmem>>, vector<1x1x8x8x1xf32>
    %58 = vector.shape_cast %57 : vector<1x1x8x8x1xf32> to vector<8x8x1xf32>
    %59 = vector.shape_cast %58 : vector<8x8x1xf32> to vector<64x1xf32>
    %c0_96 = arith.constant 0 : index
    %c0_97 = arith.constant 0 : index
    %c1_98 = arith.constant 1 : index
    %c3_99 = arith.constant 3 : index
    %c0_100 = arith.constant 0 : index
    %60 = vector.load %arg1[%c0_96, %c0_97, %c1_98, %c3_99, %c0_100] : memref<1x4x11x11x1xf32, #tpu.memory_space<vmem>>, vector<1x1x8x8x1xf32>
    %61 = vector.shape_cast %60 : vector<1x1x8x8x1xf32> to vector<8x8x1xf32>
    %62 = vector.shape_cast %61 : vector<8x8x1xf32> to vector<64x1xf32>
    %c0_101 = arith.constant 0 : index
    %c2_102 = arith.constant 2 : index
    %c1_103 = arith.constant 1 : index
    %c0_104 = arith.constant 0 : index
    %c0_105 = arith.constant 0 : index
    %63 = vector.load %arg1[%c0_101, %c2_102, %c1_103, %c0_104, %c0_105] : memref<1x4x11x11x1xf32, #tpu.memory_space<vmem>>, vector<1x1x8x8x1xf32>
    %64 = vector.shape_cast %63 : vector<1x1x8x8x1xf32> to vector<8x8x1xf32>
    %65 = vector.shape_cast %64 : vector<8x8x1xf32> to vector<64x1xf32>
    %c0_106 = arith.constant 0 : index
    %c3_107 = arith.constant 3 : index
    %c1_108 = arith.constant 1 : index
    %c0_109 = arith.constant 0 : index
    %c0_110 = arith.constant 0 : index
    %66 = vector.load %arg1[%c0_106, %c3_107, %c1_108, %c0_109, %c0_110] : memref<1x4x11x11x1xf32, #tpu.memory_space<vmem>>, vector<1x1x8x8x1xf32>
    %67 = vector.shape_cast %66 : vector<1x1x8x8x1xf32> to vector<8x8x1xf32>
    %68 = vector.shape_cast %67 : vector<8x8x1xf32> to vector<64x1xf32>
    %c0_111 = arith.constant 0 : index
    %c2_112 = arith.constant 2 : index
    %c1_113 = arith.constant 1 : index
    %c1_114 = arith.constant 1 : index
    %c0_115 = arith.constant 0 : index
    %69 = vector.load %arg1[%c0_111, %c2_112, %c1_113, %c1_114, %c0_115] : memref<1x4x11x11x1xf32, #tpu.memory_space<vmem>>, vector<1x1x8x8x1xf32>
    %70 = vector.shape_cast %69 : vector<1x1x8x8x1xf32> to vector<8x8x1xf32>
    %71 = vector.shape_cast %70 : vector<8x8x1xf32> to vector<64x1xf32>
    %c0_116 = arith.constant 0 : index
    %c3_117 = arith.constant 3 : index
    %c1_118 = arith.constant 1 : index
    %c1_119 = arith.constant 1 : index
    %c0_120 = arith.constant 0 : index
    %72 = vector.load %arg1[%c0_116, %c3_117, %c1_118, %c1_119, %c0_120] : memref<1x4x11x11x1xf32, #tpu.memory_space<vmem>>, vector<1x1x8x8x1xf32>
    %73 = vector.shape_cast %72 : vector<1x1x8x8x1xf32> to vector<8x8x1xf32>
    %74 = vector.shape_cast %73 : vector<8x8x1xf32> to vector<64x1xf32>
    %c0_121 = arith.constant 0 : index
    %c2_122 = arith.constant 2 : index
    %c1_123 = arith.constant 1 : index
    %c2_124 = arith.constant 2 : index
    %c0_125 = arith.constant 0 : index
    %75 = vector.load %arg1[%c0_121, %c2_122, %c1_123, %c2_124, %c0_125] : memref<1x4x11x11x1xf32, #tpu.memory_space<vmem>>, vector<1x1x8x8x1xf32>
    %76 = vector.shape_cast %75 : vector<1x1x8x8x1xf32> to vector<8x8x1xf32>
    %77 = vector.shape_cast %76 : vector<8x8x1xf32> to vector<64x1xf32>
    %c0_126 = arith.constant 0 : index
    %c3_127 = arith.constant 3 : index
    %c1_128 = arith.constant 1 : index
    %c2_129 = arith.constant 2 : index
    %c0_130 = arith.constant 0 : index
    %78 = vector.load %arg1[%c0_126, %c3_127, %c1_128, %c2_129, %c0_130] : memref<1x4x11x11x1xf32, #tpu.memory_space<vmem>>, vector<1x1x8x8x1xf32>
    %79 = vector.shape_cast %78 : vector<1x1x8x8x1xf32> to vector<8x8x1xf32>
    %80 = vector.shape_cast %79 : vector<8x8x1xf32> to vector<64x1xf32>
    %c0_131 = arith.constant 0 : index
    %c2_132 = arith.constant 2 : index
    %c1_133 = arith.constant 1 : index
    %c3_134 = arith.constant 3 : index
    %c0_135 = arith.constant 0 : index
    %81 = vector.load %arg1[%c0_131, %c2_132, %c1_133, %c3_134, %c0_135] : memref<1x4x11x11x1xf32, #tpu.memory_space<vmem>>, vector<1x1x8x8x1xf32>
    %82 = vector.shape_cast %81 : vector<1x1x8x8x1xf32> to vector<8x8x1xf32>
    %83 = vector.shape_cast %82 : vector<8x8x1xf32> to vector<64x1xf32>
    %c0_136 = arith.constant 0 : index
    %c0_137 = arith.constant 0 : index
    %c2_138 = arith.constant 2 : index
    %c0_139 = arith.constant 0 : index
    %c0_140 = arith.constant 0 : index
    %84 = vector.load %arg1[%c0_136, %c0_137, %c2_138, %c0_139, %c0_140] : memref<1x4x11x11x1xf32, #tpu.memory_space<vmem>>, vector<1x1x8x8x1xf32>
    %85 = vector.shape_cast %84 : vector<1x1x8x8x1xf32> to vector<8x8x1xf32>
    %86 = vector.shape_cast %85 : vector<8x8x1xf32> to vector<64x1xf32>
    %c0_141 = arith.constant 0 : index
    %c1_142 = arith.constant 1 : index
    %c2_143 = arith.constant 2 : index
    %c0_144 = arith.constant 0 : index
    %c0_145 = arith.constant 0 : index
    %87 = vector.load %arg1[%c0_141, %c1_142, %c2_143, %c0_144, %c0_145] : memref<1x4x11x11x1xf32, #tpu.memory_space<vmem>>, vector<1x1x8x8x1xf32>
    %88 = vector.shape_cast %87 : vector<1x1x8x8x1xf32> to vector<8x8x1xf32>
    %89 = vector.shape_cast %88 : vector<8x8x1xf32> to vector<64x1xf32>
    %c0_146 = arith.constant 0 : index
    %c0_147 = arith.constant 0 : index
    %c2_148 = arith.constant 2 : index
    %c1_149 = arith.constant 1 : index
    %c0_150 = arith.constant 0 : index
    %90 = vector.load %arg1[%c0_146, %c0_147, %c2_148, %c1_149, %c0_150] : memref<1x4x11x11x1xf32, #tpu.memory_space<vmem>>, vector<1x1x8x8x1xf32>
    %91 = vector.shape_cast %90 : vector<1x1x8x8x1xf32> to vector<8x8x1xf32>
    %92 = vector.shape_cast %91 : vector<8x8x1xf32> to vector<64x1xf32>
    %c0_151 = arith.constant 0 : index
    %c1_152 = arith.constant 1 : index
    %c2_153 = arith.constant 2 : index
    %c1_154 = arith.constant 1 : index
    %c0_155 = arith.constant 0 : index
    %93 = vector.load %arg1[%c0_151, %c1_152, %c2_153, %c1_154, %c0_155] : memref<1x4x11x11x1xf32, #tpu.memory_space<vmem>>, vector<1x1x8x8x1xf32>
    %94 = vector.shape_cast %93 : vector<1x1x8x8x1xf32> to vector<8x8x1xf32>
    %95 = vector.shape_cast %94 : vector<8x8x1xf32> to vector<64x1xf32>
    %c0_156 = arith.constant 0 : index
    %c0_157 = arith.constant 0 : index
    %c2_158 = arith.constant 2 : index
    %c2_159 = arith.constant 2 : index
    %c0_160 = arith.constant 0 : index
    %96 = vector.load %arg1[%c0_156, %c0_157, %c2_158, %c2_159, %c0_160] : memref<1x4x11x11x1xf32, #tpu.memory_space<vmem>>, vector<1x1x8x8x1xf32>
    %97 = vector.shape_cast %96 : vector<1x1x8x8x1xf32> to vector<8x8x1xf32>
    %98 = vector.shape_cast %97 : vector<8x8x1xf32> to vector<64x1xf32>
    %c0_161 = arith.constant 0 : index
    %c1_162 = arith.constant 1 : index
    %c2_163 = arith.constant 2 : index
    %c2_164 = arith.constant 2 : index
    %c0_165 = arith.constant 0 : index
    %99 = vector.load %arg1[%c0_161, %c1_162, %c2_163, %c2_164, %c0_165] : memref<1x4x11x11x1xf32, #tpu.memory_space<vmem>>, vector<1x1x8x8x1xf32>
    %100 = vector.shape_cast %99 : vector<1x1x8x8x1xf32> to vector<8x8x1xf32>
    %101 = vector.shape_cast %100 : vector<8x8x1xf32> to vector<64x1xf32>
    %c0_166 = arith.constant 0 : index
    %c0_167 = arith.constant 0 : index
    %c2_168 = arith.constant 2 : index
    %c3_169 = arith.constant 3 : index
    %c0_170 = arith.constant 0 : index
    %102 = vector.load %arg1[%c0_166, %c0_167, %c2_168, %c3_169, %c0_170] : memref<1x4x11x11x1xf32, #tpu.memory_space<vmem>>, vector<1x1x8x8x1xf32>
    %103 = vector.shape_cast %102 : vector<1x1x8x8x1xf32> to vector<8x8x1xf32>
    %104 = vector.shape_cast %103 : vector<8x8x1xf32> to vector<64x1xf32>
    %c0_171 = arith.constant 0 : index
    %c2_172 = arith.constant 2 : index
    %c2_173 = arith.constant 2 : index
    %c0_174 = arith.constant 0 : index
    %c0_175 = arith.constant 0 : index
    %105 = vector.load %arg1[%c0_171, %c2_172, %c2_173, %c0_174, %c0_175] : memref<1x4x11x11x1xf32, #tpu.memory_space<vmem>>, vector<1x1x8x8x1xf32>
    %106 = vector.shape_cast %105 : vector<1x1x8x8x1xf32> to vector<8x8x1xf32>
    %107 = vector.shape_cast %106 : vector<8x8x1xf32> to vector<64x1xf32>
    %c0_176 = arith.constant 0 : index
    %c3_177 = arith.constant 3 : index
    %c2_178 = arith.constant 2 : index
    %c0_179 = arith.constant 0 : index
    %c0_180 = arith.constant 0 : index
    %108 = vector.load %arg1[%c0_176, %c3_177, %c2_178, %c0_179, %c0_180] : memref<1x4x11x11x1xf32, #tpu.memory_space<vmem>>, vector<1x1x8x8x1xf32>
    %109 = vector.shape_cast %108 : vector<1x1x8x8x1xf32> to vector<8x8x1xf32>
    %110 = vector.shape_cast %109 : vector<8x8x1xf32> to vector<64x1xf32>
    %c0_181 = arith.constant 0 : index
    %c2_182 = arith.constant 2 : index
    %c2_183 = arith.constant 2 : index
    %c1_184 = arith.constant 1 : index
    %c0_185 = arith.constant 0 : index
    %111 = vector.load %arg1[%c0_181, %c2_182, %c2_183, %c1_184, %c0_185] : memref<1x4x11x11x1xf32, #tpu.memory_space<vmem>>, vector<1x1x8x8x1xf32>
    %112 = vector.shape_cast %111 : vector<1x1x8x8x1xf32> to vector<8x8x1xf32>
    %113 = vector.shape_cast %112 : vector<8x8x1xf32> to vector<64x1xf32>
    %c0_186 = arith.constant 0 : index
    %c3_187 = arith.constant 3 : index
    %c2_188 = arith.constant 2 : index
    %c1_189 = arith.constant 1 : index
    %c0_190 = arith.constant 0 : index
    %114 = vector.load %arg1[%c0_186, %c3_187, %c2_188, %c1_189, %c0_190] : memref<1x4x11x11x1xf32, #tpu.memory_space<vmem>>, vector<1x1x8x8x1xf32>
    %115 = vector.shape_cast %114 : vector<1x1x8x8x1xf32> to vector<8x8x1xf32>
    %116 = vector.shape_cast %115 : vector<8x8x1xf32> to vector<64x1xf32>
    %c0_191 = arith.constant 0 : index
    %c2_192 = arith.constant 2 : index
    %c2_193 = arith.constant 2 : index
    %c2_194 = arith.constant 2 : index
    %c0_195 = arith.constant 0 : index
    %117 = vector.load %arg1[%c0_191, %c2_192, %c2_193, %c2_194, %c0_195] : memref<1x4x11x11x1xf32, #tpu.memory_space<vmem>>, vector<1x1x8x8x1xf32>
    %118 = vector.shape_cast %117 : vector<1x1x8x8x1xf32> to vector<8x8x1xf32>
    %119 = vector.shape_cast %118 : vector<8x8x1xf32> to vector<64x1xf32>
    %c0_196 = arith.constant 0 : index
    %c3_197 = arith.constant 3 : index
    %c2_198 = arith.constant 2 : index
    %c2_199 = arith.constant 2 : index
    %c0_200 = arith.constant 0 : index
    %120 = vector.load %arg1[%c0_196, %c3_197, %c2_198, %c2_199, %c0_200] : memref<1x4x11x11x1xf32, #tpu.memory_space<vmem>>, vector<1x1x8x8x1xf32>
    %121 = vector.shape_cast %120 : vector<1x1x8x8x1xf32> to vector<8x8x1xf32>
    %122 = vector.shape_cast %121 : vector<8x8x1xf32> to vector<64x1xf32>
    %c0_201 = arith.constant 0 : index
    %c2_202 = arith.constant 2 : index
    %c2_203 = arith.constant 2 : index
    %c3_204 = arith.constant 3 : index
    %c0_205 = arith.constant 0 : index
    %123 = vector.load %arg1[%c0_201, %c2_202, %c2_203, %c3_204, %c0_205] : memref<1x4x11x11x1xf32, #tpu.memory_space<vmem>>, vector<1x1x8x8x1xf32>
    %124 = vector.shape_cast %123 : vector<1x1x8x8x1xf32> to vector<8x8x1xf32>
    %125 = vector.shape_cast %124 : vector<8x8x1xf32> to vector<64x1xf32>
    %c0_206 = arith.constant 0 : index
    %c0_207 = arith.constant 0 : index
    %c3_208 = arith.constant 3 : index
    %c0_209 = arith.constant 0 : index
    %c0_210 = arith.constant 0 : index
    %126 = vector.load %arg1[%c0_206, %c0_207, %c3_208, %c0_209, %c0_210] : memref<1x4x11x11x1xf32, #tpu.memory_space<vmem>>, vector<1x1x8x8x1xf32>
    %127 = vector.shape_cast %126 : vector<1x1x8x8x1xf32> to vector<8x8x1xf32>
    %128 = vector.shape_cast %127 : vector<8x8x1xf32> to vector<64x1xf32>
    %c0_211 = arith.constant 0 : index
    %c1_212 = arith.constant 1 : index
    %c3_213 = arith.constant 3 : index
    %c0_214 = arith.constant 0 : index
    %c0_215 = arith.constant 0 : index
    %129 = vector.load %arg1[%c0_211, %c1_212, %c3_213, %c0_214, %c0_215] : memref<1x4x11x11x1xf32, #tpu.memory_space<vmem>>, vector<1x1x8x8x1xf32>
    %130 = vector.shape_cast %129 : vector<1x1x8x8x1xf32> to vector<8x8x1xf32>
    %131 = vector.shape_cast %130 : vector<8x8x1xf32> to vector<64x1xf32>
    %c0_216 = arith.constant 0 : index
    %c0_217 = arith.constant 0 : index
    %c3_218 = arith.constant 3 : index
    %c1_219 = arith.constant 1 : index
    %c0_220 = arith.constant 0 : index
    %132 = vector.load %arg1[%c0_216, %c0_217, %c3_218, %c1_219, %c0_220] : memref<1x4x11x11x1xf32, #tpu.memory_space<vmem>>, vector<1x1x8x8x1xf32>
    %133 = vector.shape_cast %132 : vector<1x1x8x8x1xf32> to vector<8x8x1xf32>
    %134 = vector.shape_cast %133 : vector<8x8x1xf32> to vector<64x1xf32>
    %c0_221 = arith.constant 0 : index
    %c1_222 = arith.constant 1 : index
    %c3_223 = arith.constant 3 : index
    %c1_224 = arith.constant 1 : index
    %c0_225 = arith.constant 0 : index
    %135 = vector.load %arg1[%c0_221, %c1_222, %c3_223, %c1_224, %c0_225] : memref<1x4x11x11x1xf32, #tpu.memory_space<vmem>>, vector<1x1x8x8x1xf32>
    %136 = vector.shape_cast %135 : vector<1x1x8x8x1xf32> to vector<8x8x1xf32>
    %137 = vector.shape_cast %136 : vector<8x8x1xf32> to vector<64x1xf32>
    %c0_226 = arith.constant 0 : index
    %c0_227 = arith.constant 0 : index
    %c3_228 = arith.constant 3 : index
    %c2_229 = arith.constant 2 : index
    %c0_230 = arith.constant 0 : index
    %138 = vector.load %arg1[%c0_226, %c0_227, %c3_228, %c2_229, %c0_230] : memref<1x4x11x11x1xf32, #tpu.memory_space<vmem>>, vector<1x1x8x8x1xf32>
    %139 = vector.shape_cast %138 : vector<1x1x8x8x1xf32> to vector<8x8x1xf32>
    %140 = vector.shape_cast %139 : vector<8x8x1xf32> to vector<64x1xf32>
    %c0_231 = arith.constant 0 : index
    %c1_232 = arith.constant 1 : index
    %c3_233 = arith.constant 3 : index
    %c2_234 = arith.constant 2 : index
    %c0_235 = arith.constant 0 : index
    %141 = vector.load %arg1[%c0_231, %c1_232, %c3_233, %c2_234, %c0_235] : memref<1x4x11x11x1xf32, #tpu.memory_space<vmem>>, vector<1x1x8x8x1xf32>
    %142 = vector.shape_cast %141 : vector<1x1x8x8x1xf32> to vector<8x8x1xf32>
    %143 = vector.shape_cast %142 : vector<8x8x1xf32> to vector<64x1xf32>
    %c0_236 = arith.constant 0 : index
    %c0_237 = arith.constant 0 : index
    %c3_238 = arith.constant 3 : index
    %c3_239 = arith.constant 3 : index
    %c0_240 = arith.constant 0 : index
    %144 = vector.load %arg1[%c0_236, %c0_237, %c3_238, %c3_239, %c0_240] : memref<1x4x11x11x1xf32, #tpu.memory_space<vmem>>, vector<1x1x8x8x1xf32>
    %145 = vector.shape_cast %144 : vector<1x1x8x8x1xf32> to vector<8x8x1xf32>
    %146 = vector.shape_cast %145 : vector<8x8x1xf32> to vector<64x1xf32>
    %147 = tpu.concatenate %2, %5, %8, %11, %14, %17, %20, %23, %26, %29, %32, %35, %38, %41, %44, %47 in 1 : vector<64x1xf32>, vector<64x1xf32>, vector<64x1xf32>, vector<64x1xf32>, vector<64x1xf32>, vector<64x1xf32>, vector<64x1xf32>, vector<64x1xf32>, vector<64x1xf32>, vector<64x1xf32>, vector<64x1xf32>, vector<64x1xf32>, vector<64x1xf32>, vector<64x1xf32>, vector<64x1xf32>, vector<64x1xf32> -> vector<64x16xf32>
    %148 = tpu.concatenate %50, %53, %56, %59, %62, %65, %68, %71, %74, %77, %80, %83, %86, %89, %92, %95 in 1 : vector<64x1xf32>, vector<64x1xf32>, vector<64x1xf32>, vector<64x1xf32>, vector<64x1xf32>, vector<64x1xf32>, vector<64x1xf32>, vector<64x1xf32>, vector<64x1xf32>, vector<64x1xf32>, vector<64x1xf32>, vector<64x1xf32>, vector<64x1xf32>, vector<64x1xf32>, vector<64x1xf32>, vector<64x1xf32> -> vector<64x16xf32>
    %149 = tpu.concatenate %98, %101, %104, %107, %110, %113, %116, %119, %122, %125, %128, %131, %134, %137, %140, %143 in 1 : vector<64x1xf32>, vector<64x1xf32>, vector<64x1xf32>, vector<64x1xf32>, vector<64x1xf32>, vector<64x1xf32>, vector<64x1xf32>, vector<64x1xf32>, vector<64x1xf32>, vector<64x1xf32>, vector<64x1xf32>, vector<64x1xf32>, vector<64x1xf32>, vector<64x1xf32>, vector<64x1xf32>, vector<64x1xf32> -> vector<64x16xf32>
    %150 = tpu.concatenate %147, %148, %149, %146 in 1 : vector<64x16xf32>, vector<64x16xf32>, vector<64x16xf32>, vector<64x1xf32> -> vector<64x49xf32>
    %151 = arith.truncf %150 : vector<64x49xf32> to vector<64x49xbf16>
    %c0_241 = arith.constant 0 : index
    %c0_242 = arith.constant 0 : index
    %152 = vector.load %arg2[%c0_241, %c0_242] : memref<49x192xbf16, #tpu.memory_space<vmem>>, vector<49x192xbf16>
    %cst = arith.constant dense<0.000000e+00> : vector<64x192xf32>
    %153 = tpu.matmul %151, %152, %cst {dimension_numbers = #tpu.dot_dimension_numbers<[1], [0], [0], [1], [0, 0, 1, 1], [], []>} : vector<64x49xbf16>, vector<49x192xbf16>, vector<64x192xf32> -> vector<64x192xf32>
    %c0_243 = arith.constant 0 : index
    %c0_244 = arith.constant 0 : index
    %154 = vector.load %arg3[%c0_243, %c0_244] : memref<1x192xf32, #tpu.memory_space<vmem>>, vector<1x192xf32>
    %155 = vector.broadcast %154 : vector<1x192xf32> to vector<64x192xf32>
    %156 = arith.mulf %153, %155 : vector<64x192xf32>
    %c0_245 = arith.constant 0 : index
    %c0_246 = arith.constant 0 : index
    %157 = vector.load %arg4[%c0_245, %c0_246] : memref<1x192xf32, #tpu.memory_space<vmem>>, vector<1x192xf32>
    %158 = vector.broadcast %157 : vector<1x192xf32> to vector<64x192xf32>
    %159 = arith.addf %156, %158 : vector<64x192xf32>
    %cst_247 = arith.constant 0.000000e+00 : f32
    %160 = vector.broadcast %cst_247 : f32 to vector<64x192xf32>
    %161 = arith.cmpf ogt, %159, %160 : vector<64x192xf32>
    %cst_248 = arith.constant 0.00999999977 : f32
    %162 = vector.broadcast %cst_248 : f32 to vector<64x192xf32>
    %163 = arith.mulf %162, %159 : vector<64x192xf32>
    %164 = arith.select %161, %159, %163 : vector<64x192xi1>, vector<64x192xf32>
    %165 = vector.extract_strided_slice %164 {offsets = [0, 0], sizes = [1, 192], strides = [1, 1]} : vector<64x192xf32> to vector<1x192xf32>
    %166 = vector.extract_strided_slice %164 {offsets = [1, 0], sizes = [1, 192], strides = [1, 1]} : vector<64x192xf32> to vector<1x192xf32>
    %167 = arith.maximumf %165, %166 : vector<1x192xf32>
    %168 = vector.extract_strided_slice %164 {offsets = [8, 0], sizes = [1, 192], strides = [1, 1]} : vector<64x192xf32> to vector<1x192xf32>
    %169 = vector.extract_strided_slice %164 {offsets = [9, 0], sizes = [1, 192], strides = [1, 1]} : vector<64x192xf32> to vector<1x192xf32>
    %170 = arith.maximumf %168, %169 : vector<1x192xf32>
    %171 = arith.maximumf %167, %170 : vector<1x192xf32>
    %172 = vector.extract_strided_slice %164 {offsets = [2, 0], sizes = [1, 192], strides = [1, 1]} : vector<64x192xf32> to vector<1x192xf32>
    %173 = vector.extract_strided_slice %164 {offsets = [3, 0], sizes = [1, 192], strides = [1, 1]} : vector<64x192xf32> to vector<1x192xf32>
    %174 = arith.maximumf %172, %173 : vector<1x192xf32>
    %175 = vector.extract_strided_slice %164 {offsets = [10, 0], sizes = [1, 192], strides = [1, 1]} : vector<64x192xf32> to vector<1x192xf32>
    %176 = vector.extract_strided_slice %164 {offsets = [11, 0], sizes = [1, 192], strides = [1, 1]} : vector<64x192xf32> to vector<1x192xf32>
    %177 = arith.maximumf %175, %176 : vector<1x192xf32>
    %178 = arith.maximumf %174, %177 : vector<1x192xf32>
    %179 = vector.extract_strided_slice %164 {offsets = [4, 0], sizes = [1, 192], strides = [1, 1]} : vector<64x192xf32> to vector<1x192xf32>
    %180 = vector.extract_strided_slice %164 {offsets = [5, 0], sizes = [1, 192], strides = [1, 1]} : vector<64x192xf32> to vector<1x192xf32>
    %181 = arith.maximumf %179, %180 : vector<1x192xf32>
    %182 = vector.extract_strided_slice %164 {offsets = [12, 0], sizes = [1, 192], strides = [1, 1]} : vector<64x192xf32> to vector<1x192xf32>
    %183 = vector.extract_strided_slice %164 {offsets = [13, 0], sizes = [1, 192], strides = [1, 1]} : vector<64x192xf32> to vector<1x192xf32>
    %184 = arith.maximumf %182, %183 : vector<1x192xf32>
    %185 = arith.maximumf %181, %184 : vector<1x192xf32>
    %186 = vector.extract_strided_slice %164 {offsets = [6, 0], sizes = [1, 192], strides = [1, 1]} : vector<64x192xf32> to vector<1x192xf32>
    %187 = vector.extract_strided_slice %164 {offsets = [7, 0], sizes = [1, 192], strides = [1, 1]} : vector<64x192xf32> to vector<1x192xf32>
    %188 = arith.maximumf %186, %187 : vector<1x192xf32>
    %189 = vector.extract_strided_slice %164 {offsets = [14, 0], sizes = [1, 192], strides = [1, 1]} : vector<64x192xf32> to vector<1x192xf32>
    %190 = vector.extract_strided_slice %164 {offsets = [15, 0], sizes = [1, 192], strides = [1, 1]} : vector<64x192xf32> to vector<1x192xf32>
    %191 = arith.maximumf %189, %190 : vector<1x192xf32>
    %192 = arith.maximumf %188, %191 : vector<1x192xf32>
    %193 = vector.extract_strided_slice %164 {offsets = [16, 0], sizes = [1, 192], strides = [1, 1]} : vector<64x192xf32> to vector<1x192xf32>
    %194 = vector.extract_strided_slice %164 {offsets = [17, 0], sizes = [1, 192], strides = [1, 1]} : vector<64x192xf32> to vector<1x192xf32>
    %195 = arith.maximumf %193, %194 : vector<1x192xf32>
    %196 = vector.extract_strided_slice %164 {offsets = [24, 0], sizes = [1, 192], strides = [1, 1]} : vector<64x192xf32> to vector<1x192xf32>
    %197 = vector.extract_strided_slice %164 {offsets = [25, 0], sizes = [1, 192], strides = [1, 1]} : vector<64x192xf32> to vector<1x192xf32>
    %198 = arith.maximumf %196, %197 : vector<1x192xf32>
    %199 = arith.maximumf %195, %198 : vector<1x192xf32>
    %200 = vector.extract_strided_slice %164 {offsets = [18, 0], sizes = [1, 192], strides = [1, 1]} : vector<64x192xf32> to vector<1x192xf32>
    %201 = vector.extract_strided_slice %164 {offsets = [19, 0], sizes = [1, 192], strides = [1, 1]} : vector<64x192xf32> to vector<1x192xf32>
    %202 = arith.maximumf %200, %201 : vector<1x192xf32>
    %203 = vector.extract_strided_slice %164 {offsets = [26, 0], sizes = [1, 192], strides = [1, 1]} : vector<64x192xf32> to vector<1x192xf32>
    %204 = vector.extract_strided_slice %164 {offsets = [27, 0], sizes = [1, 192], strides = [1, 1]} : vector<64x192xf32> to vector<1x192xf32>
    %205 = arith.maximumf %203, %204 : vector<1x192xf32>
    %206 = arith.maximumf %202, %205 : vector<1x192xf32>
    %207 = vector.extract_strided_slice %164 {offsets = [20, 0], sizes = [1, 192], strides = [1, 1]} : vector<64x192xf32> to vector<1x192xf32>
    %208 = vector.extract_strided_slice %164 {offsets = [21, 0], sizes = [1, 192], strides = [1, 1]} : vector<64x192xf32> to vector<1x192xf32>
    %209 = arith.maximumf %207, %208 : vector<1x192xf32>
    %210 = vector.extract_strided_slice %164 {offsets = [28, 0], sizes = [1, 192], strides = [1, 1]} : vector<64x192xf32> to vector<1x192xf32>
    %211 = vector.extract_strided_slice %164 {offsets = [29, 0], sizes = [1, 192], strides = [1, 1]} : vector<64x192xf32> to vector<1x192xf32>
    %212 = arith.maximumf %210, %211 : vector<1x192xf32>
    %213 = arith.maximumf %209, %212 : vector<1x192xf32>
    %214 = vector.extract_strided_slice %164 {offsets = [22, 0], sizes = [1, 192], strides = [1, 1]} : vector<64x192xf32> to vector<1x192xf32>
    %215 = vector.extract_strided_slice %164 {offsets = [23, 0], sizes = [1, 192], strides = [1, 1]} : vector<64x192xf32> to vector<1x192xf32>
    %216 = arith.maximumf %214, %215 : vector<1x192xf32>
    %217 = vector.extract_strided_slice %164 {offsets = [30, 0], sizes = [1, 192], strides = [1, 1]} : vector<64x192xf32> to vector<1x192xf32>
    %218 = vector.extract_strided_slice %164 {offsets = [31, 0], sizes = [1, 192], strides = [1, 1]} : vector<64x192xf32> to vector<1x192xf32>
    %219 = arith.maximumf %217, %218 : vector<1x192xf32>
    %220 = arith.maximumf %216, %219 : vector<1x192xf32>
    %221 = vector.extract_strided_slice %164 {offsets = [32, 0], sizes = [1, 192], strides = [1, 1]} : vector<64x192xf32> to vector<1x192xf32>
    %222 = vector.extract_strided_slice %164 {offsets = [33, 0], sizes = [1, 192], strides = [1, 1]} : vector<64x192xf32> to vector<1x192xf32>
    %223 = arith.maximumf %221, %222 : vector<1x192xf32>
    %224 = vector.extract_strided_slice %164 {offsets = [40, 0], sizes = [1, 192], strides = [1, 1]} : vector<64x192xf32> to vector<1x192xf32>
    %225 = vector.extract_strided_slice %164 {offsets = [41, 0], sizes = [1, 192], strides = [1, 1]} : vector<64x192xf32> to vector<1x192xf32>
    %226 = arith.maximumf %224, %225 : vector<1x192xf32>
    %227 = arith.maximumf %223, %226 : vector<1x192xf32>
    %228 = vector.extract_strided_slice %164 {offsets = [34, 0], sizes = [1, 192], strides = [1, 1]} : vector<64x192xf32> to vector<1x192xf32>
    %229 = vector.extract_strided_slice %164 {offsets = [35, 0], sizes = [1, 192], strides = [1, 1]} : vector<64x192xf32> to vector<1x192xf32>
    %230 = arith.maximumf %228, %229 : vector<1x192xf32>
    %231 = vector.extract_strided_slice %164 {offsets = [42, 0], sizes = [1, 192], strides = [1, 1]} : vector<64x192xf32> to vector<1x192xf32>
    %232 = vector.extract_strided_slice %164 {offsets = [43, 0], sizes = [1, 192], strides = [1, 1]} : vector<64x192xf32> to vector<1x192xf32>
    %233 = arith.maximumf %231, %232 : vector<1x192xf32>
    %234 = arith.maximumf %230, %233 : vector<1x192xf32>
    %235 = vector.extract_strided_slice %164 {offsets = [36, 0], sizes = [1, 192], strides = [1, 1]} : vector<64x192xf32> to vector<1x192xf32>
    %236 = vector.extract_strided_slice %164 {offsets = [37, 0], sizes = [1, 192], strides = [1, 1]} : vector<64x192xf32> to vector<1x192xf32>
    %237 = arith.maximumf %235, %236 : vector<1x192xf32>
    %238 = vector.extract_strided_slice %164 {offsets = [44, 0], sizes = [1, 192], strides = [1, 1]} : vector<64x192xf32> to vector<1x192xf32>
    %239 = vector.extract_strided_slice %164 {offsets = [45, 0], sizes = [1, 192], strides = [1, 1]} : vector<64x192xf32> to vector<1x192xf32>
    %240 = arith.maximumf %238, %239 : vector<1x192xf32>
    %241 = arith.maximumf %237, %240 : vector<1x192xf32>
    %242 = vector.extract_strided_slice %164 {offsets = [38, 0], sizes = [1, 192], strides = [1, 1]} : vector<64x192xf32> to vector<1x192xf32>
    %243 = vector.extract_strided_slice %164 {offsets = [39, 0], sizes = [1, 192], strides = [1, 1]} : vector<64x192xf32> to vector<1x192xf32>
    %244 = arith.maximumf %242, %243 : vector<1x192xf32>
    %245 = vector.extract_strided_slice %164 {offsets = [46, 0], sizes = [1, 192], strides = [1, 1]} : vector<64x192xf32> to vector<1x192xf32>
    %246 = vector.extract_strided_slice %164 {offsets = [47, 0], sizes = [1, 192], strides = [1, 1]} : vector<64x192xf32> to vector<1x192xf32>
    %247 = arith.maximumf %245, %246 : vector<1x192xf32>
    %248 = arith.maximumf %244, %247 : vector<1x192xf32>
    %249 = vector.extract_strided_slice %164 {offsets = [48, 0], sizes = [1, 192], strides = [1, 1]} : vector<64x192xf32> to vector<1x192xf32>
    %250 = vector.extract_strided_slice %164 {offsets = [49, 0], sizes = [1, 192], strides = [1, 1]} : vector<64x192xf32> to vector<1x192xf32>
    %251 = arith.maximumf %249, %250 : vector<1x192xf32>
    %252 = vector.extract_strided_slice %164 {offsets = [56, 0], sizes = [1, 192], strides = [1, 1]} : vector<64x192xf32> to vector<1x192xf32>
    %253 = vector.extract_strided_slice %164 {offsets = [57, 0], sizes = [1, 192], strides = [1, 1]} : vector<64x192xf32> to vector<1x192xf32>
    %254 = arith.maximumf %252, %253 : vector<1x192xf32>
    %255 = arith.maximumf %251, %254 : vector<1x192xf32>
    %256 = vector.extract_strided_slice %164 {offsets = [50, 0], sizes = [1, 192], strides = [1, 1]} : vector<64x192xf32> to vector<1x192xf32>
    %257 = vector.extract_strided_slice %164 {offsets = [51, 0], sizes = [1, 192], strides = [1, 1]} : vector<64x192xf32> to vector<1x192xf32>
    %258 = arith.maximumf %256, %257 : vector<1x192xf32>
    %259 = vector.extract_strided_slice %164 {offsets = [58, 0], sizes = [1, 192], strides = [1, 1]} : vector<64x192xf32> to vector<1x192xf32>
    %260 = vector.extract_strided_slice %164 {offsets = [59, 0], sizes = [1, 192], strides = [1, 1]} : vector<64x192xf32> to vector<1x192xf32>
    %261 = arith.maximumf %259, %260 : vector<1x192xf32>
    %262 = arith.maximumf %258, %261 : vector<1x192xf32>
    %263 = vector.extract_strided_slice %164 {offsets = [52, 0], sizes = [1, 192], strides = [1, 1]} : vector<64x192xf32> to vector<1x192xf32>
    %264 = vector.extract_strided_slice %164 {offsets = [53, 0], sizes = [1, 192], strides = [1, 1]} : vector<64x192xf32> to vector<1x192xf32>
    %265 = arith.maximumf %263, %264 : vector<1x192xf32>
    %266 = vector.extract_strided_slice %164 {offsets = [60, 0], sizes = [1, 192], strides = [1, 1]} : vector<64x192xf32> to vector<1x192xf32>
    %267 = vector.extract_strided_slice %164 {offsets = [61, 0], sizes = [1, 192], strides = [1, 1]} : vector<64x192xf32> to vector<1x192xf32>
    %268 = arith.maximumf %266, %267 : vector<1x192xf32>
    %269 = arith.maximumf %265, %268 : vector<1x192xf32>
    %270 = vector.extract_strided_slice %164 {offsets = [54, 0], sizes = [1, 192], strides = [1, 1]} : vector<64x192xf32> to vector<1x192xf32>
    %271 = vector.extract_strided_slice %164 {offsets = [55, 0], sizes = [1, 192], strides = [1, 1]} : vector<64x192xf32> to vector<1x192xf32>
    %272 = arith.maximumf %270, %271 : vector<1x192xf32>
    %273 = vector.extract_strided_slice %164 {offsets = [62, 0], sizes = [1, 192], strides = [1, 1]} : vector<64x192xf32> to vector<1x192xf32>
    %274 = vector.extract_strided_slice %164 {offsets = [63, 0], sizes = [1, 192], strides = [1, 1]} : vector<64x192xf32> to vector<1x192xf32>
    %275 = arith.maximumf %273, %274 : vector<1x192xf32>
    %276 = arith.maximumf %272, %275 : vector<1x192xf32>
    %c0_249 = arith.constant 0 : index
    %c0_250 = arith.constant 0 : index
    %277 = vector.load %arg5[%c0_249, %c0_250] : memref<1728x128xbf16, #tpu.memory_space<vmem>>, vector<1728x128xbf16>
    %c0_251 = arith.constant 0 : index
    %c0_252 = arith.constant 0 : index
    %278 = vector.load %arg6[%c0_251, %c0_252] : memref<1x128xf32, #tpu.memory_space<vmem>>, vector<1x128xf32>
    %c0_253 = arith.constant 0 : index
    %c0_254 = arith.constant 0 : index
    %279 = vector.load %arg7[%c0_253, %c0_254] : memref<1x128xf32, #tpu.memory_space<vmem>>, vector<1x128xf32>
    %cst_255 = arith.constant 0.000000e+00 : f32
    %280 = vector.broadcast %cst_255 : f32 to vector<1x192xf32>
    %281 = tpu.concatenate %280, %280, %280, %280, %171, %178, %280, %199, %206 in 1 : vector<1x192xf32>, vector<1x192xf32>, vector<1x192xf32>, vector<1x192xf32>, vector<1x192xf32>, vector<1x192xf32>, vector<1x192xf32>, vector<1x192xf32>, vector<1x192xf32> -> vector<1x1728xf32>
    %282 = tpu.concatenate %280, %280, %280, %178, %185, %192, %206, %213, %220 in 1 : vector<1x192xf32>, vector<1x192xf32>, vector<1x192xf32>, vector<1x192xf32>, vector<1x192xf32>, vector<1x192xf32>, vector<1x192xf32>, vector<1x192xf32>, vector<1x192xf32> -> vector<1x1728xf32>
    %283 = tpu.concatenate %280, %199, %206, %280, %227, %234, %280, %255, %262 in 1 : vector<1x192xf32>, vector<1x192xf32>, vector<1x192xf32>, vector<1x192xf32>, vector<1x192xf32>, vector<1x192xf32>, vector<1x192xf32>, vector<1x192xf32>, vector<1x192xf32> -> vector<1x1728xf32>
    %284 = tpu.concatenate %206, %213, %220, %234, %241, %248, %262, %269, %276 in 1 : vector<1x192xf32>, vector<1x192xf32>, vector<1x192xf32>, vector<1x192xf32>, vector<1x192xf32>, vector<1x192xf32>, vector<1x192xf32>, vector<1x192xf32>, vector<1x192xf32> -> vector<1x1728xf32>
    %285 = tpu.concatenate %281, %282, %283, %284 in 0 : vector<1x1728xf32>, vector<1x1728xf32>, vector<1x1728xf32>, vector<1x1728xf32> -> vector<4x1728xf32>
    %286 = arith.truncf %285 : vector<4x1728xf32> to vector<4x1728xbf16>
    %cst_256 = arith.constant dense<0.000000e+00> : vector<4x128xf32>
    %287 = tpu.matmul %286, %277, %cst_256 {dimension_numbers = #tpu.dot_dimension_numbers<[1], [0], [0], [1], [0, 0, 1, 1], [], []>} : vector<4x1728xbf16>, vector<1728x128xbf16>, vector<4x128xf32> -> vector<4x128xf32>
    %288 = vector.broadcast %278 : vector<1x128xf32> to vector<4x128xf32>
    %289 = arith.mulf %287, %288 : vector<4x128xf32>
    %290 = vector.broadcast %279 : vector<1x128xf32> to vector<4x128xf32>
    %291 = arith.addf %289, %290 : vector<4x128xf32>
    %cst_257 = arith.constant 0.000000e+00 : f32
    %292 = vector.broadcast %cst_257 : f32 to vector<4x128xf32>
    %293 = arith.cmpf ogt, %291, %292 : vector<4x128xf32>
    %cst_258 = arith.constant 0.00999999977 : f32
    %294 = vector.broadcast %cst_258 : f32 to vector<4x128xf32>
    %295 = arith.mulf %294, %291 : vector<4x128xf32>
    %296 = arith.select %293, %291, %295 : vector<4x128xi1>, vector<4x128xf32>
    %297 = vector.extract_strided_slice %296 {offsets = [0, 0], sizes = [1, 128], strides = [1, 1]} : vector<4x128xf32> to vector<1x128xf32>
    %298 = vector.extract_strided_slice %296 {offsets = [1, 0], sizes = [1, 128], strides = [1, 1]} : vector<4x128xf32> to vector<1x128xf32>
    %299 = arith.maximumf %297, %298 : vector<1x128xf32>
    %300 = vector.extract_strided_slice %296 {offsets = [2, 0], sizes = [1, 128], strides = [1, 1]} : vector<4x128xf32> to vector<1x128xf32>
    %301 = vector.extract_strided_slice %296 {offsets = [3, 0], sizes = [1, 128], strides = [1, 1]} : vector<4x128xf32> to vector<1x128xf32>
    %302 = arith.maximumf %300, %301 : vector<1x128xf32>
    %303 = arith.maximumf %299, %302 : vector<1x128xf32>
    %c0_259 = arith.constant 0 : index
    %c0_260 = arith.constant 0 : index
    %304 = vector.load %arg8[%c0_259, %c0_260] : memref<1152x64xbf16, #tpu.memory_space<vmem>>, vector<1152x64xbf16>
    %c0_261 = arith.constant 0 : index
    %c0_262 = arith.constant 0 : index
    %305 = vector.load %arg9[%c0_261, %c0_262] : memref<1x64xf32, #tpu.memory_space<vmem>>, vector<1x64xf32>
    %c0_263 = arith.constant 0 : index
    %c0_264 = arith.constant 0 : index
    %306 = vector.load %arg10[%c0_263, %c0_264] : memref<1x64xf32, #tpu.memory_space<vmem>>, vector<1x64xf32>
    %cst_265 = arith.constant 0.000000e+00 : f32
    %307 = vector.broadcast %cst_265 : f32 to vector<1x128xf32>
    %308 = tpu.concatenate %307, %307, %307, %307, %303, %307, %307, %307, %307 in 1 : vector<1x128xf32>, vector<1x128xf32>, vector<1x128xf32>, vector<1x128xf32>, vector<1x128xf32>, vector<1x128xf32>, vector<1x128xf32>, vector<1x128xf32>, vector<1x128xf32> -> vector<1x1152xf32>
    %309 = arith.truncf %308 : vector<1x1152xf32> to vector<1x1152xbf16>
    %cst_266 = arith.constant dense<0.000000e+00> : vector<1x64xf32>
    %310 = tpu.matmul %309, %304, %cst_266 {dimension_numbers = #tpu.dot_dimension_numbers<[1], [0], [0], [1], [0, 0, 1, 1], [], []>} : vector<1x1152xbf16>, vector<1152x64xbf16>, vector<1x64xf32> -> vector<1x64xf32>
    %311 = arith.mulf %310, %305 : vector<1x64xf32>
    %312 = arith.addf %311, %306 : vector<1x64xf32>
    %cst_267 = arith.constant 0.000000e+00 : f32
    %313 = vector.broadcast %cst_267 : f32 to vector<1x64xf32>
    %314 = arith.cmpf ogt, %312, %313 : vector<1x64xf32>
    %cst_268 = arith.constant 0.00999999977 : f32
    %315 = vector.broadcast %cst_268 : f32 to vector<1x64xf32>
    %316 = arith.mulf %315, %312 : vector<1x64xf32>
    %317 = arith.select %314, %312, %316 : vector<1x64xi1>, vector<1x64xf32>
    %c0_269 = arith.constant 0 : index
    %c0_270 = arith.constant 0 : index
    %c0_271 = arith.constant 0 : index
    %c0_272 = arith.constant 0 : index
    %318 = vector.load %arg11[%c0_269, %c0_270, %c0_271, %c0_272] : memref<1x1x1x64xf32, #tpu.memory_space<vmem>>, vector<1x1x1x64xf32>
    %319 = vector.shape_cast %318 : vector<1x1x1x64xf32> to vector<1x64xf32>
    %320 = vector.shape_cast %317 : vector<1x64xf32> to vector<1x1x1x64xf32>
    tpu.vector_store %arg11[%c0_269, %c0_270, %c0_271, %c0_272], %320 {strides = array<i32>} : memref<1x1x1x64xf32, #tpu.memory_space<vmem>>, vector<1x1x1x64xf32>,
    return
  }
  func.func @transform_0(%arg0: i32) -> (i32, i32, i32, i32, i32) {
    %c0_i32 = arith.constant 0 : i32
    %c0_i32_0 = arith.constant 0 : i32
    %c0_i32_1 = arith.constant 0 : i32
    %c0_i32_2 = arith.constant 0 : i32
    %c0_i32_3 = arith.constant 0 : i32
    return %arg0, %c0_i32, %c0_i32_0, %c0_i32_1, %c0_i32_2 : i32, i32, i32, i32, i32
  }
  func.func @transform_1(%arg0: i32) -> (i32, i32) {
    %c0_i32 = arith.constant 0 : i32
    %c0_i32_0 = arith.constant 0 : i32
    %c0_i32_1 = arith.constant 0 : i32
    return %c0_i32, %c0_i32_0 : i32, i32
  }
  func.func @transform_2(%arg0: i32) -> (i32, i32) {
    %c0_i32 = arith.constant 0 : i32
    %c0_i32_0 = arith.constant 0 : i32
    %c0_i32_1 = arith.constant 0 : i32
    return %c0_i32, %c0_i32_0 : i32, i32
  }
  func.func @transform_3(%arg0: i32) -> (i32, i32) {
    %c0_i32 = arith.constant 0 : i32
    %c0_i32_0 = arith.constant 0 : i32
    %c0_i32_1 = arith.constant 0 : i32
    return %c0_i32, %c0_i32_0 : i32, i32
  }
  func.func @transform_4(%arg0: i32) -> (i32, i32) {
    %c0_i32 = arith.constant 0 : i32
    %c0_i32_0 = arith.constant 0 : i32
    %c0_i32_1 = arith.constant 0 : i32
    return %c0_i32, %c0_i32_0 : i32, i32
  }
  func.func @transform_5(%arg0: i32) -> (i32, i32) {
    %c0_i32 = arith.constant 0 : i32
    %c0_i32_0 = arith.constant 0 : i32
    %c0_i32_1 = arith.constant 0 : i32
    return %c0_i32, %c0_i32_0 : i32, i32
  }
  func.func @transform_6(%arg0: i32) -> (i32, i32) {
    %c0_i32 = arith.constant 0 : i32
    %c0_i32_0 = arith.constant 0 : i32
    %c0_i32_1 = arith.constant 0 : i32
    return %c0_i32, %c0_i32_0 : i32, i32
  }
  func.func @transform_7(%arg0: i32) -> (i32, i32) {
    %c0_i32 = arith.constant 0 : i32
    %c0_i32_0 = arith.constant 0 : i32
    %c0_i32_1 = arith.constant 0 : i32
    return %c0_i32, %c0_i32_0 : i32, i32
  }
  func.func @transform_8(%arg0: i32) -> (i32, i32) {
    %c0_i32 = arith.constant 0 : i32
    %c0_i32_0 = arith.constant 0 : i32
    %c0_i32_1 = arith.constant 0 : i32
    return %c0_i32, %c0_i32_0 : i32, i32
  }
  func.func @transform_9(%arg0: i32) -> (i32, i32) {
    %c0_i32 = arith.constant 0 : i32
    %c0_i32_0 = arith.constant 0 : i32
    %c0_i32_1 = arith.constant 0 : i32
    return %c0_i32, %c0_i32_0 : i32, i32
  }
  func.func @transform_10(%arg0: i32) -> (i32, i32, i32, i32) {
    %c0_i32 = arith.constant 0 : i32
    %c0_i32_0 = arith.constant 0 : i32
    %c0_i32_1 = arith.constant 0 : i32
    %c0_i32_2 = arith.constant 0 : i32
    return %arg0, %c0_i32, %c0_i32_0, %c0_i32_1 : i32, i32, i32, i32
  }
}

</mosaic_0001>

<bundles_post_ra>
// kernel: _lambda_.1
= control target key start
LH: loop header
LB: loop body
LE: loop exit
PB: predicated region body
PF: predicated region fallthrough
CT: control target
= control target key end

     0   :  { %s10460_s0 = inlined_call_operand.vmem [shape: f32[2,4,11,11,1], index: 0, kind: input, shape index: {}]   ;;  %s10461_s1 = inlined_call_operand.vmem [shape: bf16[49,192], index: 1, kind: input, shape index: {}]   ;;  %s10462_s2 = inlined_call_operand.vmem [shape: f32[1,192], index: 2, kind: input, shape index: {}]   ;;  %s10463_s3 = inlined_call_operand.vmem [shape: f32[1,192], index: 3, kind: input, shape index: {}]   ;;  %s10464_s4 = inlined_call_operand.vmem [shape: bf16[1728,128], index: 4, kind: input, shape index: {}]   ;;  %s10465_s5 = inlined_call_operand.vmem [shape: f32[1,128], index: 5, kind: input, shape index: {}]   ;;  %s10466_s6 = inlined_call_operand.vmem [shape: f32[1,128], index: 6, kind: input, shape index: {}]   ;;  %s10467_s7 = inlined_call_operand.vmem [shape: bf16[1152,64], index: 7, kind: input, shape index: {}]   ;;  %s10468_s8 = inlined_call_operand.vmem [shape: f32[1,64], index: 8, kind: input, shape index: {}]   ;;  %s10469_s9 = inlined_call_operand.vmem [shape: f32[1,64], index: 9, kind: input, shape index: {}]   ;;  %s10470_s10 = inlined_call_operand.hbm [shape: f32[2,1,1,64], index: 10, kind: output, shape index: {}]  }
   0x1   :  { %10571 = sst [smem:[#allocation58_spill]] %s10460_s0 }
   0x2   :  { %10572 = sst [smem:[#allocation59_spill]] %s10470_s10 }
   0x3   :  { %15 = vsyncpa [#allocation3], 0 }
   0x4   :  { %17 = vsyncpa [#allocation3 + $0x1], 0  ;;  %s7532_s13 = smov 0   ;;  %s7534_s14 = smov 0  }
   0x5   :  { %s7536_s15 = smov 0   ;;  %s7538_s16 = smov 0  }
   0x6 LB: > { %10573 = sst [smem:[#allocation5_spill]] %s7439_s13  ;;  %s7553_s17 = sadd.s32 4294967295, %s7451_s16   ;;  %s7451_s16 = sphi %s7538_s16, %s10800_s16   ;;  %s7447_s15 = sphi %s7536_s15, %s10802_s15   ;;  %s7443_s14 = sphi %s7534_s14, %s10804_s14   ;;  %s7439_s13 = sphi %s7532_s13, %s10803_s13  }
   0x7   : > { %10574 = sst [smem:[#allocation6_spill]] %s7447_s15  ;;  %s5296_s18 = sadd.s32 4294967294, %s7451_s16  }
   0x8   : > { %10575 = sst [smem:[#allocation7_spill]] %s7451_s16  ;;  %s7557_s19 = sadd.s32 1, %s7451_s16  }
   0x9   : > { %10576 = sst [smem:[#allocation8_spill]] %s7557_s19  ;;  %s245_s20 = sadd.s32 1, %s7447_s15 }
   0xa   : > { %s242_s21 = ssub.s32 %s7451_s16, %s7557_s19  ;;  %p255_p0 = scmp.ne.s32.totalorder %s7447_s15, %s7443_s14 }
   0xb   : > { %p243_p1 = scmp.eq.s32.totalorder %s242_s21, 0  ;;  %p256_p2 = scmp.eq.s32.totalorder %s7553_s17, 1 }
   0xc   : > { %p261_p3 = scmp.ne.s32.totalorder %s7443_s14, %s7439_s13  ;;  %p262_p4 = scmp.eq.s32.totalorder %s5296_s18, 1 }
   0xd   : > { %s7568_s22 = scalar_select %p243_p1, %s7447_s15, %s245_s20  }
   0xe   : > { %p7570_p5 = por %p256_p2, %p255_p0  ;;  %p7574_p6 = por %p262_p4, %p261_p3 }
   0xf   : > { %10577 = sst [smem:[#allocation9_spill]] %s7568_s22  ;;  %p5299_p7 = scmp.ge.s32.totalorder %s7451_s16, 1 }
  0x10   : > { %s10578_s23 = scalar_select %p7570_p5, 1, 0 }
  0x11   : > { %s10580_s24 = scalar_select %p7574_p6, 1, 0 }
  0x12   : > { %10579 = sst [smem:[#allocation10_spill]] %s10578_s23  ;;  %p315_p8 = scmp.lt.s32.totalorder %s7451_s16, 3 }
  0x13   : > { %10581 = sst [smem:[#allocation11_spill]] %s10580_s24 }
  0x14   : > { %p316_p9 = pnand %p5299_p7, %p315_p8 }
  0x16   : > { %319 = sbr.rel (%p316_p9) target bundleno = 1433 (0x599), region = 60 }
  0x1b   : > { %p352_p10 = scmp.lt.s32.totalorder %s7553_s17, 1  ;;  %s10582_s0 = sld [smem:[#allocation58_spill]]  ;;  %vm10560_vm0 = vcmask 7168   ;;  %vm10561_vm1 = vcmask 15360   ;;  %vm10562_vm2 = vcmask 23552   ;;  %vm1270_vm3 = vcmask 31744  }
  0x1c   : > { %s10473_s30 = smov 1   ;;  %s10477_s11 = smov 3   ;;  %vm1279_vm4 = vcmask 39936   ;;  %vm1288_vm5 = vcmask 48128   ;;  %vm1297_vm6 = vcmask 56320   ;;  %vm1306_vm7 = vcmask 64512  }
  0x1d   : > { %s353_s25 = scalar_select %p352_p10, %s7553_s17, 1  ;;  %vm1315_vm8 = vcmask 72704   ;;  %vm1324_vm9 = vcmask 80896   ;;  %vm1333_vm10 = vcmask 89088   ;;  %vm10570_vm11 = vcmask 97280  }
  0x1e   : > { %s10475_s12 = smov 2   ;;  %s10479_s18 = smov 4   ;;  %vm10569_vm12 = vcmask 105472   ;;  %vm10568_vm13 = vcmask 113664   ;;  %vm10559_vm14 = vcmask 1040384   ;;  %vm10567_vm15 = vcmask 121856  }
  0x1f   : > { %s6113_s26 = smul.u32 704, %s353_s25  ;;  %s10481_s20 = smov 5  }
  0x20   : > { %s10495_s21 = smov 6   ;;  %s10493_s25 = smov 7  }
  0x21   : > { %s7585_s29 = scalar_lea.vmem %s10582_s0, %s6113_s26  ;;  %s10471_s26 = smov 8  }
  0x22   : > { %v5533_v0 = vld [vmem:[%s7585_s29 + $0xd2] sm:$0xff]  ;;  %v7589_v1 = vld [vmem:[%s7585_s29 + $0xe2] sm:$0xff]  ;;  %s10497_s27 = smov 9   ;;  %s10499_s28 = smov 10  }
  0x23   : > { %v5405_v2 = vld [vmem:[%s7585_s29 + $0xc1] sm:$0xff]  ;;  %v6186_v3 = vpack.i.bf16 %v7589_v1, %v5533_v0  ;;  %v7594_v4 = vld [vmem:[%s7585_s29 + $0xd1] sm:$0xff]  ;;  %s10624_s0 = smov 15   ;;  %s10644_s22 = smov 6  }
  0x24   : > { %v5421_v5 = vld [vmem:[%s7585_s29 + $0xc2] sm:$0xff]  ;;  %v5413_v6 = vld [vmem:[%s7585_s29 + $0x12] sm:$0xff]  ;;  %v6176_v7 = vpack.i.bf16 %v7594_v4, %v5405_v2  ;;  %s10656_s15 = smov 7   ;;  %s10662_s19 = smov 9  }
  0x25   : > { %v5414_v8 = vld [vmem:[%s7585_s29 + $0x22] sm:$0xff]  ;;  %6187 = vrot.lane.b32.xlu1 %v6186_v3, %s10473_s30  ;;  %v6191_v9 = vpack.i.bf16 %v5533_v0, %v5421_v5  ;;  %v5429_v11 = vld [vmem:[%s7585_s29 + $0x13] sm:$0xff]  ;;  %s10674_s24 = smov 10   ;;  %s7469_s10 = smov 16  }
  0x26   : > { %6177 = vrot.lane.b32.xlu0 %v6176_v7, %s10473_s30  ;;  %v6181_v10 = vpack.i.bf16 %v5414_v8, %v5413_v6  ;;  %v5430_v12 = vld [vmem:[%s7585_s29 + $0x23] sm:$0xff]  ;;  %v7605_v13 = vld [vmem:[%s7585_s29 + $0x33] sm:$0xff]  ;;  %s7470_s23 = smov 32   ;;  %s7471_s13 = smov 48  }
  0x27   : > { %v6201_v14 = vpack.i.bf16 %v5430_v12, %v5429_v11  ;;  %v6196_v15 = vpack.i.bf16 %v7605_v13, %v5430_v12  ;;  %v5437_v16 = vld [vmem:[%s7585_s29 + $0x170] sm:$0xff]  ;;  %v5438_v17 = vld [vmem:[%s7585_s29 + $0x180] sm:$0xff] }
  0x28   : > { %v7613_v18 = vld [vmem:[%s7585_s29 + $0x190] sm:$0xff]  ;;  %v6211_v19 = vpack.i.bf16 %v5438_v17, %v5437_v16  ;;  %v5445_v21 = vld [vmem:[%s7585_s29 + $0x220] sm:$0xff] }
  0x29   : > { %6192 = vrot.lane.b32.xlu1 %v6191_v9, %s10477_s11  ;;  %v6206_v20 = vpack.i.bf16 %v7613_v18, %v5438_v17  ;;  %v5446_v22 = vld [vmem:[%s7585_s29 + $0x230] sm:$0xff]  ;;  %v7621_v23 = vld [vmem:[%s7585_s29 + $0x240] sm:$0xff] }
  0x2a   : > { %6182 = vrot.lane.b32.xlu0 %v6181_v10, %s10475_s12  ;;  %v6221_v24 = vpack.i.bf16 %v5446_v22, %v5445_v21  ;;  %v6216_v25 = vpack.i.bf16 %v7621_v23, %v5446_v22  ;;  %v5453_v26 = vld [vmem:[%s7585_s29 + $0x171] sm:$0xff]  ;;  %v5454_v27 = vld [vmem:[%s7585_s29 + $0x181] sm:$0xff] }
  0x2b   : > { %v7629_v28 = vld [vmem:[%s7585_s29 + $0x191] sm:$0xff]  ;;  %v6231_v29 = vpack.i.bf16 %v5454_v27, %v5453_v26  ;;  %v5461_v31 = vld [vmem:[%s7585_s29 + $0x221] sm:$0xff] }
  0x2c   : > { %v6226_v30 = vpack.i.bf16 %v7629_v28, %v5454_v27  ;;  %v5462_v32 = vld [vmem:[%s7585_s29 + $0x231] sm:$0xff]  ;;  %v7637_v33 = vld [vmem:[%s7585_s29 + $0x241] sm:$0xff] }
  0x2d   : > { %6202 = vrot.lane.b32.xlu1 %v6201_v14, %s10479_s18  ;;  %v6241_v34 = vpack.i.bf16 %v5462_v32, %v5461_v31  ;;  %v6236_v35 = vpack.i.bf16 %v7637_v33, %v5462_v32  ;;  %v7643_v36 = vld [vmem:[%s7585_s29 + $0xe1] sm:$0xff]  ;;  %v7646_v37 = vld [vmem:[%s7585_s29 + $0xf1] sm:$0xff] }
  0x2e   : > { %6197 = vrot.lane.b32.xlu0 %v6196_v15, %s10475_s12  ;;  %v5581_v38 = vld [vmem:[%s7585_s29 + $0x182] sm:$0xff]  ;;  %v7650_v39 = vld [vmem:[%s7585_s29 + $0x192] sm:$0xff]  ;;  %v7655_v40 = vpack.i.bf16 %v7646_v37, %v7643_v36 }
  0x2f   : > { %v6246_v41 = vpack.i.bf16 %v7650_v39, %v5581_v38  ;;  %v5589_v42 = vld [vmem:[%s7585_s29 + $0x232] sm:$0xff]  ;;  %v7661_v43 = vld [vmem:[%s7585_s29 + $0x242] sm:$0xff] }
  0x30   : > { %v5469_v44 = vld [vmem:[%s7585_s29 + $0x172] sm:$0xff]  ;;  %v5477_v45 = vld [vmem:[%s7585_s29 + $0x222] sm:$0xff]  ;;  %v6261_v46 = vpack.i.bf16 %v7661_v43, %v5589_v42 }
  0x31   : > { %6212 = vrot.lane.b32.xlu1 %v6211_v19, %s10481_s20  ;;  %v6256_v47 = vpack.i.bf16 %v5581_v38, %v5469_v44  ;;  %v5415_v48 = vld [vmem:[%s7585_s29 + $0x32] sm:$0xff]  ;;  %v5416_v49 = vld [vmem:[%s7585_s29 + $0x42] sm:$0xff]  ;;  %v6271_v52 = vpack.i.bf16 %v5589_v42, %v5477_v45 }
  0x32   : > { %6207 = vrot.lane.b32.xlu0 %v6206_v20, %s10477_s11  ;;  %v5597_v50 = vld [vmem:[%s7585_s29 + $0x183] sm:$0xff]  ;;  %v7673_v51 = vld [vmem:[%s7585_s29 + $0x193] sm:$0xff]  ;;  %v7677_v53 = vpack.i.bf16 %v5416_v49, %v5415_v48 }
  0x33   : > { %v5535_v54 = vld [vmem:[%s7585_s29 + $0xf2] sm:$0xff]  ;;  %v7681_v55 = vld [vmem:[%s7585_s29 + $0x102] sm:$0xff]  ;;  %v6281_v57 = vpack.i.bf16 %v7673_v51, %v5597_v50 }
  0x34   : > { %v5485_v56 = vld [vmem:[%s7585_s29 + $0x173] sm:$0xff]  ;;  %v6276_v58 = vpack.i.bf16 %v7681_v55, %v5535_v54  ;;  %v7691_v60 = vld [vmem:[%s7585_s29 + $0x40] sm:$0xff]  ;;  %v7696_v62 = vpack.i.bf16 %v5535_v54, %v7589_v1 }
  0x35   : > { %6222 = vrot.lane.b32.xlu1 %v6221_v24, %s10495_s21  ;;  %v5605_v59 = vld [vmem:[%s7585_s29 + $0x30] sm:$0xff]  ;;  %v6291_v61 = vpack.i.bf16 %v5597_v50, %v5485_v56  ;;  %v5543_v63 = vld [vmem:[%s7585_s29 + $0x43] sm:$0xff] }
  0x36   : > { %6217 = vrot.lane.b32.xlu0 %v6216_v25, %s10479_s18  ;;  %v7700_v0 = vld [vmem:[%s7585_s29 + $0x53] sm:$0xff]  ;;  %v5493_v2 = vld [vmem:[%s7585_s29 + $0x20] sm:$0xff]  ;;  %v6301_v3 = vpack.i.bf16 %v7691_v60, %v5605_v59  ;;  %v6306_v8 = vpack.i.bf16 %v5543_v63, %v7605_v13 }
  0x37   : > { %v6296_v5 = vpack.i.bf16 %v7700_v0, %v5543_v63  ;;  %v5613_v1 = vld [vmem:[%s7585_s29 + $0xe0] sm:$0xff]  ;;  %v7710_v6 = vld [vmem:[%s7585_s29 + $0xf0] sm:$0xff]  ;;  %v6311_v7 = vpack.i.bf16 %v5605_v59, %v5493_v2 }
  0x38   : > { %v5551_v9 = vld [vmem:[%s7585_s29 + $0x1a0] sm:$0xff]  ;;  %v7717_v10 = vld [vmem:[%s7585_s29 + $0x1b0] sm:$0xff]  ;;  %v6321_v12 = vpack.i.bf16 %v7710_v6, %v5613_v1 }
  0x39   : > { %6232 = vrot.lane.b32.xlu1 %v6231_v29, %s10493_s25  ;;  %v5501_v11 = vld [vmem:[%s7585_s29 + $0xd0] sm:$0xff]  ;;  %v6316_v14 = vpack.i.bf16 %v7717_v10, %v5551_v9  ;;  %v7726_v16 = vld [vmem:[%s7585_s29 + $0x41] sm:$0xff]  ;;  %v6326_v17 = vpack.i.bf16 %v5551_v9, %v7613_v18 }
  0x3a   : > { %6227 = vrot.lane.b32.xlu0 %v6226_v30, %s10481_s20  ;;  %v5621_v15 = vld [vmem:[%s7585_s29 + $0x31] sm:$0xff]  ;;  %v6331_v13 = vpack.i.bf16 %v5613_v1, %v5501_v11  ;;  %v7733_v20 = vld [vmem:[%s7585_s29 + $0x260] sm:$0xff]  ;;  %v6371_v30 = vpack.i.bf16 %v7643_v36, %v7594_v4 }
  0x3b   : > { %v5559_v19 = vld [vmem:[%s7585_s29 + $0x250] sm:$0xff]  ;;  %v5509_v21 = vld [vmem:[%s7585_s29 + $0x21] sm:$0xff]  ;;  %v6341_v22 = vpack.i.bf16 %v7726_v16, %v5621_v15 }
  0x3c   : > { %v6336_v24 = vpack.i.bf16 %v7733_v20, %v5559_v19  ;;  %v6351_v25 = vpack.i.bf16 %v5621_v15, %v5509_v21  ;;  %v6346_v18 = vpack.i.bf16 %v5559_v19, %v7621_v23  ;;  %v5567_v26 = vld [vmem:[%s7585_s29 + $0x1a1] sm:$0xff]  ;;  %v7745_v27 = vld [vmem:[%s7585_s29 + $0x1b1] sm:$0xff] }
  0x3d   : > { %6242 = vrot.lane.b32.xlu1 %v6241_v34, %s10471_s26  ;;  %v6356_v29 = vpack.i.bf16 %v7745_v27, %v5567_v26  ;;  %v6366_v23 = vpack.i.bf16 %v5567_v26, %v7629_v28  ;;  %v5575_v31 = vld [vmem:[%s7585_s29 + $0x251] sm:$0xff]  ;;  %v7758_v32 = vld [vmem:[%s7585_s29 + $0x261] sm:$0xff] }
  0x3e   : > { %6237 = vrot.lane.b32.xlu0 %v6236_v35, %s10495_s21  ;;  %v5583_v34 = vld [vmem:[%s7585_s29 + $0x1a2] sm:$0xff]  ;;  %v7762_v35 = vld [vmem:[%s7585_s29 + $0x1b2] sm:$0xff]  ;;  %v6376_v4 = vpack.i.bf16 %v7758_v32, %v5575_v31  ;;  %v6386_v36 = vpack.i.bf16 %v5575_v31, %v7637_v33 }
  0x3f   : > { %v6391_v28 = vpack.i.bf16 %v7762_v35, %v5583_v34  ;;  %v5480_v38 = vld [vmem:[%s7585_s29 + $0x252] sm:$0xff]  ;;  %v5488_v42 = vld [vmem:[%s7585_s29 + $0x1a3] sm:$0xff] }
  0x40   : > { %v6411_v44 = vpack.i.bf16 %v5480_v38, %v7661_v43  ;;  %v7786_v45 = vld [vmem:[%s7585_s29 + $0x1b3] sm:$0xff]  ;;  %v7794_v43 = vld [vmem:[%s7585_s29 + $0x60] sm:$0xff] }
  0x41   : > { %6252 = vrot.lane.b32.xlu1 %v7655_v40, %s10473_s30  ;;  %v5504_v49 = vld [vmem:[%s7585_s29 + $0x100] sm:$0xff]  ;;  %v5639_v2 = vld [vmem:[%s7585_s29 + $0x52] sm:$0xff] }
  0x42   : > { %6247 = vrot.lane.b32.xlu0 %v6246_v41, %s10493_s25  ;;  %v7777_v41 = vld [vmem:[%s7585_s29 + $0x262] sm:$0xff]  ;;  %v5554_v21 = vld [vmem:[%s7585_s29 + $0x1d0] sm:$0xff] }
  0x43   : > { %v6406_v33 = vpack.i.bf16 %v7777_v41, %v5480_v38  ;;  %v7810_v56 = vld [vmem:[%s7585_s29 + $0x61] sm:$0xff] }
  0x45   : > { %6262 = vrot.lane.b32.xlu1 %v6261_v46, %s10471_s26  ;;  %s10491_s26 = smov 11   ;;  %v6421_v46 = vpack.i.bf16 %v5488_v42, %v7673_v51  ;;  %v6441_v51 = vpack.i.bf16 %v5504_v49, %v7710_v6 }
  0x46   : > { %6257 = vrot.lane.b32.xlu0 %v6256_v47, %s10497_s27  ;;  %v6416_v47 = vpack.i.bf16 %v7786_v45, %v5488_v42 }
  0x49   : > { %6272 = vrot.lane.b32.xlu1 %v6271_v52, %s10499_s28  ;;  %v7802_v52 = vld [vmem:[%s7585_s29 + $0x110] sm:$0xff] }
  0x4a   : > { %6267 = vrot.lane.b32.xlu0 %v7677_v53, %s10475_s12  ;;  %v6436_v54 = vpack.i.bf16 %v7802_v52, %v5504_v49 }
  0x4d   : > { %6282 = vrot.lane.b32.xlu1 %v6281_v57, %s10497_s27 }
  0x4e   : > { %6277 = vrot.lane.b32.xlu0 %v6276_v58, %s10473_s30  ;;  %s10485_s30 = smov 12   ;;  %v5520_v58 = vld [vmem:[%s7585_s29 + $0x101] sm:$0xff] }
  0x51   : > { %6292 = vrot.lane.b32.xlu1 %v6291_v61, %s10491_s26  ;;  %v6461_v61 = vpack.i.bf16 %v5520_v58, %v7646_v37 }
  0x52   : > { %6287 = vrot.lane.b32.xlu0 %v7696_v62, %s10477_s11 }
  0x55   : > { %6302 = vrot.lane.b32.xlu1 %v6301_v3, %s10499_s28  ;;  %v5640_v3 = vld [vmem:[%s7585_s29 + $0x62] sm:$0xff] }
  0x56   : > { %6297 = vrot.lane.b32.xlu0 %v6296_v5, %s10475_s12  ;;  %s10483_s12 = smov 13   ;;  %v6466_v1 = vpack.i.bf16 %v5640_v3, %v5639_v2 }
  0x59   : > { %6312 = vrot.lane.b32.xlu1 %v6311_v7, %s10485_s30 }
  0x5a   : > { %6307 = vrot.lane.b32.xlu0 %v6306_v8, %s10479_s18  ;;  %v7839_v8 = vld [vmem:[%s7585_s29 + $0x122] sm:$0xff] }
  0x5d   : > { %6322 = vrot.lane.b32.xlu1 %v6321_v12, %s10491_s26 }
  0x5e   : > { %6317 = vrot.lane.b32.xlu0 %v6316_v14, %s10477_s11  ;;  %s10489_s11 = smov 14   ;;  %v5546_v14 = vld [vmem:[%s7585_s29 + $0x73] sm:$0xff] }
  0x61   : > { %6332 = vrot.lane.b32.xlu1 %v6331_v13, %s10483_s12 }
  0x62   : > { %6327 = vrot.lane.b32.xlu0 %v6326_v17, %s10481_s20 }
  0x65   : > { %6342 = vrot.lane.b32.xlu1 %v6341_v22, %s10485_s30 }
  0x66   : > { %6337 = vrot.lane.b32.xlu0 %v6336_v24, %s10479_s18  ;;  %s10487_s18 = smov 15   ;;  %v5450_v24 = vld [vmem:[%s7585_s29 + $0x270] sm:$0xff] }
  0x69   : > { %6352 = vrot.lane.b32.xlu1 %v6351_v25, %s10489_s11 }
  0x6a   : > { %6347 = vrot.lane.b32.xlu0 %v6346_v18, %s10495_s21 }
  0x6d   : > { %6362 = vrot.lane.b32.xlu1 %v7655_v40, %s10483_s12  ;;  %v6401_v40 = vpack.i.bf16 %v5583_v34, %v7650_v39  ;;  %v5496_v39 = vld [vmem:[%s7585_s29 + $0x50] sm:$0xff] }
  0x6e   : > { %6357 = vrot.lane.b32.xlu0 %v6356_v29, %s10481_s20  ;;  %s10583_s20 = smov 8   ;;  %v6431_v48 = vpack.i.bf16 %v5496_v39, %v7691_v60  ;;  %v6426_v50 = vpack.i.bf16 %v7794_v43, %v5496_v39  ;;  %v7818_v60 = vld [vmem:[%s7585_s29 + $0x111] sm:$0xff] }
  0x6f   : > { %v6456_v63 = vpack.i.bf16 %v7818_v60, %v5520_v58 }
  0x71   : > { %6372 = vrot.lane.b32.xlu1 %v6371_v30, %s10487_s18  ;;  %v5458_v30 = vld [vmem:[%s7585_s29 + $0x1c1] sm:$0xff] }
  0x72   : > { %6367 = vrot.lane.b32.xlu0 %v6366_v23, %s10493_s25  ;;  %v6521_v23 = vpack.i.bf16 %v5450_v24, %v7733_v20  ;;  %v5578_v20 = vld [vmem:[%s7585_s29 + $0x281] sm:$0xff] }
  0x75   : > { %6382 = vrot.lane.b32.xlu1 %v7677_v53, %s10489_s11  ;;  %v5512_v53 = vld [vmem:[%s7585_s29 + $0x51] sm:$0xff] }
  0x76   : > { %6377 = vrot.lane.b32.xlu0 %v6376_v4, %s10495_s21  ;;  %v6451_v57 = vpack.i.bf16 %v5512_v53, %v7726_v16  ;;  %v6446_v59 = vpack.i.bf16 %v7810_v56, %v5512_v53  ;;  %v5442_v16 = vld [vmem:[%s7585_s29 + $0x1c0] sm:$0xff] }
  0x77   : > { %v6511_v25 = vpack.i.bf16 %v5442_v16, %v7717_v10  ;;  %v6506_v18 = vpack.i.bf16 %v5554_v21, %v5442_v16  ;;  %v5570_v10 = vld [vmem:[%s7585_s29 + $0x1d1] sm:$0xff] }
  0x78   : > { %v6526_v38 = vpack.i.bf16 %v5570_v10, %v5458_v30 }
  0x79   : > { %6392 = vrot.lane.b32.xlu1 %v6391_v28, %s10493_s25  ;;  %v5466_v28 = vld [vmem:[%s7585_s29 + $0x271] sm:$0xff] }
  0x7a   : > { %6387 = vrot.lane.b32.xlu0 %v6386_v36, %s10583_s20  ;;  %v6531_v36 = vpack.i.bf16 %v5458_v30, %v7745_v27  ;;  %v6536_v39 = vpack.i.bf16 %v5578_v20, %v5466_v28  ;;  %v5586_v27 = vld [vmem:[%s7585_s29 + $0x1d2] sm:$0xff]  ;;  %v7963_v20 = vld [vmem:[%s7585_s29 + $0xc0] sm:$0xff] }
  0x7d   : > { %6402 = vrot.lane.b32.xlu1 %v6401_v40, %s10497_s27 }
  0x7e   : > { %6397 = vrot.lane.b32.xlu0 %v7696_v62, %s10487_s18  ;;  %v5648_v62 = vld [vmem:[%s7585_s29 + $0x112] sm:$0xff] }
  0x7f   : > { %v6471_v5 = vpack.i.bf16 %v5648_v62, %v7681_v55  ;;  %v5434_v55 = vld [vmem:[%s7585_s29 + $0x63] sm:$0xff]  ;;  %v6486_v11 = vpack.i.bf16 %v7839_v8, %v5648_v62  ;;  %v5498_v62 = vld [vmem:[%s7585_s29 + $0x70] sm:$0xff] }
  0x80   : > { %v6501_v13 = vpack.i.bf16 %v5434_v55, %v7700_v0  ;;  %v6496_v17 = vpack.i.bf16 %v5546_v14, %v5434_v55  ;;  %v5562_v0 = vld [vmem:[%s7585_s29 + $0x280] sm:$0xff]  ;;  %v6581_v55 = vpack.i.bf16 %v5498_v62, %v7794_v43 }
  0x81   : > { %6412 = vrot.lane.b32.xlu1 %v6411_v44, %s10499_s28  ;;  %v6516_v31 = vpack.i.bf16 %v5562_v0, %v5450_v24  ;;  %v5474_v44 = vld [vmem:[%s7585_s29 + $0x1c2] sm:$0xff] }
  0x82   : > { %6407 = vrot.lane.b32.xlu0 %v6406_v33, %s10583_s20  ;;  %v6541_v33 = vpack.i.bf16 %v5466_v28, %v7758_v32  ;;  %v6551_v49 = vpack.i.bf16 %v5474_v44, %v7762_v35  ;;  %v5594_v32 = vld [vmem:[%s7585_s29 + $0x282] sm:$0xff]  ;;  %v5602_v35 = vld [vmem:[%s7585_s29 + $0x1d3] sm:$0xff] }
  0x83   : > { %v5626_v24 = vld [vmem:[%s7585_s29 + $0x81] sm:$0xff]  ;;  %v5641_v28 = vld [vmem:[%s7585_s29 + $0x72] sm:$0xff] }
  0x85   : > { %6422 = vrot.lane.b32.xlu1 %v6421_v46, %s10491_s26 }
  0x86   : > { %6417 = vrot.lane.b32.xlu0 %v6416_v47, %s10497_s27 }
  0x89   : > { %6432 = vrot.lane.b32.xlu1 %v6431_v48, %s10485_s30  ;;  %v5482_v48 = vld [vmem:[%s7585_s29 + $0x272] sm:$0xff] }
  0x8a   : > { %6427 = vrot.lane.b32.xlu0 %v6426_v50, %s10499_s28  ;;  %v6546_v50 = vpack.i.bf16 %v5586_v27, %v5474_v44  ;;  %v6556_v58 = vpack.i.bf16 %v5594_v32, %v5482_v48  ;;  %v7966_v44 = vld [vmem:[%s7585_s29 + $0x2] sm:$0xff]  ;;  %v7974_v27 = vld [vmem:[%s7585_s29 + $0xb1] sm:$0xff] }
  0x8b   : > { %v7986_v32 = vld [vmem:[%s7585_s29 + $0xb2] sm:$0xff] }
  0x8c   : > { %10609 = vst [vmem:[#allocation28_spill] sm:$0xff] %v7986_v32  ;;  %v8172_v32 = vld [vmem:[%s7585_s29 + $0x40] sm:$0xff] }
  0x8d   : > { %6442 = vrot.lane.b32.xlu1 %v6441_v51, %s10483_s12  ;;  %10637 = vst [vmem:[#allocation55_spill] sm:$0xff] %v8172_v32 }
  0x8e   : > { %6437 = vrot.lane.b32.xlu0 %v6436_v54, %s10491_s26  ;;  %s10588_s26 = smov 5   ;;  %v5490_v54 = vld [vmem:[%s7585_s29 + $0x1c3] sm:$0xff] }
  0x8f   : > { %v6566_v2 = vpack.i.bf16 %v5602_v35, %v5490_v54 }
  0x91   : > { %6452 = vrot.lane.b32.xlu1 %v6451_v57, %s10489_s11  ;;  %v6561_v57 = vpack.i.bf16 %v5482_v48, %v7777_v41  ;;  %v5610_v41 = vld [vmem:[%s7585_s29 + $0x80] sm:$0xff] }
  0x92   : > { %6447 = vrot.lane.b32.xlu0 %v6446_v59, %s10485_s30  ;;  %s10585_s30 = smov 1   ;;  %v7977_v48 = vld [vmem:[%s7585_s29 + $0xc1] sm:$0xff] }
  0x95   : > { %6462 = vrot.lane.b32.xlu1 %v6461_v61, %s10487_s18 }
  0x96   : > { %6457 = vrot.lane.b32.xlu0 %v6456_v63, %s10483_s12  ;;  %s10584_s12 = smov 2  }
  0x97   : > { %v7830_v6 = vpop.permute.xlu1 %6187 }
  0x98   : > { %v7832_v37 = vpop.permute.xlu0 %6177 }
  0x99   : > { %6472 = vrot.lane.b32.xlu1 %v6471_v5, %s10487_s18  ;;  %s10586_s18 = smov 3  }
  0x9a   : > { %6467 = vrot.lane.b32.xlu0 %v6466_v1, %s10489_s11  ;;  %s10587_s11 = smov 4  }
  0x9b   : > { %v7836_v7 = vpop.permute.xlu1 %6192 }
  0x9c   : > { %v7841_v9 = vpop.permute.xlu0 %6182 }
  0x9d   : > { %6482 = vrot.lane.b32.xlu1 %v6466_v1, %s10584_s12  ;;  %v5506_v1 = vld [vmem:[%s7585_s29 + $0x120] sm:$0xff] }
  0x9e   : > { %6477 = vrot.lane.b32.xlu0 %v6456_v63, %s10585_s30  ;;  %v6571_v63 = vpack.i.bf16 %v5490_v54, %v7786_v45  ;;  %v5618_v45 = vld [vmem:[%s7585_s29 + $0x130] sm:$0xff]  ;;  %v7989_v54 = vld [vmem:[%s7585_s29 + $0xc2] sm:$0xff] }
  0x9f   : > { %v7847_v12 = vpop.permute.xlu1 %6202  ;;  %v6586_v43 = vpack.i.bf16 %v5618_v45, %v5506_v1 }
  0xa0   : > { %v7850_v15 = vpop.permute.xlu0 %6197 }
  0xa1   : > { %6492 = vrot.lane.b32.xlu1 %v6471_v5, %s10586_s18 }
  0xa2   : > { %6487 = vrot.lane.b32.xlu0 %v6486_v11, %s10585_s30  ;;  %v6576_v11 = vpack.i.bf16 %v5610_v41, %v5498_v62  ;;  %v8004_v62 = vld [vmem:[%s7585_s29 + $0x160] sm:$0xff]  ;;  %v8013_v41 = vld [vmem:[%s7585_s29 + $0x171] sm:$0xff] }
  0xa3   : > { %v7856_v19 = vpop.permute.xlu1 %6212  ;;  %10613 = vst [vmem:[#allocation32_spill] sm:$0xff] %v8004_v62  ;;  %10616 = vst [vmem:[#allocation35_spill] sm:$0xff] %v8013_v41  ;;  %v8141_v62 = vld [vmem:[%s7585_s29 + $0x231] sm:$0xff]  ;;  %v8150_v41 = vld [vmem:[%s7585_s29 + $0x242] sm:$0xff] }
  0xa4   : > { %v7859_v22 = vpop.permute.xlu0 %6207  ;;  %10633 = vst [vmem:[#allocation51_spill] sm:$0xff] %v8150_v41  ;;  %v6194_v41 = vunpack.i.l.bf16 %v7836_v7 }
  0xa5   : > { %6502 = vrot.lane.b32.xlu1 %v6501_v13, %s10587_s11  ;;  %v5514_v13 = vld [vmem:[%s7585_s29 + $0x71] sm:$0xff] }
  0xa6   : > { %6497 = vrot.lane.b32.xlu0 %v6496_v17, %s10584_s12  ;;  %v6591_v17 = vpack.i.bf16 %v5506_v1, %v7802_v52  ;;  %v6601_v0 = vpack.i.bf16 %v5514_v13, %v7810_v56  ;;  %v6596_v52 = vpack.i.bf16 %v5626_v24, %v5514_v13  ;;  %v5642_v56 = vld [vmem:[%s7585_s29 + $0x82] sm:$0xff]  ;;  %v8036_v24 = vld [vmem:[%s7585_s29 + $0x172] sm:$0xff] }
  0xa7   : > { %v7865_v26 = vpop.permute.xlu1 %6222  ;;  %v8016_v1 = vld [vmem:[%s7585_s29 + $0xe0] sm:$0xff] }
  0xa8   : > { %v7868_v29 = vpop.permute.xlu0 %6217  ;;  %10617 = vst [vmem:[#allocation36_spill] sm:$0xff] %v8016_v1  ;;  %v8027_v13 = vld [vmem:[%s7585_s29 + $0x21] sm:$0xff] }
  0xa9   : > { %6512 = vrot.lane.b32.xlu1 %v6511_v25, %s10588_s26  ;;  %v8163_v1 = vld [vmem:[%s7585_s29 + $0x182] sm:$0xff] }
  0xaa   : > { %6507 = vrot.lane.b32.xlu0 %v6506_v18, %s10586_s18  ;;  %v5522_v18 = vld [vmem:[%s7585_s29 + $0x121] sm:$0xff]  ;;  %10635 = vst [vmem:[#allocation53_spill] sm:$0xff] %v8163_v1 }
  0xab   : > { %v7874_v34 = vpop.permute.xlu1 %6232 }
  0xac   : > { %v7877_v4 = vpop.permute.xlu0 %6227 }
  0xad   : > { %6522 = vrot.lane.b32.xlu1 %v6521_v23, %s10495_s21  ;;  %v5634_v23 = vld [vmem:[%s7585_s29 + $0x131] sm:$0xff] }
  0xae   : > { %6517 = vrot.lane.b32.xlu0 %v6516_v31, %s10587_s11  ;;  %v7950_v31 = vld [vmem:[%s7585_s29 + $0x132] sm:$0xff]  ;;  %v8001_v35 = vpack.i.bf16 %v5634_v23, %v5522_v18  ;;  %v8048_v23 = vld [vmem:[%s7585_s29 + $0x222] sm:$0xff] }
  0xaf   : > { %v7883_v40 = vpop.permute.xlu1 %6242 }
  0xb0   : > { %10589 = vst [vmem:[#allocation12_spill] sm:$0xff] %v7883_v40  ;;  %v7886_v42 = vpop.permute.xlu0 %6237  ;;  %10612 = vst [vmem:[#allocation31_spill] sm:$0xff] %v8001_v35  ;;  %v8169_v40 = vld [vmem:[%s7585_s29 + $0x30] sm:$0xff] }
  0xb1   : > { %10590 = vst [vmem:[#allocation13_spill] sm:$0xff] %v7886_v42  ;;  %6532 = vrot.lane.b32.xlu1 %v6531_v36, %s10493_s25  ;;  %v7957_v36 = vld [vmem:[%s7585_s29 + $0x1] sm:$0xff]  ;;  %10636 = vst [vmem:[#allocation54_spill] sm:$0xff] %v8169_v40 }
  0xb2   : > { %6527 = vrot.lane.b32.xlu0 %v6526_v38, %s10588_s26  ;;  %v7960_v38 = vld [vmem:[%s7585_s29 + $0xb0] sm:$0xff]  ;;  %v8132_v42 = vld [vmem:[%s7585_s29 + $0x181] sm:$0xff] }
  0xb3   : > { %v7892_v46 = vpop.permute.xlu1 %6252 }
  0xb4   : > { %10591 = vst [vmem:[#allocation14_spill] sm:$0xff] %v7892_v46  ;;  %v7895_v47 = vpop.permute.xlu0 %6247 }
  0xb5   : > { %10592 = vst [vmem:[#allocation15_spill] sm:$0xff] %v7895_v47  ;;  %6542 = vrot.lane.b32.xlu1 %v6541_v33, %s10583_s20  ;;  %v7969_v33 = vld [vmem:[%s7585_s29 + $0x12] sm:$0xff] }
  0xb6   : > { %6537 = vrot.lane.b32.xlu0 %v6536_v39, %s10495_s21  ;;  %s10602_s21 = smov 12   ;;  %v6611_v39 = vpack.i.bf16 %v5522_v18, %v7818_v60  ;;  %v7995_v60 = vld [vmem:[%s7585_s29 + $0x220] sm:$0xff]  ;;  %v8039_v18 = vld [vmem:[%s7585_s29 + $0xd1] sm:$0xff] }
  0xb7   : > { %v7901_v51 = vpop.permute.xlu1 %6262  ;;  %10611 = vst [vmem:[#allocation30_spill] sm:$0xff] %v7995_v60  ;;  %v8094_v47 = vld [vmem:[%s7585_s29 + $0xd0] sm:$0xff] }
  0xb8   : > { %10593 = vst [vmem:[#allocation16_spill] sm:$0xff] %v7901_v51  ;;  %v7904_v53 = vpop.permute.xlu0 %6257  ;;  %v8091_v51 = vld [vmem:[%s7585_s29 + $0x33] sm:$0xff]  ;;  %10627 = vst [vmem:[#allocation45_spill] sm:$0xff] %v8094_v47 }
  0xb9   : > { %10594 = vst [vmem:[#allocation17_spill] sm:$0xff] %v7904_v53  ;;  %6552 = vrot.lane.b32.xlu1 %v6551_v49, %s10497_s27  ;;  %v7980_v49 = vld [vmem:[%s7585_s29 + $0x3] sm:$0xff] }
  0xba   : > { %6547 = vrot.lane.b32.xlu0 %v6546_v50, %s10493_s25  ;;  %s10599_s25 = smov 11   ;;  %v7983_v50 = vld [vmem:[%s7585_s29 + $0x13] sm:$0xff]  ;;  %v8088_v53 = vld [vmem:[%s7585_s29 + $0x23] sm:$0xff] }
  0xbb   : > { %v7910_v59 = vpop.permute.xlu1 %6272  ;;  %10626 = vst [vmem:[#allocation44_spill] sm:$0xff] %v8088_v53 }
  0xbc   : > { %10595 = vst [vmem:[#allocation18_spill] sm:$0xff] %v7910_v59  ;;  %v7913_v61 = vpop.permute.xlu0 %6267  ;;  %v8144_v59 = vld [vmem:[%s7585_s29 + $0x241] sm:$0xff] }
  0xbd   : > { %10596 = vst [vmem:[#allocation19_spill] sm:$0xff] %v7913_v61  ;;  %6562 = vrot.lane.b32.xlu1 %v6561_v57, %s10499_s28  ;;  %v7992_v57 = vld [vmem:[%s7585_s29 + $0x210] sm:$0xff]  ;;  %v8107_v61 = vld [vmem:[%s7585_s29 + $0x180] sm:$0xff] }
  0xbe   : > { %6557 = vrot.lane.b32.xlu0 %v6556_v58, %s10583_s20  ;;  %10610 = vst [vmem:[#allocation29_spill] sm:$0xff] %v7992_v57  ;;  %v7998_v58 = vld [vmem:[%s7585_s29 + $0x11] sm:$0xff] }
  0xbf   : > { %v7919_v3 = vpop.permute.xlu1 %6282  ;;  %v8125_v57 = vld [vmem:[%s7585_s29 + $0xd0] sm:$0xff] }
  0xc0   : > { %10597 = vst [vmem:[#allocation20_spill] sm:$0xff] %v7919_v3  ;;  %v7922_v5 = vpop.permute.xlu0 %6277  ;;  %v8073_v3 = vld [vmem:[%s7585_s29 + $0x10] sm:$0xff]  ;;  %10631 = vst [vmem:[#allocation49_spill] sm:$0xff] %v8125_v57  ;;  %v6184_v57 = vunpack.i.l.bf16 %v7841_v9 }
  0xc1   : > { %10598 = vst [vmem:[#allocation21_spill] sm:$0xff] %v7922_v5  ;;  %6572 = vrot.lane.b32.xlu1 %v6571_v63, %s10599_s25  ;;  %v8007_v63 = vld [vmem:[%s7585_s29 + $0x170] sm:$0xff]  ;;  %v8070_v5 = vld [vmem:[%s7585_s29 + $0xe2] sm:$0xff]  ;;  %10623 = vst [vmem:[#allocation42_spill] sm:$0xff] %v8073_v3 }
  0xc2   : > { %6567 = vrot.lane.b32.xlu0 %v6566_v2, %s10497_s27  ;;  %s10605_s27 = smov 13   ;;  %10614 = vst [vmem:[#allocation33_spill] sm:$0xff] %v8007_v63  ;;  %v8010_v2 = vld [vmem:[%s7585_s29 + $0x161] sm:$0xff]  ;;  %v8166_v63 = vld [vmem:[%s7585_s29 + $0x192] sm:$0xff] }
  0xc3   : > { %v7928_v14 = vpop.permute.xlu1 %6292  ;;  %10615 = vst [vmem:[#allocation34_spill] sm:$0xff] %v8010_v2  ;;  %v8147_v2 = vld [vmem:[%s7585_s29 + $0x232] sm:$0xff]  ;;  %v8200_v3 = vld [vmem:[%s7585_s29 + $0x183] sm:$0xff] }
  0xc4   : > { %10600 = vst [vmem:[#allocation22_spill] sm:$0xff] %v7928_v14  ;;  %v7931_v16 = vpop.permute.xlu0 %6287  ;;  %v8067_v14 = vld [vmem:[%s7585_s29 + $0xd2] sm:$0xff]  ;;  %10632 = vst [vmem:[#allocation50_spill] sm:$0xff] %v8147_v2 }
  0xc5   : > { %10601 = vst [vmem:[#allocation23_spill] sm:$0xff] %v7931_v16  ;;  %6582 = vrot.lane.b32.xlu1 %v6581_v55, %s10602_s21  ;;  %v8019_v55 = vld [vmem:[%s7585_s29 + $0x211] sm:$0xff]  ;;  %10638 = vst [vmem:[#allocation56_spill] sm:$0xff] %v8200_v3  ;;  %v6224_v3 = vunpack.i.l.bf16 %v7865_v26 }
  0xc6   : > { %6577 = vrot.lane.b32.xlu0 %v6576_v11, %s10499_s28  ;;  %s10608_s28 = smov 14   ;;  %10618 = vst [vmem:[#allocation37_spill] sm:$0xff] %v8019_v55  ;;  %v8022_v11 = vld [vmem:[%s7585_s29 + $0x221] sm:$0xff]  ;;  %v8064_v16 = vld [vmem:[%s7585_s29 + $0x173] sm:$0xff]  ;;  %v6185_v55 = vunpack.i.h.bf16 %v7841_v9  ;;  %v6214_v9 = vunpack.i.l.bf16 %v7856_v19 }
  0xc7   : > { %v7937_v21 = vpop.permute.xlu1 %6302  ;;  %10619 = vst [vmem:[#allocation38_spill] sm:$0xff] %v8022_v11  ;;  %v7378_v11 = vld [vmem:[%s7585_s29 + $0x21] sm:$0xff] }
  0xc8   : > { %10603 = vst [vmem:[#allocation24_spill] sm:$0xff] %v7937_v21  ;;  %v7940_v25 = vpop.permute.xlu0 %6297  ;;  %v8061_v21 = vld [vmem:[%s7585_s29 + $0x163] sm:$0xff] }
  0xc9   : > { %10604 = vst [vmem:[#allocation25_spill] sm:$0xff] %v7940_v25  ;;  %6592 = vrot.lane.b32.xlu1 %v6591_v17, %s10605_s27  ;;  %v8030_v17 = vld [vmem:[%s7585_s29 + $0x31] sm:$0xff] }
  0xca   : > { %6587 = vrot.lane.b32.xlu0 %v6586_v43, %s10599_s25  ;;  %v8033_v43 = vld [vmem:[%s7585_s29 + $0x162] sm:$0xff]  ;;  %v8058_v25 = vld [vmem:[%s7585_s29 + $0x32] sm:$0xff] }
  0xcb   : > { %v7946_v30 = vpop.permute.xlu1 %6312 }
  0xcc   : > { %10606 = vst [vmem:[#allocation26_spill] sm:$0xff] %v7946_v30  ;;  %v7952_v10 = vpop.permute.xlu0 %6307  ;;  %v8055_v30 = vld [vmem:[%s7585_s29 + $0x22] sm:$0xff] }
  0xcd   : > { %10607 = vst [vmem:[#allocation27_spill] sm:$0xff] %v7952_v10  ;;  %6602 = vrot.lane.b32.xlu1 %v6601_v0, %s10608_s28  ;;  %v8042_v0 = vld [vmem:[%s7585_s29 + $0xe1] sm:$0xff]  ;;  %v6621_v10 = vpack.i.bf16 %v7950_v31, %v7839_v8  ;;  %v8079_v8 = vpack.i.bf16 %v5642_v56, %v5641_v28  ;;  %v8110_v31 = vld [vmem:[%s7585_s29 + $0x190] sm:$0xff] }
  0xce   : > { %6597 = vrot.lane.b32.xlu0 %v6596_v52, %s10602_s21  ;;  %v8045_v52 = vld [vmem:[%s7585_s29 + $0x212] sm:$0xff] }
  0xcf   : > { %v8024_v45 = vpop.permute.xlu1 %6322  ;;  %10621 = vst [vmem:[#allocation40_spill] sm:$0xff] %v8045_v52  ;;  %10625 = vst [vmem:[#allocation43_spill] sm:$0xff] %v8079_v8  ;;  %v8113_v28 = vld [vmem:[%s7585_s29 + $0x230] sm:$0xff]  ;;  %v6179_v52 = vunpack.i.l.bf16 %v7832_v37 }
  0xd0   : > { %10620 = vst [vmem:[#allocation39_spill] sm:$0xff] %v8024_v45  ;;  %v8050_v45 = vpop.permute.xlu0 %6317  ;;  %10628 = vst [vmem:[#allocation46_spill] sm:$0xff] %v8113_v28  ;;  %v6189_v28 = vunpack.i.l.bf16 %v7830_v6 }
  0xd1   : > { %10622 = vst [vmem:[#allocation41_spill] sm:$0xff] %v8050_v45  ;;  %v8076_v45 = vld [vmem:[%s7585_s29 + $0x20] sm:$0xff]  ;;  %6612 = vrot.lane.b32.xlu1 %v6611_v39, %s10624_s0  ;;  %v1858_v53 = vsel %vm10560_vm0, %v7998_v58, %v6179_v52  ;;  %v6204_v52 = vunpack.i.l.bf16 %v7847_v12 }
  0xd2   : > { %6607 = vrot.lane.b32.xlu0 %v8001_v35, %s10605_s27  ;;  %v8116_v35 = vld [vmem:[%s7585_s29 + $0x240] sm:$0xff] }
  0xd3   : > { %10629 = vst [vmem:[#allocation47_spill] sm:$0xff] %v8116_v35  ;;  %v8118_v56 = vpop.permute.xlu1 %6332  ;;  %v8138_v39 = vld [vmem:[%s7585_s29 + $0x43] sm:$0xff]  ;;  %v10640_v35 = vpack.i.bf16 %v7998_v58, %v7957_v36  ;;  %v10641_v36 = vpack.i.bf16 %v7963_v20, %v7960_v38  ;;  %v6205_v58 = vunpack.i.h.bf16 %v7847_v12  ;;  %v6215_v12 = vunpack.i.h.bf16 %v7856_v19 }
  0xd4   : > { %10630 = vst [vmem:[#allocation48_spill] sm:$0xff] %v8118_v56  ;;  %v8135_v56 = vld [vmem:[%s7585_s29 + $0x191] sm:$0xff]  ;;  %v8152_v60 = vpop.permute.xlu0 %6327  ;;  %v10643_v19 = vpack.i.bf16 %v7977_v48, %v7974_v27  ;;  %v6220_v27 = vunpack.i.h.bf16 %v7868_v29 }
  0xd5   : > { %10634 = vst [vmem:[#allocation52_spill] sm:$0xff] %v8152_v60  ;;  %6622 = vrot.lane.b32.xlu1 %v6621_v10, %s10624_s0  ;;  %v6180_v60 = vunpack.i.h.bf16 %v7832_v37  ;;  %v8213_v37 = vld [vmem:[%s7585_s29 + $0x193] sm:$0xff] }
  0xd6   : > { %6617 = vrot.lane.b32.xlu0 %v8079_v8, %s10608_s28  ;;  %10639 = vst [vmem:[#allocation57_spill] sm:$0xff] %v8213_v37  ;;  %v6190_v8 = vunpack.i.h.bf16 %v7830_v6  ;;  %v6195_v6 = vunpack.i.h.bf16 %v7836_v7  ;;  %v6199_v7 = vunpack.i.l.bf16 %v7850_v15  ;;  %v10678_v37 = vld [vmem:[#allocation24_spill] sm:$0xff] }
  0xd7   : > { %v8193_v46 = vpop.permute.xlu1 %6342  ;;  %v1859_v2 = vsel %vm10560_vm0, %v7378_v11, %v6180_v60  ;;  %v6200_v11 = vunpack.i.h.bf16 %v7850_v15  ;;  %v10642_v15 = vpack.i.bf16 %v7969_v33, %v7966_v44  ;;  %v6219_v33 = vunpack.i.l.bf16 %v7868_v29 }
  0xd8   : > { %v8202_v10 = vpop.permute.xlu0 %6337  ;;  %v1867_v47 = vsel %vm10561_vm1, %v1859_v2, %v6185_v55  ;;  %v6210_v55 = vunpack.i.h.bf16 %v7859_v22  ;;  %v6305_v1 = vunpack.i.h.bf16 %v10678_v37 }
  0xd9   : > { %6632 = vrot.lane.b32.xlu1 %v10640_v35, %s10584_s12  ;;  %v1866_v35 = vsel %vm10561_vm1, %v1858_v53, %v6184_v57  ;;  %v7379_v57 = vld [vmem:[%s7585_s29 + $0x22] sm:$0xff]  ;;  %v1875_v32 = vsel %vm10562_vm2, %v1867_v47, %v6195_v6  ;;  %v6225_v53 = vunpack.i.h.bf16 %v7865_v26 }
  0xda   : > { %6627 = vrot.lane.b32.xlu0 %v10641_v36, %s10585_s30  ;;  %v2458_v2 = vsel %vm10560_vm0, %v7379_v57, %v6189_v28  ;;  %v6209_v36 = vunpack.i.l.bf16 %v7859_v22  ;;  %v1874_v40 = vsel %vm10562_vm2, %v1866_v35, %v6194_v41  ;;  %v7380_v28 = vld [vmem:[%s7585_s29 + $0x32] sm:$0xff]  ;;  %v1883_v44 = vsel %vm1270_vm3, %v1875_v32, %v6205_v58 }
  0xdb   : > { %v8239_v60 = vpop.permute.xlu1 %6352  ;;  %v2459_v22 = vsel %vm10560_vm0, %v7380_v28, %v6190_v8  ;;  %v1882_v57 = vsel %vm1270_vm3, %v1874_v40, %v6204_v52  ;;  %v2466_v26 = vsel %vm10561_vm1, %v2458_v2, %v6199_v7  ;;  %v1891_v8 = vsel %vm1279_vm4, %v1883_v44, %v6215_v12  ;;  %v10646_v7 = vld [vmem:[#allocation28_spill] sm:$0xff]  ;;  %v10650_v28 = vld [vmem:[#allocation14_spill] sm:$0xff]  ;;  %v10651_v44 = vld [vmem:[#allocation15_spill] sm:$0xff] }
  0xdc   : > { %v8244_v38 = vpop.permute.xlu0 %6347  ;;  %v2467_v47 = vsel %vm10561_vm1, %v2459_v22, %v6200_v11  ;;  %v1890_v6 = vsel %vm1279_vm4, %v1882_v57, %v6214_v9  ;;  %v2474_v40 = vsel %vm10562_vm2, %v2466_v26, %v6209_v36  ;;  %v6234_v35 = vunpack.i.l.bf16 %v7874_v34  ;;  %v10652_v26 = vld [vmem:[#allocation30_spill] sm:$0xff] }
  0xdd   : > { %6642 = vrot.lane.b32.xlu1 %v10642_v15, %s10587_s11  ;;  %v2475_v32 = vsel %vm10562_vm2, %v2467_v47, %v6210_v55  ;;  %v10645_v58 = vpack.i.bf16 %v7983_v50, %v7980_v49  ;;  %v1898_v9 = vsel %vm1288_vm5, %v1890_v6, %v6224_v3  ;;  %v1899_v29 = vsel %vm1288_vm5, %v1891_v8, %v6225_v53  ;;  %v10648_v49 = vld [vmem:[#allocation12_spill] sm:$0xff]  ;;  %v10649_v53 = vld [vmem:[#allocation13_spill] sm:$0xff] }
  0xde   : > { %6637 = vrot.lane.b32.xlu0 %v10643_v19, %s10586_s18  ;;  %v6235_v52 = vunpack.i.h.bf16 %v7874_v34  ;;  %v6229_v11 = vunpack.i.l.bf16 %v7877_v4  ;;  %v10647_v2 = vpack.i.bf16 %v7989_v54, %v10646_v7  ;;  %v2482_v12 = vsel %vm1270_vm3, %v2474_v40, %v6219_v33  ;;  %v10653_v6 = vld [vmem:[#allocation29_spill] sm:$0xff]  ;;  %v10658_v7 = vld [vmem:[#allocation32_spill] sm:$0xff] }
  0xdf   : > { %v8270_v41 = vpop.permute.xlu1 %6362  ;;  %v6230_v55 = vunpack.i.h.bf16 %v7877_v4  ;;  %v6245_v50 = vunpack.i.h.bf16 %v10648_v49  ;;  %v6244_v3 = vunpack.i.l.bf16 %v10648_v49  ;;  %v2483_v34 = vsel %vm1270_vm3, %v2475_v32, %v6220_v27  ;;  %v10655_v32 = vld [vmem:[#allocation16_spill] sm:$0xff] }
  0xe0   : > { %v8276_v48 = vpop.permute.xlu0 %6357  ;;  %v6240_v15 = vunpack.i.h.bf16 %v10649_v53  ;;  %v6239_v19 = vunpack.i.l.bf16 %v10649_v53  ;;  %v6254_v22 = vunpack.i.l.bf16 %v10650_v28  ;;  %v1906_v57 = vsel %vm1297_vm6, %v1898_v9, %v6234_v35  ;;  %v10657_v9 = vld [vmem:[#allocation33_spill] sm:$0xff] }
  0xe1   : > { %6652 = vrot.lane.b32.xlu1 %v10645_v58, %s10644_s22  ;;  %v6255_v4 = vunpack.i.h.bf16 %v10650_v28  ;;  %v6250_v33 = vunpack.i.h.bf16 %v10651_v44  ;;  %v6249_v47 = vunpack.i.l.bf16 %v10651_v44  ;;  %v10654_v27 = vpack.i.bf16 %v10652_v26, %v10653_v6  ;;  %v10660_v44 = vld [vmem:[#allocation17_spill] sm:$0xff] }
  0xe2   : > { %6647 = vrot.lane.b32.xlu0 %v10647_v2, %s10588_s26  ;;  %v1907_v8 = vsel %vm1297_vm6, %v1899_v29, %v6235_v52  ;;  %v2490_v40 = vsel %vm1279_vm4, %v2482_v12, %v6229_v11  ;;  %v6265_v35 = vunpack.i.h.bf16 %v10655_v32  ;;  %v6264_v58 = vunpack.i.l.bf16 %v10655_v32  ;;  %v7381_v26 = vld [vmem:[%s7585_s29 + $0x31] sm:$0xff] }
  0xe3   : > { %v8298_v36 = vpop.permute.xlu1 %6372  ;;  %v10659_v2 = vpack.i.bf16 %v10657_v9, %v10658_v7  ;;  %v2491_v49 = vsel %vm1279_vm4, %v2483_v34, %v6230_v55  ;;  %v1914_v53 = vsel %vm1306_vm7, %v1906_v57, %v6244_v3  ;;  %v1915_v28 = vsel %vm1306_vm7, %v1907_v8, %v6245_v50  ;;  %v7382_v55 = vld [vmem:[%s7585_s29 + $0x41] sm:$0xff]  ;;  %v10661_v57 = vld [vmem:[#allocation18_spill] sm:$0xff] }
  0xe4   : > { %v8304_v54 = vpop.permute.xlu0 %6367  ;;  %v6259_v29 = vunpack.i.l.bf16 %v10660_v44  ;;  %v2498_v11 = vsel %vm1288_vm5, %v2490_v40, %v6239_v19  ;;  %v2499_v12 = vsel %vm1288_vm5, %v2491_v49, %v6240_v15  ;;  %v1860_v6 = vsel %vm10560_vm0, %v7381_v26, %v6254_v22  ;;  %v10663_v19 = vld [vmem:[#allocation35_spill] sm:$0xff]  ;;  %v10664_v40 = vld [vmem:[#allocation34_spill] sm:$0xff] }
  0xe5   : > { %6662 = vrot.lane.b32.xlu1 %v10654_v27, %s10583_s20  ;;  %v6260_v27 = vunpack.i.h.bf16 %v10660_v44  ;;  %v1861_v3 = vsel %vm10560_vm0, %v7382_v55, %v6255_v4  ;;  %v2506_v50 = vsel %vm1297_vm6, %v2498_v11, %v6249_v47  ;;  %v2507_v34 = vsel %vm1297_vm6, %v2499_v12, %v6250_v33  ;;  %v10667_v4 = vld [vmem:[#allocation36_spill] sm:$0xff]  ;;  %v10668_v47 = vld [vmem:[#allocation49_spill] sm:$0xff] }
  0xe6   : > { %6657 = vrot.lane.b32.xlu0 %v10659_v2, %s10656_s15  ;;  %v6274_v8 = vunpack.i.l.bf16 %v10661_v57  ;;  %v10665_v15 = vpack.i.bf16 %v10663_v19, %v10664_v40  ;;  %v2514_v22 = vsel %vm1306_vm7, %v2506_v50, %v6264_v58  ;;  %v2515_v9 = vsel %vm1306_vm7, %v2507_v34, %v6265_v35  ;;  %v10666_v2 = vld [vmem:[#allocation19_spill] sm:$0xff]  ;;  %v10670_v12 = vld [vmem:[#allocation20_spill] sm:$0xff]  ;;  %v10671_v50 = vld [vmem:[#allocation21_spill] sm:$0xff] }
  0xe7   : > { %v8326_v52 = vpop.permute.xlu1 %6382  ;;  %v6275_v7 = vunpack.i.h.bf16 %v10661_v57  ;;  %v6269_v49 = vunpack.i.l.bf16 %v10666_v2  ;;  %v10669_v33 = vpack.i.bf16 %v10667_v4, %v10668_v47  ;;  %v1922_v44 = vsel %vm1315_vm8, %v1914_v53, %v6259_v29  ;;  %v10672_v19 = vld [vmem:[#allocation22_spill] sm:$0xff] }
  0xe8   : > { %v8333_v32 = vpop.permute.xlu0 %6377  ;;  %v6270_v11 = vunpack.i.h.bf16 %v10666_v2  ;;  %v6285_v26 = vunpack.i.h.bf16 %v10670_v12  ;;  %v6284_v58 = vunpack.i.l.bf16 %v10670_v12  ;;  %v1923_v35 = vsel %vm1315_vm8, %v1915_v28, %v6260_v27  ;;  %v10673_v2 = vld [vmem:[#allocation23_spill] sm:$0xff]  ;;  %v10675_v28 = vld [vmem:[#allocation38_spill] sm:$0xff]  ;;  %v10676_v27 = vld [vmem:[#allocation37_spill] sm:$0xff] }
  0xe9   : > { %6672 = vrot.lane.b32.xlu1 %v10665_v15, %s10662_s19  ;;  %v6280_v34 = vunpack.i.h.bf16 %v10671_v50  ;;  %v6279_v57 = vunpack.i.l.bf16 %v10671_v50  ;;  %v6294_v40 = vunpack.i.l.bf16 %v10672_v19  ;;  %v1930_v53 = vsel %vm1324_vm9, %v1922_v44, %v6274_v8 }
  0xea   : > { %6667 = vrot.lane.b32.xlu0 %v10669_v33, %s10585_s30  ;;  %v6295_v29 = vunpack.i.h.bf16 %v10672_v19  ;;  %v6290_v47 = vunpack.i.h.bf16 %v10673_v2  ;;  %v6289_v33 = vunpack.i.l.bf16 %v10673_v2  ;;  %v10677_v12 = vpack.i.bf16 %v10675_v28, %v10676_v27  ;;  %v10680_v27 = vld [vmem:[#allocation25_spill] sm:$0xff] }
  0xeb   : > { %v8356_v55 = vpop.permute.xlu1 %6392  ;;  %v1931_v50 = vsel %vm1324_vm9, %v1923_v35, %v6275_v7  ;;  %v1868_v4 = vsel %vm10561_vm1, %v1860_v6, %v6269_v49  ;;  %v6304_v8 = vunpack.i.l.bf16 %v10678_v37  ;;  %v10679_v44 = vpack.i.bf16 %v8030_v17, %v8027_v13  ;;  %v7383_v6 = vld [vmem:[%s7585_s29 + $0x52] sm:$0xff]  ;;  %v7384_v37 = vld [vmem:[%s7585_s29 + $0x42] sm:$0xff] }
  0xec   : > { %v8362_v15 = vpop.permute.xlu0 %6387  ;;  %v1869_v19 = vsel %vm10561_vm1, %v1861_v3, %v6270_v11  ;;  %v2522_v2 = vsel %vm1315_vm8, %v2514_v22, %v6284_v58  ;;  %v2523_v28 = vsel %vm1315_vm8, %v2515_v9, %v6285_v26  ;;  %v2461_v49 = vsel %vm10560_vm0, %v7383_v6, %v6280_v34  ;;  %v10681_v26 = vld [vmem:[#allocation26_spill] sm:$0xff]  ;;  %v10686_v6 = vld [vmem:[#allocation40_spill] sm:$0xff] }
  0xed   : > { %6682 = vrot.lane.b32.xlu1 %v10677_v12, %s10674_s24  ;;  %v6299_v12 = vunpack.i.l.bf16 %v10680_v27  ;;  %v2460_v35 = vsel %vm10560_vm0, %v7384_v37, %v6279_v57  ;;  %v1938_v13 = vsel %vm1333_vm10, %v1930_v53, %v6294_v40  ;;  %v6300_v17 = vunpack.i.h.bf16 %v10680_v27  ;;  %v2711_v57 = vld [vmem:[%s10461_s1 + $0x30] sm:$0x11] }
  0xee   : > { %6677 = vrot.lane.b32.xlu0 %v10679_v44, %s10584_s12  ;;  %v1939_v22 = vsel %vm1333_vm10, %v1931_v50, %v6295_v29  ;;  %v1876_v9 = vsel %vm10562_vm2, %v1868_v4, %v6289_v33  ;;  %v1877_v11 = vsel %vm10562_vm2, %v1869_v19, %v6290_v47  ;;  %v6314_v58 = vunpack.i.l.bf16 %v10681_v26 }
  0xef   : > { %v8384_v7 = vpop.permute.xlu1 %6402  ;;  %v10682_v34 = vpack.i.bf16 %v8036_v24, %v8033_v43  ;;  %v2530_v40 = vsel %vm1324_vm9, %v2522_v2, %v6304_v8  ;;  %v2531_v53 = vsel %vm1324_vm9, %v2523_v28, %v6305_v1  ;;  %v10683_v4 = vpack.i.bf16 %v8042_v0, %v8039_v18  ;;  %v10684_v8 = vld [vmem:[#allocation27_spill] sm:$0xff] }
  0xf0   : > { %v8392_v3 = vpop.permute.xlu0 %6397  ;;  %v5668_v29 = vcombine.high %v2711_v57, %v2711_v57  ;;  %v2468_v47 = vsel %vm10561_vm1, %v2460_v35, %v6299_v12  ;;  %v6315_v43 = vunpack.i.h.bf16 %v10681_v26  ;;  %v5667_v33 = vcombine.low %v2711_v57, %v2711_v57  ;;  %v10685_v28 = vld [vmem:[#allocation39_spill] sm:$0xff]  ;;  %v10688_v35 = vld [vmem:[#allocation41_spill] sm:$0xff] }
  0xf1   : > { %6692 = vrot.lane.b32.xlu1 %v10682_v34, %s10599_s25  ;;  %v2469_v50 = vsel %vm10561_vm1, %v2461_v49, %v6300_v17  ;;  %v6310_v44 = vunpack.i.h.bf16 %v10684_v8  ;;  %v6309_v1 = vunpack.i.l.bf16 %v10684_v8  ;;  %v10554_v2 = vmov 0   ;;  %v10689_v34 = vld [vmem:[#allocation48_spill] sm:$0xff] }
  0xf2   : > { %6687 = vrot.lane.b32.xlu0 %v10683_v4, %s10586_s18  ;;  %v2762_v18 = vsel %vm10559_vm14, 65535, %v10554_v2  ;;  %2801 = vmatprep.mubr.bf16.mxu0 %v10554_v2  ;;  %v1946_v0 = vsel %vm10570_vm11, %v1938_v13, %v6314_v58  ;;  %v6325_v27 = vunpack.i.h.bf16 %v10685_v28  ;;  %v6324_v12 = vunpack.i.l.bf16 %v10685_v28  ;;  %v10691_v28 = vld [vmem:[#allocation52_spill] sm:$0xff] }
  0xf3   : > { %v8413_v24 = vpop.permute.xlu1 %6412  ;;  %v10687_v49 = vpack.i.bf16 %v8048_v23, %v10686_v6  ;;  %v2767_v37 = vand.u32 %v5668_v29, %v2762_v18  ;;  %v6320_v17 = vunpack.i.h.bf16 %v10688_v35  ;;  %v6319_v26 = vunpack.i.l.bf16 %v10688_v35 }
  0xf4   : > { %v8418_v19 = vpop.permute.xlu0 %6407  ;;  %v6334_v57 = vunpack.i.l.bf16 %v10689_v34  ;;  %v10690_v13 = vpack.i.bf16 %v8058_v25, %v8055_v30  ;;  %v2764_v58 = vand.u32 %v5667_v33, %v2762_v18  ;;  %v1947_v4 = vsel %vm10570_vm11, %v1939_v22, %v6315_v43  ;;  %v7188_v22 = vld [vmem:[%s10461_s1 + $0x24] ss:$8 sps:$4 sm:$0xff]  }
  0xf5   : > { %6702 = vrot.lane.b32.xlu1 %v10687_v49, %s10602_s21  ;;  %v6335_v8 = vunpack.i.h.bf16 %v10689_v34  ;;  %v6330_v23 = vunpack.i.h.bf16 %v10691_v28  ;;  %v6329_v29 = vunpack.i.l.bf16 %v10691_v28  ;;  %2777 = vmatprep.subr.bf16.mxu0 %v2767_v37  ;;  %v1884_v49 = vsel %vm1270_vm3, %v1876_v9, %v6309_v1 }
  0xf6   : > { %6697 = vrot.lane.b32.xlu0 %v10690_v13, %s10587_s11  ;;  %v1885_v35 = vsel %vm1270_vm3, %v1877_v11, %v6310_v44  ;;  %v6345_v2 = vunpack.i.h.bf16 %v8193_v46  ;;  %v6344_v25 = vunpack.i.l.bf16 %v8193_v46  ;;  %2778 = vmatpush1.bf16.msra.mxu0 %v2764_v58  ;;  %v2538_v43 = vsel %vm1333_vm10, %v2530_v40, %v6324_v12  ;;  %v7190_v46 = vld [vmem:[%s10461_s1 + $0x20] ss:$8 sps:$4 sm:$0xff]  }
  0xf7   : > { %v8441_v6 = vpop.permute.xlu1 %6422  ;;  %v2539_v33 = vsel %vm1333_vm10, %v2531_v53, %v6325_v27  ;;  %v6339_v18 = vunpack.i.l.bf16 %v8202_v10  ;;  %v6354_v9 = vunpack.i.l.bf16 %v8239_v60  ;;  %v10692_v11 = vpack.i.bf16 %v8064_v16, %v8061_v21  ;;  %2779 = vmatprep.subr.bf16.mxu0 %v7188_v22 }
  0xf8   : > { %v8447_v30 = vpop.permute.xlu0 %6417  ;;  %v2476_v44 = vsel %vm10562_vm2, %v2468_v47, %v6319_v26  ;;  %v2477_v1 = vsel %vm10562_vm2, %v2469_v50, %v6320_v17  ;;  %v1954_v40 = vsel %vm10569_vm12, %v1946_v0, %v6334_v57  ;;  %v6355_v53 = vunpack.i.h.bf16 %v8239_v60  ;;  %v7191_v17 = vld [vmem:[%s10461_s1 + $0x14] ss:$8 sps:$4 sm:$0xff]  }
  0xf9   : > { %6712 = vrot.lane.b32.xlu1 %v10692_v11, %s10605_s27  ;;  %v10693_v27 = vpack.i.bf16 %v8070_v5, %v8067_v14  ;;  %v1955_v16 = vsel %vm10569_vm12, %v1947_v4, %v6335_v8  ;;  %v1892_v21 = vsel %vm1279_vm4, %v1884_v49, %v6329_v29  ;;  %v1893_v12 = vsel %vm1279_vm4, %v1885_v35, %v6330_v23 }
  0xfa   : > { %v6340_v47 = vunpack.i.h.bf16 %v8202_v10  ;;  %v2546_v50 = vsel %vm10570_vm11, %v2538_v43, %v6344_v25  ;;  %v2547_v60 = vsel %vm10570_vm11, %v2539_v33, %v6345_v2  ;;  %v6375_v0 = vunpack.i.h.bf16 %v8298_v36  ;;  %2780 = vmatpush1.bf16.msra.mxu0 %v7190_v46  ;;  %v10694_v2 = vld [vmem:[#allocation42_spill] sm:$0xff] }
  0xfb   : > { %6707 = vrot.lane.b32.xlu0 %v10693_v27, %s10588_s26  ;;  %v8475_v37 = vpop.permute.xlu1 %6432  ;;  %v6374_v5 = vunpack.i.l.bf16 %v8298_v36  ;;  %v2484_v26 = vsel %vm1270_vm3, %v2476_v44, %v6339_v18  ;;  %v1962_v10 = vsel %vm10568_vm13, %v1954_v40, %v6354_v9  ;;  %v6350_v34 = vunpack.i.h.bf16 %v8244_v38  ;;  %v7193_v36 = vld [vmem:[%s10461_s1 + $0x10] ss:$8 sps:$4 sm:$0xff]   ;;  %2781 = vmatprep.subr.bf16.mxu0 %v7191_v17 }
  0xfc   : > { %v8481_v14 = vpop.permute.xlu0 %6427  ;;  %v6349_v57 = vunpack.i.l.bf16 %v8244_v38  ;;  %v10695_v13 = vpack.i.bf16 %v8076_v45, %v10694_v2  ;;  %v1963_v58 = vsel %vm10568_vm13, %v1955_v16, %v6355_v53  ;;  %v6365_v4 = vunpack.i.h.bf16 %v8270_v41  ;;  %v10696_v38 = vld [vmem:[#allocation44_spill] sm:$0xff]  ;;  %v10698_v44 = vld [vmem:[#allocation45_spill] sm:$0xff] }
  0xfd   : > { %v6364_v8 = vunpack.i.l.bf16 %v8270_v41  ;;  %v6360_v28 = vunpack.i.h.bf16 %v8276_v48  ;;  %v10697_v23 = vpack.i.bf16 %v8091_v51, %v10696_v38  ;;  %v6359_v45 = vunpack.i.l.bf16 %v8276_v48  ;;  %v7194_v48 = vld [vmem:[%s10461_s1 + $0x4] ss:$8 sps:$4 sm:$0xff]  }
  0xfe   : > { %6722 = vrot.lane.b32.xlu1 %v10695_v13, %s10608_s28  ;;  %v6369_v29 = vunpack.i.l.bf16 %v8304_v54  ;;  %v6385_v49 = vunpack.i.h.bf16 %v8326_v52  ;;  %v6384_v35 = vunpack.i.l.bf16 %v8326_v52  ;;  %v1970_v41 = vsel %vm10567_vm15, %v1962_v10, %v6374_v5  ;;  %2782 = vmatpush1.bf16.msra.mxu0 %v7193_v36  ;;  %v10701_v36 = vld [vmem:[#allocation47_spill] sm:$0xff] }
  0xff   : > { %6717 = vrot.lane.b32.xlu0 %v10697_v23, %s10644_s22  ;;  %v8509_v25 = vpop.permute.xlu1 %6442  ;;  %v1971_v22 = vsel %vm10567_vm15, %v1963_v58, %v6375_v0  ;;  %v6400_v43 = vunpack.i.h.bf16 %v8392_v3  ;;  %v6399_v33 = vunpack.i.l.bf16 %v8392_v3  ;;  %v2485_v9 = vsel %vm1270_vm3, %v2477_v1, %v6340_v47  ;;  %v7196_v3 = vld [vmem:[%s10461_s1] ss:$8 sps:$4 sm:$0xff]   ;;  %2783 = vmatprep.subr.bf16.mxu0 %v7194_v48  ;;  %v10702_v58 = vld [vmem:[#allocation46_spill] sm:$0xff] }
 0x100   : > { %v8515_v18 = vpop.permute.xlu0 %6437  ;;  %v1900_v52 = vsel %vm1288_vm5, %v1892_v21, %v6349_v57  ;;  %v6370_v11 = vunpack.i.h.bf16 %v8304_v54  ;;  %v6379_v46 = vunpack.i.l.bf16 %v8333_v32  ;;  %v10699_v40 = vpack.i.bf16 %v10698_v44, %v7963_v20 }
 0x101   : > { %v1901_v53 = vsel %vm1288_vm5, %v1893_v12, %v6350_v34  ;;  %v2554_v27 = vsel %vm10569_vm12, %v2546_v50, %v6364_v8  ;;  %v2555_v1 = vsel %vm10569_vm12, %v2547_v60, %v6365_v4  ;;  %v6380_v16 = vunpack.i.h.bf16 %v8333_v32 }
 0x102   : > { %6732 = vrot.lane.b32.xlu1 %v10699_v40, %s10624_s0  ;;  %v10700_v54 = vpack.i.bf16 %v8110_v31, %v8107_v61  ;;  %v2492_v20 = vsel %vm1279_vm4, %v2484_v26, %v6359_v45  ;;  %v2562_v21 = vsel %vm10568_vm13, %v2554_v27, %v6384_v35  ;;  %v2563_v47 = vsel %vm10568_vm13, %v2555_v1, %v6385_v49 }
 0x103   : > { %v8542_v0 = vpop.permute.xlu1 %6452  ;;  %v6741_v12 = vpack.i.bf16 %v1971_v22, %v1970_v41  ;;  %v2493_v50 = vsel %vm1279_vm4, %v2485_v9, %v6360_v28  ;;  %v1908_v60 = vsel %vm1297_vm6, %v1900_v52, %v6369_v29  ;;  %v2570_v32 = vsel %vm10567_vm15, %v2562_v21, %v6399_v33  ;;  %2784 = vmatpush1.bf16.msra.mxu0 %v7196_v3 }
 0x104   : > { %6727 = vrot.lane.b32.xlu0 %v10700_v54, %s10656_s15  ;;  %v2571_v5 = vsel %vm10567_vm15, %v2563_v47, %v6400_v43  ;;  %v8548_v61 = vpop.permute.xlu0 %6447  ;;  %v1909_v31 = vsel %vm1297_vm6, %v1901_v53, %v6370_v11  ;;  %v2500_v17 = vsel %vm1288_vm5, %v2492_v20, %v6379_v46  ;;  %v6390_v26 = vunpack.i.h.bf16 %v8362_v15 }
 0x105   : > { %v6389_v10 = vunpack.i.l.bf16 %v8362_v15  ;;  %v2501_v34 = vsel %vm1288_vm5, %v2493_v50, %v6380_v16  ;;  %v6395_v57 = vunpack.i.h.bf16 %v8356_v55  ;;  %v6405_v2 = vunpack.i.h.bf16 %v8384_v7 }
 0x106   : > { %6742 = vrot.lane.b32.xlu1 %v6741_v12, %s7469_s10  ;;  %v6404_v13 = vunpack.i.l.bf16 %v8384_v7  ;;  %v10703_v4 = vpack.i.bf16 %v10701_v36, %v10702_v58  ;;  %v6394_v8 = vunpack.i.l.bf16 %v8356_v55  ;;  %v6415_v15 = vunpack.i.h.bf16 %v8413_v24  ;;  %v10710_v58 = vld [vmem:[#allocation53_spill] sm:$0xff] }
 0x107   : > { %v6414_v28 = vunpack.i.l.bf16 %v8413_v24  ;;  %v8566_v38 = vpop.permute.xlu1 %6462  ;;  %v6751_v23 = vpack.i.bf16 %v2571_v5, %v2570_v32  ;;  %v6410_v45 = vunpack.i.h.bf16 %v8418_v19  ;;  %v6409_v29 = vunpack.i.l.bf16 %v8418_v19 }
 0x108   : > { %6737 = vrot.lane.b32.xlu0 %v10703_v4, %s10583_s20  ;;  %v6425_v7 = vunpack.i.h.bf16 %v8441_v6  ;;  %v6424_v49 = vunpack.i.l.bf16 %v8441_v6  ;;  %v8572_v35 = vpop.permute.xlu0 %6457  ;;  %v1916_v41 = vsel %vm1306_vm7, %v1908_v60, %v6389_v10  ;;  %v1917_v55 = vsel %vm1306_vm7, %v1909_v31, %v6390_v26  ;;  %v10707_v10 = vld [vmem:[#allocation51_spill] sm:$0xff] }
 0x109   : > { %v6420_v22 = vunpack.i.h.bf16 %v8447_v30  ;;  %v6419_v24 = vunpack.i.l.bf16 %v8447_v30  ;;  %v1924_v43 = vsel %vm1315_vm8, %v1916_v41, %v6404_v13  ;;  %v1925_v19 = vsel %vm1315_vm8, %v1917_v55, %v6405_v2 }
 0x10a   : > { %6752 = vrot.lane.b32.xlu1 %v6751_v23, %s7470_s23  ;;  %v6435_v33 = vunpack.i.h.bf16 %v8475_v37  ;;  %v6434_v6 = vunpack.i.l.bf16 %v8475_v37  ;;  %v10704_v48 = vpack.i.bf16 %v8135_v56, %v8132_v42  ;;  %v2508_v9 = vsel %vm1297_vm6, %v2500_v17, %v6394_v8 }
 0x10b   : > { %v2509_v30 = vsel %vm1297_vm6, %v2501_v34, %v6395_v57  ;;  %v1932_v52 = vsel %vm1324_vm9, %v1924_v43, %v6414_v28  ;;  %v1933_v11 = vsel %vm1324_vm9, %v1925_v19, %v6415_v15  ;;  %v8591_v46 = vpop.permute.xlu1 %6472  ;;  %v2516_v44 = vsel %vm1306_vm7, %v2508_v9, %v6409_v29  ;;  %v10708_v34 = vld [vmem:[#allocation50_spill] sm:$0xff]  ;;  %v10712_v43 = vld [vmem:[#allocation55_spill] sm:$0xff]  ;;  %v10715_v9 = vld [vmem:[#allocation57_spill] sm:$0xff] }
 0x10c   : > { %6747 = vrot.lane.b32.xlu0 %v10704_v48, %s10662_s19  ;;  %v2517_v40 = vsel %vm1306_vm7, %v2509_v30, %v6410_v45  ;;  %v1940_v37 = vsel %vm1333_vm10, %v1932_v52, %v6424_v49  ;;  %v1941_v3 = vsel %vm1333_vm10, %v1933_v11, %v6425_v7  ;;  %v6468_v42 = vpop.permute.xlu0 %6467  ;;  %v2524_v56 = vsel %vm1315_vm8, %v2516_v44, %v6419_v24  ;;  %v5392_v45 = vld [vmem:[%s7585_s29 + $0xf0] sm:$0xff]  ;;  %v10716_v30 = vld [vmem:[#allocation56_spill] sm:$0xff] }
 0x10d   : > { %v2525_v53 = vsel %vm1315_vm8, %v2517_v40, %v6420_v22  ;;  %v6430_v27 = vunpack.i.h.bf16 %v8481_v14  ;;  %v6429_v1 = vunpack.i.l.bf16 %v8481_v14  ;;  %v10705_v16 = vpack.i.bf16 %v8138_v39, %v8091_v51  ;;  %v10713_v19 = vld [vmem:[#allocation54_spill] sm:$0xff]  ;;  %v10718_v11 = vld [vmem:[#allocation36_spill] sm:$0xff] }
 0x10e   : > { %v1948_v54 = vsel %vm10570_vm11, %v1940_v37, %v6434_v6  ;;  %v1949_v20 = vsel %vm10570_vm11, %v1941_v3, %v6435_v33  ;;  %v6445_v21 = vunpack.i.h.bf16 %v8509_v25  ;;  %v6444_v47 = vunpack.i.l.bf16 %v8509_v25  ;;  %v5656_v40 = vld [vmem:[%s7585_s29 + $0x63] sm:$0xff] }
 0x10f   : > { %6762 = vrot.lane.b32.xlu1 %v10705_v16, %s7471_s13  ;;  %v10706_v12 = vpack.i.bf16 %v8144_v59, %v8141_v62  ;;  %v6440_v14 = vunpack.i.h.bf16 %v8515_v18  ;;  %v6439_v50 = vunpack.i.l.bf16 %v8515_v18  ;;  %v6455_v51 = vunpack.i.h.bf16 %v8542_v0  ;;  %v8617_v32 = vpop.permute.xlu1 %6482 }
 0x110   : > { %v6454_v60 = vunpack.i.l.bf16 %v8542_v0  ;;  %v6450_v5 = vunpack.i.h.bf16 %v8548_v61  ;;  %v6449_v31 = vunpack.i.l.bf16 %v8548_v61  ;;  %v6465_v25 = vunpack.i.h.bf16 %v8566_v38  ;;  %v8623_v59 = vpop.permute.xlu0 %6477 }
 0x111   : > { %6757 = vrot.lane.b32.xlu0 %v10706_v12, %s10674_s24  ;;  %v6464_v17 = vunpack.i.l.bf16 %v8566_v38  ;;  %v2532_v62 = vsel %vm1324_vm9, %v2524_v56, %v6429_v1  ;;  %v2533_v18 = vsel %vm1324_vm9, %v2525_v53, %v6430_v27  ;;  %v6460_v26 = vunpack.i.h.bf16 %v8572_v35  ;;  %v379_v1 = vld [vmem:[%s7585_s29 + $0x41] sm:$0xff] }
 0x112   : > { %v6459_v0 = vunpack.i.l.bf16 %v8572_v35  ;;  %v10709_v57 = vpack.i.bf16 %v10707_v10, %v10708_v34  ;;  %v1956_v61 = vsel %vm10569_vm12, %v1948_v54, %v6444_v47  ;;  %v1957_v2 = vsel %vm10569_vm12, %v1949_v20, %v6445_v21  ;;  %v8681_v54 = vld [vmem:[%s7585_s29 + $0x100] sm:$0xff]  ;;  %v8684_v20 = vld [vmem:[%s7585_s29 + $0x51] sm:$0xff] }
 0x113   : > { %v6470_v13 = vunpack.i.h.bf16 %v6468_v42  ;;  %v6469_v36 = vunpack.i.l.bf16 %v6468_v42  ;;  %v10711_v4 = vpack.i.bf16 %v8166_v63, %v10710_v58  ;;  %v2540_v8 = vsel %vm1333_vm10, %v2532_v62, %v6439_v50  ;;  %v8643_v23 = vpop.permute.xlu1 %6492  ;;  %v395_v50 = vld [vmem:[%s7585_s29 + $0x42] sm:$0xff]  ;;  %v5337_v34 = vld [vmem:[%s7585_s29 + $0x250] sm:$0xff] }
 0x114   : > { %6772 = vrot.lane.b32.xlu1 %v10709_v57, %s10602_s21  ;;  %v2541_v15 = vsel %vm1333_vm10, %v2533_v18, %v6440_v14  ;;  %v1964_v28 = vsel %vm10568_vm13, %v1956_v61, %v6454_v60  ;;  %v1965_v38 = vsel %vm10568_vm13, %v1957_v2, %v6455_v51  ;;  %v2548_v29 = vsel %vm10570_vm11, %v2540_v8, %v6449_v31  ;;  %v8650_v35 = vpop.permute.xlu0 %6487  ;;  %v396_v51 = vld [vmem:[%s7585_s29 + $0x52] sm:$0xff]  ;;  %v5314_v31 = vld [vmem:[%s7585_s29 + $0x101] sm:$0xff] }
 0x115   : > { %6767 = vrot.lane.b32.xlu0 %v10711_v4, %s10599_s25  ;;  %v2549_v7 = vsel %vm10570_vm11, %v2541_v15, %v6450_v5  ;;  %v1972_v63 = vsel %vm10567_vm15, %v1964_v28, %v6464_v17  ;;  %v1973_v49 = vsel %vm10567_vm15, %v1965_v38, %v6465_v25  ;;  %v2556_v41 = vsel %vm10569_vm12, %v2548_v29, %v6459_v0  ;;  %v5313_v5 = vld [vmem:[%s7585_s29 + $0xf1] sm:$0xff]  ;;  %v5322_v0 = vld [vmem:[%s7585_s29 + $0x102] sm:$0xff] }
 0x116   : > { %v2557_v55 = vsel %vm10569_vm12, %v2549_v7, %v6460_v26  ;;  %v6475_v22 = vunpack.i.h.bf16 %v8591_v46  ;;  %v6474_v24 = vunpack.i.l.bf16 %v8591_v46  ;;  %v10714_v33 = vpack.i.bf16 %v10712_v43, %v10713_v19  ;;  %v5655_v46 = vld [vmem:[%s7585_s29 + $0x53] sm:$0xff]  ;;  %v5338_v57 = vld [vmem:[%s7585_s29 + $0x260] sm:$0xff] }
 0x117   : > { %v2564_v6 = vsel %vm10568_vm13, %v2556_v41, %v6469_v36  ;;  %v2565_v48 = vsel %vm10568_vm13, %v2557_v55, %v6470_v13  ;;  %v10717_v52 = vpack.i.bf16 %v10715_v9, %v10716_v30  ;;  %v6786_v44 = vpack.i.bf16 %v5392_v45, %v10718_v11  ;;  %v8669_v37 = vpop.permute.xlu1 %6502  ;;  %v5321_v26 = vld [vmem:[%s7585_s29 + $0xf2] sm:$0xff]  ;;  %v5329_v2 = vld [vmem:[%s7585_s29 + $0x1a0] sm:$0xff] }
 0x118   : > { %6782 = vrot.lane.b32.xlu1 %v10714_v33, %s10608_s28  ;;  %v6791_v3 = vpack.i.bf16 %v1973_v49, %v1972_v63  ;;  %v8671_v42 = vpop.permute.xlu0 %6497  ;;  %v6801_v56 = vpack.i.bf16 %v5656_v40, %v5655_v46  ;;  %v2572_v53 = vsel %vm10567_vm15, %v2564_v6, %v6474_v24  ;;  %v2573_v27 = vsel %vm10567_vm15, %v2565_v48, %v6475_v22  ;;  %v5330_v13 = vld [vmem:[%s7585_s29 + $0x1b0] sm:$0xff]  ;;  %v8719_v4 = vld [vmem:[%s7585_s29 + $0x261] sm:$0xff] }
 0x119   : > { %6777 = vrot.lane.b32.xlu0 %v10717_v52, %s10605_s27  ;;  %v6796_v47 = vpack.i.bf16 %v2573_v27, %v2572_v53  ;;  %v6811_v12 = vpack.i.bf16 %v8684_v20, %v379_v1  ;;  %v6806_v14 = vpack.i.bf16 %v8681_v54, %v5392_v45  ;;  %v6821_v17 = vpack.i.bf16 %v396_v51, %v395_v50  ;;  %v8715_v36 = vld [vmem:[%s7585_s29 + $0x251] sm:$0xff]  ;;  %v8722_v8 = vld [vmem:[%s7585_s29 + $0x1a1] sm:$0xff] }
 0x11a   : > { %v6816_v62 = vpack.i.bf16 %v5314_v31, %v5313_v5  ;;  %v6831_v61 = vpack.i.bf16 %v5655_v46, %v8138_v39  ;;  %v6826_v58 = vpack.i.bf16 %v5322_v0, %v5321_v26  ;;  %v8725_v15 = vld [vmem:[%s7585_s29 + $0x1b1] sm:$0xff]  ;;  %v8733_v38 = vld [vmem:[%s7585_s29 + $0x262] sm:$0xff]  ;;  %v6480_v41 = vunpack.i.h.bf16 %v8623_v59 }
 0x11b   : > { %v8678_v16 = vpop.permute.xlu1 %6512  ;;  %v8730_v39 = vld [vmem:[%s7585_s29 + $0x252] sm:$0xff]  ;;  %v8736_v45 = vld [vmem:[%s7585_s29 + $0x1a2] sm:$0xff]  ;;  %v6479_v55 = vunpack.i.l.bf16 %v8623_v59  ;;  %v6841_v22 = vpack.i.bf16 %v5338_v57, %v5337_v34  ;;  %v6836_v6 = vpack.i.bf16 %v5330_v13, %v5329_v2  ;;  %v6851_v59 = vpack.i.bf16 %v8719_v4, %v8715_v36 }
 0x11c   : > { %6792 = vrot.lane.b32.xlu1 %v6791_v3, %s7469_s10  ;;  %v8686_v21 = vpop.permute.xlu0 %6507  ;;  %v8741_v7 = vld [vmem:[%s7585_s29 + $0x1b2] sm:$0xff]  ;;  %v8747_v49 = vld [vmem:[%s7585_s29 + $0x60] sm:$0xff]  ;;  %v6846_v9 = vpack.i.bf16 %v8725_v15, %v8722_v8  ;;  %v6861_v30 = vpack.i.bf16 %v8733_v38, %v8730_v39  ;;  %v6485_v3 = vunpack.i.h.bf16 %v8617_v32  ;;  %v6495_v51 = vunpack.i.h.bf16 %v8643_v23 }
 0x11d   : > { %6787 = vrot.lane.b32.xlu0 %v6786_v44, %s10624_s0  ;;  %v8744_v63 = vld [vmem:[%s7585_s29 + $0x50] sm:$0xff]  ;;  %v8753_v24 = vld [vmem:[%s7585_s29 + $0x1a3] sm:$0xff]  ;;  %v6856_v52 = vpack.i.bf16 %v8741_v7, %v8736_v45  ;;  %v6490_v5 = vunpack.i.h.bf16 %v8650_v35  ;;  %v6489_v31 = vunpack.i.l.bf16 %v8650_v35  ;;  %v6504_v0 = vunpack.i.l.bf16 %v8669_v37 }
 0x11e   : > { %v8756_v43 = vld [vmem:[%s7585_s29 + $0x1b3] sm:$0xff]  ;;  %v5402_v33 = vld [vmem:[%s7585_s29 + $0x61] sm:$0xff]  ;;  %v6871_v11 = vpack.i.bf16 %v8747_v49, %v8744_v63  ;;  %v6500_v13 = vunpack.i.h.bf16 %v8671_v42  ;;  %v6499_v36 = vunpack.i.l.bf16 %v8671_v42  ;;  %v6515_v8 = vunpack.i.h.bf16 %v8678_v16 }
 0x11f   : > { %v8694_v60 = vpop.permute.xlu1 %6522  ;;  %v8759_v19 = vld [vmem:[%s7585_s29 + $0x110] sm:$0xff]  ;;  %v8776_v44 = vld [vmem:[%s7585_s29 + $0x142] sm:$0xff]  ;;  %v6866_v27 = vpack.i.bf16 %v8756_v43, %v8753_v24  ;;  %v1863_v50 = vsel %vm10560_vm0, %v5402_v33, %v6480_v41  ;;  %v6514_v15 = vunpack.i.l.bf16 %v8678_v16  ;;  %v6509_v42 = vunpack.i.l.bf16 %v8686_v21 }
 0x120   : > { %6802 = vrot.lane.b32.xlu1 %v6801_v56, %s7471_s13  ;;  %v8698_v25 = vpop.permute.xlu0 %6517  ;;  %v8779_v46 = vld [vmem:[%s7585_s29 + $0x83] sm:$0xff]  ;;  %v8782_v40 = vld [vmem:[%s7585_s29 + $0x93] sm:$0xff]  ;;  %v6484_v56 = vunpack.i.l.bf16 %v8617_v32  ;;  %v6881_v1 = vpack.i.bf16 %v8759_v19, %v8681_v54  ;;  %v6494_v32 = vunpack.i.l.bf16 %v8643_v23  ;;  %v6505_v23 = vunpack.i.h.bf16 %v8669_v37 }
 0x121   : > { %6797 = vrot.lane.b32.xlu0 %v6796_v47, %s7470_s23  ;;  %v8793_v47 = vld [vmem:[%s7585_s29 + $0x122] sm:$0xff]  ;;  %v1871_v2 = vsel %vm10561_vm1, %v1863_v50, %v6485_v3  ;;  %v7386_v39 = vld [vmem:[%s7585_s29 + $0x72] sm:$0xff]  ;;  %v6524_v16 = vunpack.i.l.bf16 %v8694_v60  ;;  %vm10566_vm14 = vcmask 130048  }
 0x122   : > { %v5529_v26 = vld [vmem:[%s7585_s29 + $0x62] sm:$0xff]  ;;  %v1879_v4 = vsel %vm10562_vm2, %v1871_v2, %v6495_v51  ;;  %v2463_v38 = vsel %vm10560_vm0, %v7386_v39, %v6490_v5 }
 0x123   : > { %v8702_v18 = vpop.permute.xlu1 %6532  ;;  %v2462_v41 = vsel %vm10560_vm0, %v5529_v26, %v6489_v31  ;;  %v1887_v33 = vsel %vm1270_vm3, %v1879_v4, %v6505_v23 }
 0x124   : > { %6812 = vrot.lane.b32.xlu1 %v6811_v12, %s10584_s12  ;;  %v8706_v10 = vpop.permute.xlu0 %6527  ;;  %v5435_v12 = vld [vmem:[%s7585_s29 + $0x73] sm:$0xff]  ;;  %v2470_v3 = vsel %vm10561_vm1, %v2462_v41, %v6499_v36  ;;  %v1895_v50 = vsel %vm1279_vm4, %v1887_v33, %v6515_v8  ;;  %v6535_v51 = vunpack.i.h.bf16 %v8702_v18 }
 0x125   : > { %6807 = vrot.lane.b32.xlu0 %v6806_v14, %s10585_s30  ;;  %v1862_v14 = vsel %vm10560_vm0, %v8684_v20, %v6479_v55  ;;  %v6901_v20 = vpack.i.bf16 %v8782_v40, %v8779_v46  ;;  %v8820_v57 = vpack.i.bf16 %v8779_v46, %v5435_v12  ;;  %v6510_v55 = vunpack.i.h.bf16 %v8686_v21  ;;  %v5556_v46 = vld [vmem:[%s7585_s29 + $0x1f0] sm:$0xff] }
 0x126   : > { %v6520_v12 = vunpack.i.h.bf16 %v8698_v25  ;;  %v6519_v21 = vunpack.i.l.bf16 %v8698_v25  ;;  %v6530_v31 = vunpack.i.h.bf16 %v8706_v10  ;;  %v6529_v25 = vunpack.i.l.bf16 %v8706_v10 }
 0x127   : > { %v8727_v28 = vpop.permute.xlu1 %6542 }
 0x128   : > { %6822 = vrot.lane.b32.xlu1 %v6821_v17, %s10587_s11  ;;  %v8738_v29 = vpop.permute.xlu0 %6537  ;;  %v8806_v17 = vld [vmem:[%s7585_s29 + $0x132] sm:$0xff] }
 0x129   : > { %6817 = vrot.lane.b32.xlu0 %v6816_v62, %s10586_s18  ;;  %v6891_v62 = vpack.i.bf16 %v8776_v44, %v8806_v17  ;;  %v6896_v35 = vpack.i.bf16 %v8806_v17, %v8793_v47  ;;  %v6540_v10 = vunpack.i.h.bf16 %v8738_v29 }
 0x12b   : > { %v8765_v48 = vpop.permute.xlu1 %6552 }
 0x12c   : > { %6832 = vrot.lane.b32.xlu1 %v6831_v61, %s10644_s22  ;;  %v8786_v53 = vpop.permute.xlu0 %6547  ;;  %v1870_v61 = vsel %vm10561_vm1, %v1862_v14, %v6484_v56  ;;  %v2471_v56 = vsel %vm10561_vm1, %v2463_v38, %v6500_v13  ;;  %v6539_v13 = vunpack.i.l.bf16 %v8738_v29 }
 0x12d   : > { %6827 = vrot.lane.b32.xlu0 %v6826_v58, %s10588_s26  ;;  %v1878_v37 = vsel %vm10562_vm2, %v1870_v61, %v6494_v32  ;;  %v2478_v32 = vsel %vm10562_vm2, %v2470_v3, %v6509_v42  ;;  %v2479_v5 = vsel %vm10562_vm2, %v2471_v56, %v6510_v55  ;;  %v6550_v29 = vunpack.i.h.bf16 %v8786_v53 }
 0x12e   : > { %v2486_v61 = vsel %vm1270_vm3, %v2478_v32, %v6519_v21  ;;  %v2487_v2 = vsel %vm1270_vm3, %v2479_v5, %v6520_v12  ;;  %v6549_v8 = vunpack.i.l.bf16 %v8786_v53 }
 0x12f   : > { %v8815_v34 = vpop.permute.xlu1 %6562  ;;  %v2495_v4 = vsel %vm1279_vm4, %v2487_v2, %v6530_v31 }
 0x130   : > { %6842 = vrot.lane.b32.xlu1 %v6841_v22, %s10583_s20  ;;  %v8826_v58 = vpop.permute.xlu0 %6557  ;;  %v1886_v22 = vsel %vm1270_vm3, %v1878_v37, %v6504_v0  ;;  %v6554_v37 = vunpack.i.l.bf16 %v8765_v48  ;;  %v6565_v63 = vunpack.i.h.bf16 %v8815_v34  ;;  %v6564_v49 = vunpack.i.l.bf16 %v8815_v34 }
 0x131   : > { %6837 = vrot.lane.b32.xlu0 %v6836_v6, %s10656_s15  ;;  %v6525_v6 = vunpack.i.h.bf16 %v8694_v60  ;;  %v6534_v60 = vunpack.i.l.bf16 %v8702_v18  ;;  %v6545_v18 = vunpack.i.h.bf16 %v8727_v28  ;;  %v2503_v38 = vsel %vm1288_vm5, %v2495_v4, %v6540_v10 }
 0x132   : > { %v6560_v53 = vunpack.i.h.bf16 %v8826_v58  ;;  %v6559_v41 = vunpack.i.l.bf16 %v8826_v58 }
 0x133   : > { %v1903_v23 = vsel %vm1288_vm5, %v1895_v50, %v6525_v6  ;;  %v10719_v6 = vld [vmem:[#allocation31_spill] sm:$0xff] }
 0x134   : > { %6852 = vrot.lane.b32.xlu1 %v6851_v59, %s10674_s24  ;;  %v8843_v59 = vpop.permute.xlu1 %6572  ;;  %v8849_v14 = vpop.permute.xlu0 %6567  ;;  %v1911_v7 = vsel %vm1297_vm6, %v1903_v23, %v6535_v51 }
 0x135   : > { %6847 = vrot.lane.b32.xlu0 %v6846_v9, %s10662_s19  ;;  %v1894_v9 = vsel %vm1279_vm4, %v1886_v22, %v6514_v15  ;;  %v1919_v15 = vsel %vm1306_vm7, %v1911_v7, %v6545_v18  ;;  %v6574_v42 = vunpack.i.l.bf16 %v8843_v59  ;;  %v2511_v22 = vsel %vm1297_vm6, %v2503_v38, %v6550_v29 }
 0x136   : > { %v1902_v26 = vsel %vm1288_vm5, %v1894_v9, %v6524_v16  ;;  %v6570_v58 = vunpack.i.h.bf16 %v8849_v14  ;;  %v6569_v33 = vunpack.i.l.bf16 %v8849_v14  ;;  %v2519_v19 = vsel %vm1306_vm7, %v2511_v22, %v6560_v53  ;;  %v8962_v22 = vld [vmem:[%s7585_s29 + $0x1d0] sm:$0xff] }
 0x137   : > { %v1910_v45 = vsel %vm1297_vm6, %v1902_v26, %v6534_v60  ;;  %v10720_v26 = vld [vmem:[#allocation43_spill] sm:$0xff] }
 0x138   : > { %6862 = vrot.lane.b32.xlu1 %v6861_v30, %s10602_s21  ;;  %v6544_v30 = vunpack.i.l.bf16 %v8727_v28  ;;  %v6583_v0 = vpop.permute.xlu1 %6582  ;;  %v8872_v36 = vpop.permute.xlu0 %6577  ;;  %v2494_v28 = vsel %vm1279_vm4, %v2486_v61, %v6529_v25  ;;  %v2527_v5 = vsel %vm1315_vm8, %v2519_v19, %v6570_v58 }
 0x139   : > { %6857 = vrot.lane.b32.xlu0 %v6856_v52, %s10599_s25  ;;  %v6555_v52 = vunpack.i.h.bf16 %v8765_v48  ;;  %v2502_v39 = vsel %vm1288_vm5, %v2494_v28, %v6539_v13  ;;  %v6585_v3 = vunpack.i.h.bf16 %v6583_v0  ;;  %v6584_v56 = vunpack.i.l.bf16 %v6583_v0 }
 0x13a   : > { %v1918_v48 = vsel %vm1306_vm7, %v1910_v45, %v6544_v30  ;;  %v2510_v34 = vsel %vm1297_vm6, %v2502_v39, %v6549_v8  ;;  %v6580_v31 = vunpack.i.h.bf16 %v8872_v36  ;;  %v6579_v25 = vunpack.i.l.bf16 %v8872_v36 }
 0x13b   : > { %v1926_v24 = vsel %vm1315_vm8, %v1918_v48, %v6554_v37  ;;  %v1927_v43 = vsel %vm1315_vm8, %v1919_v15, %v6555_v52  ;;  %v2518_v54 = vsel %vm1306_vm7, %v2510_v34, %v6559_v41 }
 0x13c   : > { %6872 = vrot.lane.b32.xlu1 %v6871_v11, %s10608_s28  ;;  %v6593_v11 = vpop.permute.xlu1 %6592  ;;  %v6588_v55 = vpop.permute.xlu0 %6587  ;;  %v1934_v16 = vsel %vm1324_vm9, %v1926_v24, %v6564_v49  ;;  %v2526_v32 = vsel %vm1315_vm8, %v2518_v54, %v6569_v33  ;;  %v2535_v15 = vsel %vm1324_vm9, %v2527_v5, %v6580_v31 }
 0x13d   : > { %6867 = vrot.lane.b32.xlu0 %v6866_v27, %s10605_s27  ;;  %v6575_v27 = vunpack.i.h.bf16 %v8843_v59  ;;  %v1935_v59 = vsel %vm1324_vm9, %v1927_v43, %v6565_v63  ;;  %v6594_v21 = vunpack.i.l.bf16 %v6593_v11  ;;  %v1942_v50 = vsel %vm1333_vm10, %v1934_v16, %v6574_v42  ;;  %v5563_v16 = vld [vmem:[%s7585_s29 + $0x290] sm:$0xff] }
 0x13e   : > { %v1950_v23 = vsel %vm10570_vm11, %v1942_v50, %v6584_v56  ;;  %v6590_v30 = vunpack.i.h.bf16 %v6588_v55  ;;  %v6589_v0 = vunpack.i.l.bf16 %v6588_v55  ;;  %v2534_v48 = vsel %vm1324_vm9, %v2526_v32, %v6579_v25  ;;  %v5571_v50 = vld [vmem:[%s7585_s29 + $0x1e1] sm:$0xff]  ;;  %v5579_v25 = vld [vmem:[%s7585_s29 + $0x291] sm:$0xff] }
 0x13f   : > { %v1943_v14 = vsel %vm1333_vm10, %v1935_v59, %v6575_v27  ;;  %v5564_v59 = vld [vmem:[%s7585_s29 + $0x2a0] sm:$0xff] }
 0x140   : > { %6882 = vrot.lane.b32.xlu1 %v6881_v1, %s10624_s0  ;;  %v6603_v12 = vpop.permute.xlu1 %6602  ;;  %v6595_v1 = vunpack.i.h.bf16 %v6593_v11  ;;  %v6598_v9 = vpop.permute.xlu0 %6597  ;;  %v1951_v18 = vsel %vm10570_vm11, %v1943_v14, %v6585_v3  ;;  %v5555_v11 = vld [vmem:[%s7585_s29 + $0x1e0] sm:$0xff]  ;;  %v2542_v40 = vsel %vm1333_vm10, %v2534_v48, %v6589_v0  ;;  %v6931_v54 = vpack.i.bf16 %v5564_v59, %v5563_v16  ;;  %v5572_v14 = vld [vmem:[%s7585_s29 + $0x1f1] sm:$0xff] }
 0x141   : > { %6877 = vrot.lane.b32.xlu0 %v10719_v6, %s10585_s30  ;;  %v6605_v51 = vunpack.i.h.bf16 %v6603_v12  ;;  %v6604_v60 = vunpack.i.l.bf16 %v6603_v12  ;;  %v6600_v52 = vunpack.i.h.bf16 %v6598_v9  ;;  %v6599_v37 = vunpack.i.l.bf16 %v6598_v9 }
 0x142   : > { %v1959_v2 = vsel %vm10569_vm12, %v1951_v18, %v6595_v1  ;;  %v6916_v43 = vpack.i.bf16 %v5556_v46, %v5555_v11  ;;  %v6926_v56 = vpack.i.bf16 %v5555_v11, %v8962_v22  ;;  %v8978_v1 = vld [vmem:[%s7585_s29 + $0x280] sm:$0xff]  ;;  %v6946_v32 = vpack.i.bf16 %v5572_v14, %v5571_v50  ;;  %v5604_v46 = vld [vmem:[%s7585_s29 + $0x1f3] sm:$0xff] }
 0x143   : > { %v1967_v7 = vsel %vm10568_vm13, %v1959_v2, %v6605_v51  ;;  %v2550_v41 = vsel %vm10570_vm11, %v2542_v40, %v6599_v37  ;;  %v6941_v9 = vpack.i.bf16 %v5563_v16, %v8978_v1  ;;  %v9003_v18 = vld [vmem:[%s7585_s29 + $0x281] sm:$0xff]  ;;  %v5595_v37 = vld [vmem:[%s7585_s29 + $0x292] sm:$0xff] }
 0x144   : > { %6892 = vrot.lane.b32.xlu1 %v6891_v62, %s10585_s30  ;;  %v6613_v61 = vpop.permute.xlu1 %6612  ;;  %v1958_v62 = vsel %vm10569_vm12, %v1950_v23, %v6594_v21  ;;  %v6608_v45 = vpop.permute.xlu0 %6607  ;;  %v6961_v0 = vpack.i.bf16 %v5579_v25, %v9003_v18  ;;  %v5603_v11 = vld [vmem:[%s7585_s29 + $0x1e3] sm:$0xff]  ;;  %v9039_v40 = vld [vmem:[%s7585_s29 + $0x1d3] sm:$0xff] }
 0x145   : > { %6887 = vrot.lane.b32.xlu0 %v10720_v26, %s10584_s12  ;;  %v6615_v10 = vunpack.i.h.bf16 %v6613_v61  ;;  %v6614_v13 = vunpack.i.l.bf16 %v6613_v61  ;;  %v1966_v36 = vsel %vm10568_vm13, %v1958_v62, %v6604_v60  ;;  %v6610_v29 = vunpack.i.h.bf16 %v6608_v45  ;;  %v8990_v60 = vld [vmem:[%s7585_s29 + $0x1d1] sm:$0xff]  ;;  %v5580_v26 = vld [vmem:[%s7585_s29 + $0x2a1] sm:$0xff] }
 0x146   : > { %v6609_v8 = vunpack.i.l.bf16 %v6608_v45  ;;  %v6951_v31 = vpack.i.bf16 %v5571_v50, %v8990_v60  ;;  %v5587_v61 = vld [vmem:[%s7585_s29 + $0x1e2] sm:$0xff]  ;;  %v5588_v62 = vld [vmem:[%s7585_s29 + $0x1f2] sm:$0xff] }
 0x147   : > { %v1974_v28 = vsel %vm10567_vm15, %v1966_v36, %v6614_v13  ;;  %v1975_v4 = vsel %vm10567_vm15, %v1967_v7, %v6615_v10  ;;  %v9015_v10 = vld [vmem:[%s7585_s29 + $0x1d2] sm:$0xff]  ;;  %v6966_v13 = vpack.i.bf16 %v5588_v62, %v5587_v61  ;;  %v9084_v14 = vld [vmem:[%s7585_s29 + $0xa1] sm:$0xff] }
 0x148   : > { %6902 = vrot.lane.b32.xlu1 %v6901_v20, %s10584_s12  ;;  %v6623_v63 = vpop.permute.xlu1 %6622  ;;  %v6906_v49 = vpack.i.bf16 %v1975_v4, %v1974_v28  ;;  %v2543_v20 = vsel %vm1333_vm10, %v2535_v15, %v6590_v30  ;;  %v6618_v53 = vpop.permute.xlu0 %6617  ;;  %v2558_v55 = vsel %vm10569_vm12, %v2550_v41, %v6609_v8  ;;  %v6956_v30 = vpack.i.bf16 %v5580_v26, %v5579_v25  ;;  %v5596_v28 = vld [vmem:[%s7585_s29 + $0x2a2] sm:$0xff]  ;;  %v9081_v50 = vld [vmem:[%s7585_s29 + $0x91] sm:$0xff] }
 0x149   : > { %6897 = vrot.lane.b32.xlu0 %v6896_v35, %s10586_s18  ;;  %v6625_v39 = vunpack.i.h.bf16 %v6623_v63  ;;  %v6624_v38 = vunpack.i.l.bf16 %v6623_v63  ;;  %v2551_v47 = vsel %vm10570_vm11, %v2543_v20, %v6600_v52  ;;  %v6620_v17 = vunpack.i.h.bf16 %v6618_v53  ;;  %v9027_v4 = vld [vmem:[%s7585_s29 + $0x282] sm:$0xff]  ;;  %v9094_v26 = vld [vmem:[%s7585_s29 + $0x151] sm:$0xff] }
 0x14a   : > { %v6619_v35 = vunpack.i.l.bf16 %v6618_v53  ;;  %v2559_v24 = vsel %vm10569_vm12, %v2551_v47, %v6610_v29  ;;  %v6971_v52 = vpack.i.bf16 %v5587_v61, %v9015_v10  ;;  %v358_v29 = vld [vmem:[%s7585_s29] sm:$0xff]  ;;  %v6976_v63 = vpack.i.bf16 %v5596_v28, %v5595_v37 }
 0x14b   : > { %v2567_v42 = vsel %vm10568_vm13, %v2559_v24, %v6620_v17  ;;  %v9091_v25 = vld [vmem:[%s7585_s29 + $0x141] sm:$0xff] }
 0x14c   : > { %6912 = vrot.lane.b32.xlu1 %v8820_v57, %s10587_s11  ;;  %v2566_v27 = vsel %vm10568_vm13, %v2558_v55, %v6619_v35  ;;  %v8959_v34 = vpop.permute.xlu1 %6632  ;;  %v8964_v58 = vpop.permute.xlu0 %6627  ;;  %v2575_v6 = vsel %vm10567_vm15, %v2567_v42, %v6625_v39  ;;  %v7387_v39 = vld [vmem:[%s7585_s29 + $0x10] sm:$0xff]  ;;  %v6986_v35 = vpack.i.bf16 %v5604_v46, %v5603_v11  ;;  %v6991_v55 = vpack.i.bf16 %v5603_v11, %v9039_v40 }
 0x14d   : > { %6907 = vrot.lane.b32.xlu0 %v6906_v49, %s7469_s10  ;;  %v2574_v33 = vsel %vm10567_vm15, %v2566_v27, %v6624_v38  ;;  %v6630_v45 = vunpack.i.h.bf16 %v8964_v58  ;;  %v6629_v36 = vunpack.i.l.bf16 %v8964_v58  ;;  %v6635_v48 = vunpack.i.h.bf16 %v8959_v34  ;;  %v5612_v58 = vld [vmem:[%s7585_s29 + $0xa0] sm:$0xff] }
 0x14e   : > { %v6921_v3 = vpack.i.bf16 %v2575_v6, %v2574_v33  ;;  %v6634_v15 = vunpack.i.l.bf16 %v8959_v34  ;;  %v6981_v49 = vpack.i.bf16 %v5595_v37, %v9027_v4  ;;  %v5611_v34 = vld [vmem:[%s7585_s29 + $0x90] sm:$0xff]  ;;  %v9060_v33 = vld [vmem:[%s7585_s29 + $0x80] sm:$0xff]  ;;  %v7026_v11 = vpack.i.bf16 %v9094_v26, %v9091_v25 }
 0x14f   : > { %v1244_v20 = vsel %vm10560_vm0, %v358_v29, %v6629_v36  ;;  %v1245_v38 = vsel %vm10560_vm0, %v7387_v39, %v6630_v45  ;;  %v9105_v45 = vld [vmem:[%s7585_s29 + $0x92] sm:$0xff]  ;;  %v9108_v36 = vld [vmem:[%s7585_s29 + $0xa2] sm:$0xff] }
 0x150   : > { %6922 = vrot.lane.b32.xlu1 %v6921_v3, %s7470_s23  ;;  %v8973_v12 = vpop.permute.xlu1 %6642  ;;  %v8975_v19 = vpop.permute.xlu0 %6637  ;;  %v1253_v27 = vsel %vm10561_vm1, %v1244_v20, %v6634_v15  ;;  %v1254_v42 = vsel %vm10561_vm1, %v1245_v38, %v6635_v48  ;;  %v7036_v20 = vpack.i.bf16 %v9108_v36, %v9105_v45  ;;  %v9134_v39 = vld [vmem:[%s7585_s29 + $0x152] sm:$0xff] }
 0x151   : > { %6917 = vrot.lane.b32.xlu0 %v6916_v43, %s10586_s18  ;;  %v6640_v53 = vunpack.i.h.bf16 %v8975_v19  ;;  %v6639_v41 = vunpack.i.l.bf16 %v8975_v19  ;;  %v6645_v24 = vunpack.i.h.bf16 %v8973_v12  ;;  %v6644_v43 = vunpack.i.l.bf16 %v8973_v12  ;;  %v9070_v12 = vld [vmem:[%s7585_s29 + $0x140] sm:$0xff]  ;;  %v9137_v38 = vld [vmem:[%s7585_s29 + $0x110] sm:$0xff] }
 0x153   : > { %v1262_v6 = vsel %vm10562_vm2, %v1253_v27, %v6639_v41  ;;  %v1263_v16 = vsel %vm10562_vm2, %v1254_v42, %v6640_v53  ;;  %v9140_v53 = vld [vmem:[%s7585_s29 + $0x120] sm:$0xff]  ;;  %v9151_v27 = vld [vmem:[%s7585_s29 + $0x111] sm:$0xff] }
 0x154   : > { %6932 = vrot.lane.b32.xlu1 %v6931_v54, %s10587_s11  ;;  %v8982_v21 = vpop.permute.xlu1 %6652  ;;  %v8987_v51 = vpop.permute.xlu0 %6647  ;;  %v9073_v54 = vld [vmem:[%s7585_s29 + $0x150] sm:$0xff]  ;;  %v1271_v61 = vsel %vm1270_vm3, %v1262_v6, %v6644_v43  ;;  %v1272_v62 = vsel %vm1270_vm3, %v1263_v16, %v6645_v24  ;;  %v9148_v43 = vld [vmem:[%s7585_s29 + $0x61] sm:$0xff] }
 0x155   : > { %6927 = vrot.lane.b32.xlu0 %v6926_v56, %s10588_s26  ;;  %v6650_v59 = vunpack.i.h.bf16 %v8987_v51  ;;  %v6649_v3 = vunpack.i.l.bf16 %v8987_v51  ;;  %v6996_v51 = vpack.i.bf16 %v5612_v58, %v5611_v34  ;;  %v7006_v15 = vpack.i.bf16 %v9073_v54, %v9070_v12  ;;  %v9154_v42 = vld [vmem:[%s7585_s29 + $0x121] sm:$0xff] }
 0x156   : > { %v7041_v54 = vpack.i.bf16 %v9134_v39, %v8776_v44 }
 0x157   : > { %v1281_v37 = vsel %vm1279_vm4, %v1272_v62, %v6650_v59 }
 0x158   : > { %6942 = vrot.lane.b32.xlu1 %v6941_v9, %s10644_s22  ;;  %v8995_v5 = vpop.permute.xlu1 %6662  ;;  %v9000_v23 = vpop.permute.xlu0 %6657  ;;  %v9078_v9 = vld [vmem:[%s7585_s29 + $0x130] sm:$0xff] }
 0x159   : > { %6937 = vrot.lane.b32.xlu0 %v8820_v57, %s7471_s13  ;;  %v6659_v28 = vunpack.i.l.bf16 %v9000_v23  ;;  %v6665_v41 = vunpack.i.h.bf16 %v8995_v5 }
 0x15c   : > { %6952 = vrot.lane.b32.xlu1 %v6951_v31, %s10656_s15  ;;  %v9007_v57 = vpop.permute.xlu1 %6672  ;;  %v9012_v2 = vpop.permute.xlu0 %6667  ;;  %v9088_v31 = vld [vmem:[%s7585_s29 + $0x81] sm:$0xff] }
 0x15d   : > { %6947 = vrot.lane.b32.xlu0 %v6946_v32, %s10588_s26  ;;  %v7001_v32 = vpack.i.bf16 %v5611_v34, %v9060_v33  ;;  %v6675_v6 = vunpack.i.h.bf16 %v9007_v57  ;;  %v6670_v59 = vunpack.i.h.bf16 %v9012_v2 }
 0x160   : > { %6962 = vrot.lane.b32.xlu1 %v6961_v0, %s10583_s20  ;;  %v9021_v7 = vpop.permute.xlu1 %6682  ;;  %v9030_v8 = vpop.permute.xlu0 %6677  ;;  %v6654_v0 = vunpack.i.l.bf16 %v8982_v21 }
 0x161   : > { %6957 = vrot.lane.b32.xlu0 %v6956_v30, %s10644_s22  ;;  %v6655_v30 = vunpack.i.h.bf16 %v8982_v21  ;;  %v6660_v21 = vunpack.i.h.bf16 %v9000_v23  ;;  %v7021_v23 = vpack.i.bf16 %v9081_v50, %v9088_v31  ;;  %v6680_v62 = vunpack.i.h.bf16 %v9030_v8 }
 0x163   : > { %v1290_v24 = vsel %vm1288_vm5, %v1281_v37, %v6655_v30 }
 0x164   : > { %6972 = vrot.lane.b32.xlu1 %v6971_v52, %s10662_s19  ;;  %v9047_v47 = vpop.permute.xlu1 %6692  ;;  %v9049_v17 = vpop.permute.xlu0 %6687  ;;  %v1280_v52 = vsel %vm1279_vm4, %v1271_v61, %v6649_v3  ;;  %v1299_v58 = vsel %vm1297_vm6, %v1290_v24, %v6660_v21  ;;  %v6669_v3 = vunpack.i.l.bf16 %v9012_v2  ;;  %v7056_v2 = vpack.i.bf16 %v9154_v42, %v9151_v27  ;;  %v7389_v24 = vld [vmem:[%s7585_s29 + $0x30] sm:$0xff] }
 0x165   : > { %6967 = vrot.lane.b32.xlu0 %v6966_v13, %s10656_s15  ;;  %v9102_v13 = vld [vmem:[%s7585_s29 + $0x131] sm:$0xff]  ;;  %v1308_v61 = vsel %vm1306_vm7, %v1299_v58, %v6665_v41  ;;  %v6695_v21 = vunpack.i.h.bf16 %v9047_v47 }
 0x166   : > { %v7031_v46 = vpack.i.bf16 %v9091_v25, %v9102_v13 }
 0x168   : > { %6982 = vrot.lane.b32.xlu1 %v6981_v49, %s10674_s24  ;;  %v9067_v56 = vpop.permute.xlu1 %6702  ;;  %v9075_v19 = vpop.permute.xlu0 %6697  ;;  %v7016_v49 = vpack.i.bf16 %v9084_v14, %v9081_v50  ;;  %v9170_v14 = vld [vmem:[%s7585_s29 + $0x71] sm:$0xff] }
 0x169   : > { %6977 = vrot.lane.b32.xlu0 %v6976_v63, %s10583_s20  ;;  %v7011_v63 = vpack.i.bf16 %v9070_v12, %v9078_v9  ;;  %v7051_v30 = vpack.i.bf16 %v9170_v14, %v9148_v43 }
 0x16c   : > { %6992 = vrot.lane.b32.xlu1 %v6991_v55, %s10599_s25  ;;  %v9115_v29 = vpop.permute.xlu1 %6712  ;;  %v1289_v55 = vsel %vm1288_vm5, %v1280_v52, %v6654_v0  ;;  %v6679_v52 = vunpack.i.l.bf16 %v9030_v8  ;;  %v1247_v8 = vsel %vm10560_vm0, %v7389_v24, %v6670_v59  ;;  %v6700_v59 = vunpack.i.h.bf16 %v9075_v19 }
 0x16d   : > { %6987 = vrot.lane.b32.xlu0 %v6986_v35, %s10662_s19  ;;  %v9117_v48 = vpop.permute.xlu0 %6707  ;;  %v6664_v35 = vunpack.i.l.bf16 %v8995_v5  ;;  %v1298_v34 = vsel %vm1297_vm6, %v1289_v55, %v6659_v28  ;;  %v6674_v5 = vunpack.i.l.bf16 %v9007_v57  ;;  %v6685_v57 = vunpack.i.h.bf16 %v9021_v7 }
 0x16e   : > { %v6694_v28 = vunpack.i.l.bf16 %v9047_v47 }
 0x16f   : > { %v1307_v0 = vsel %vm1306_vm7, %v1298_v34, %v6664_v35  ;;  %v7388_v35 = vld [vmem:[%s7585_s29 + $0x20] sm:$0xff]  ;;  %v6689_v34 = vunpack.i.l.bf16 %v9049_v17 }
 0x170   : > { %7002 = vrot.lane.b32.xlu1 %v7001_v32, %s10602_s21  ;;  %v9161_v16 = vpop.permute.xlu1 %6722  ;;  %v6684_v32 = vunpack.i.l.bf16 %v9021_v7  ;;  %v1316_v37 = vsel %vm1315_vm8, %v1307_v0, %v6674_v5  ;;  %v1317_v7 = vsel %vm1315_vm8, %v1308_v61, %v6675_v6  ;;  %v1246_v41 = vsel %vm10560_vm0, %v7388_v35, %v6669_v3 }
 0x171   : > { %6997 = vrot.lane.b32.xlu0 %v6996_v51, %s10674_s24  ;;  %v9165_v12 = vpop.permute.xlu0 %6717  ;;  %v7046_v51 = vpack.i.bf16 %v9140_v53, %v9137_v38  ;;  %v1326_v47 = vsel %vm1324_vm9, %v1317_v7, %v6685_v57  ;;  %v6704_v5 = vunpack.i.l.bf16 %v9067_v56  ;;  %v1255_v3 = vsel %vm10561_vm1, %v1246_v41, %v6679_v52 }
 0x172   : > { %v1325_v6 = vsel %vm1324_vm9, %v1316_v37, %v6684_v32  ;;  %v1256_v0 = vsel %vm10561_vm1, %v1247_v8, %v6680_v62  ;;  %v6699_v61 = vunpack.i.l.bf16 %v9075_v19  ;;  %vm10565_vm0 = vcmask 261120  }
 0x173   : > { %v1335_v57 = vsel %vm1333_vm10, %v1326_v47, %v6695_v21  ;;  %v6715_v32 = vunpack.i.h.bf16 %v9115_v29  ;;  %vm10564_vm1 = vcmask 392192   ;;  %v1264_v19 = vsel %vm10562_vm2, %v1255_v3, %v6689_v34 }
 0x174   : > { %7012 = vrot.lane.b32.xlu1 %v7011_v63, %s10605_s27  ;;  %v9190_v55 = vpop.permute.xlu1 %6732  ;;  %v6705_v63 = vunpack.i.h.bf16 %v9067_v56  ;;  %v6714_v56 = vunpack.i.l.bf16 %v9115_v29  ;;  %v6710_v52 = vunpack.i.h.bf16 %v9117_v48  ;;  %v6709_v37 = vunpack.i.l.bf16 %v9117_v48 }
 0x175   : > { %7007 = vrot.lane.b32.xlu0 %v7006_v15, %s10599_s25  ;;  %v6690_v15 = vunpack.i.h.bf16 %v9049_v17  ;;  %v1334_v17 = vsel %vm1333_vm10, %v1325_v6, %v6694_v28  ;;  %v6725_v28 = vunpack.i.h.bf16 %v9161_v16  ;;  %v6724_v50 = vunpack.i.l.bf16 %v9161_v16 }
 0x176   : > { %v9198_v58 = vpop.permute.xlu0 %6727  ;;  %v1343_v21 = vsel %vm10570_vm11, %v1334_v17, %v6704_v5  ;;  %v1344_v29 = vsel %vm10570_vm11, %v1335_v57, %v6705_v63  ;;  %v6720_v41 = vunpack.i.h.bf16 %v9165_v12  ;;  %v6719_v24 = vunpack.i.l.bf16 %v9165_v12 }
 0x177   : > { %v1352_v48 = vsel %vm10569_vm12, %v1343_v21, %v6714_v56  ;;  %v1353_v8 = vsel %vm10569_vm12, %v1344_v29, %v6715_v32  ;;  %v6735_v16 = vunpack.i.h.bf16 %v9190_v55  ;;  %v6730_v13 = vunpack.i.h.bf16 %v9198_v58  ;;  %v5323_v29 = vld [vmem:[%s7585_s29 + $0x112] sm:$0xff] }
 0x178   : > { %7022 = vrot.lane.b32.xlu1 %v7021_v23, %s10608_s28  ;;  %v6743_v62 = vpop.permute.xlu1 %6742  ;;  %v1273_v23 = vsel %vm1270_vm3, %v1264_v19, %v6699_v61  ;;  %v1361_v63 = vsel %vm10568_vm13, %v1352_v48, %v6724_v50  ;;  %v1362_v5 = vsel %vm10568_vm13, %v1353_v8, %v6725_v28  ;;  %v397_v19 = vld [vmem:[%s7585_s29 + $0x62] sm:$0xff] }
 0x179   : > { %7017 = vrot.lane.b32.xlu0 %v7016_v49, %s10602_s21  ;;  %v1265_v49 = vsel %vm10562_vm2, %v1256_v0, %v6690_v15  ;;  %vm10563_vm2 = vcmask 400384   ;;  %v6734_v15 = vunpack.i.l.bf16 %v9190_v55  ;;  %v1282_v34 = vsel %vm1279_vm4, %v1273_v23, %v6709_v37  ;;  %v5324_v28 = vld [vmem:[%s7585_s29 + $0x122] sm:$0xff] }
 0x17a   : > { %v9221_v7 = vpop.permute.xlu0 %6737  ;;  %v1274_v35 = vsel %vm1270_vm3, %v1265_v49, %v6700_v59  ;;  %v6744_v6 = vunpack.i.l.bf16 %v6743_v62  ;;  %v1291_v55 = vsel %vm1288_vm5, %v1282_v34, %v6719_v24  ;;  %v1371_v61 = vsel %vm10567_vm15, %v1362_v5, %v6735_v16  ;;  %v398_v49 = vld [vmem:[%s7585_s29 + $0x72] sm:$0xff] }
 0x17b   : > { %v1283_v26 = vsel %vm1279_vm4, %v1274_v35, %v6710_v52  ;;  %v1370_v59 = vsel %vm10567_vm15, %v1361_v63, %v6734_v15  ;;  %v6740_v17 = vunpack.i.h.bf16 %v9221_v7  ;;  %v6739_v57 = vunpack.i.l.bf16 %v9221_v7 }
 0x17c   : > { %7032 = vrot.lane.b32.xlu1 %v7031_v46, %s10624_s0  ;;  %v6753_v12 = vpop.permute.xlu1 %6752  ;;  %v1292_v25 = vsel %vm1288_vm5, %v1283_v26, %v6720_v41  ;;  %v6729_v46 = vunpack.i.l.bf16 %v9198_v58  ;;  %v2675_v32 = vsel %vm10566_vm14, %v1370_v59, %v6744_v6  ;;  %v7061_v48 = vpack.i.bf16 %v398_v49, %v397_v19  ;;  %v5339_v59 = vld [vmem:[%s7585_s29 + $0x270] sm:$0xff] }
 0x17d   : > { %7027 = vrot.lane.b32.xlu0 %v7026_v11, %s10605_s27  ;;  %v6745_v11 = vunpack.i.h.bf16 %v6743_v62  ;;  %v6755_v3 = vunpack.i.h.bf16 %v6753_v12  ;;  %v6754_v0 = vunpack.i.l.bf16 %v6753_v12  ;;  %v1301_v35 = vsel %vm1297_vm6, %v1292_v25, %v6730_v13  ;;  %v414_v12 = vld [vmem:[%s7585_s29 + $0x73] sm:$0xff] }
 0x17e   : > { %v6748_v47 = vpop.permute.xlu0 %6747  ;;  %v1300_v23 = vsel %vm1297_vm6, %v1291_v55, %v6729_v46  ;;  %v1310_v16 = vsel %vm1306_vm7, %v1301_v35, %v6740_v17  ;;  %v7066_v38 = vpack.i.bf16 %v5324_v28, %v5323_v29  ;;  %v10721_v5 = vmov 0   ;;  %v5355_v19 = vld [vmem:[%s7585_s29 + $0x271] sm:$0xff] }
 0x17f   : > { %v2676_v36 = vsel %vm10566_vm14, %v1371_v61, %v6745_v11  ;;  %v2684_v52 = vsel %vm10565_vm0, %v2675_v32, %v6754_v0  ;;  %v6750_v7 = vunpack.i.h.bf16 %v6748_v47  ;;  %v6749_v21 = vunpack.i.l.bf16 %v6748_v47  ;;  %v5347_v32 = vld [vmem:[%s7585_s29 + $0x1c1] sm:$0xff] }
 0x180   : > { %7042 = vrot.lane.b32.xlu1 %v7041_v54, %s10624_s0  ;;  %v2685_v37 = vsel %vm10565_vm0, %v2676_v36, %v6755_v3  ;;  %v1309_v8 = vsel %vm1306_vm7, %v1300_v23, %v6739_v57  ;;  %v5331_v3 = vld [vmem:[%s7585_s29 + $0x1c0] sm:$0xff] }
 0x181   : > { %7037 = vrot.lane.b32.xlu0 %v7036_v20, %s10608_s28  ;;  %v6763_v58 = vpop.permute.xlu1 %6762  ;;  %v1318_v34 = vsel %vm1315_vm8, %v1309_v8, %v6749_v21  ;;  %v1319_v26 = vsel %vm1315_vm8, %v1310_v16, %v6750_v7  ;;  %v7076_v57 = vpack.i.bf16 %v8962_v22, %v5331_v3  ;;  %v7116_v3 = vpack.i.bf16 %v9078_v9, %v9140_v53 }
 0x182   : > { %v6765_v20 = vunpack.i.h.bf16 %v6763_v58  ;;  %v6764_v56 = vunpack.i.l.bf16 %v6763_v58 }
 0x183   : > { %v6758_v62 = vpop.permute.xlu0 %6757 }
 0x184   : > { %v2693_v44 = vsel %vm10564_vm1, %v2684_v52, %v6764_v56  ;;  %v2694_v39 = vsel %vm10564_vm1, %v2685_v37, %v6765_v20  ;;  %v6760_v54 = vunpack.i.h.bf16 %v6758_v62  ;;  %v6759_v50 = vunpack.i.l.bf16 %v6758_v62  ;;  %7052 = vrot.lane.b32.xlu1 %v7051_v30, %s10584_s12  ;;  %s10796_s12 = sld [smem:[#allocation59_spill]] }
 0x185   : > { %7047 = vrot.lane.b32.xlu0 %v7046_v51, %s10585_s30  ;;  %v2701_v41 = vpack.c.bf16 %v2694_v39, %v2693_v44  ;;  %v413_v51 = vld [vmem:[%s7585_s29 + $0x63] sm:$0xff]  ;;  %v7081_v62 = vpack.i.bf16 %v8978_v1, %v5339_v59  ;;  %v7086_v37 = vpack.i.bf16 %v8990_v60, %v5347_v32 }
 0x186   : > { %v6773_v24 = vpop.permute.xlu1 %6772  ;;  %v1327_v43 = vsel %vm1324_vm9, %v1318_v34, %v6759_v50  ;;  %v1328_v30 = vsel %vm1324_vm9, %v1319_v26, %v6760_v54  ;;  %v7071_v13 = vpack.i.bf16 %v414_v12, %v413_v51  ;;  %v7091_v54 = vpack.i.bf16 %v9003_v18, %v5355_v19  ;;  %v5363_v50 = vld [vmem:[%s7585_s29 + $0x1c2] sm:$0xff] }
 0x187   : > { %v6768_v15 = vpop.permute.xlu0 %6767  ;;  %5669 = vmatmul.mubr.msk.bf16.vlgmr.msra.gmra.mxu0 %vm10563_vm2, %v2701_v41  ;;  %v6775_v47 = vunpack.i.h.bf16 %v6773_v24  ;;  %v6774_v63 = vunpack.i.l.bf16 %v6773_v24  ;;  %v5371_v41 = vld [vmem:[%s7585_s29 + $0x272] sm:$0xff]  ;;  %v5379_v34 = vld [vmem:[%s7585_s29 + $0x1c3] sm:$0xff] }
 0x188   : > { %v6770_v11 = vunpack.i.h.bf16 %v6768_v15  ;;  %v6769_v6 = vunpack.i.l.bf16 %v6768_v15  ;;  %2811 = vmatprep.mubr.bf16.mxu0 %v10721_v5  ;;  %7062 = vrot.lane.b32.xlu1 %v7061_v48, %s10587_s11  ;;  %v7096_v15 = vpack.i.bf16 %v9015_v10, %v5363_v50  ;;  %v7101_v12 = vpack.i.bf16 %v9027_v4, %v5371_v41 }
 0x189   : > { %7057 = vrot.lane.b32.xlu0 %v7056_v2, %s10586_s18  ;;  %v7106_v10 = vpack.i.bf16 %v9039_v40, %v5379_v34 }
 0x18a   : > { %v1336_v0 = vsel %vm1333_vm10, %v1327_v43, %v6769_v6  ;;  %v1337_v55 = vsel %vm1333_vm10, %v1328_v30, %v6770_v11  ;;  %v6783_v25 = vpop.permute.xlu1 %6782  ;;  %v9334_v43 = vld [vmem:[%s7585_s29 + $0x70] sm:$0xff] }
 0x18b   : > { %v6778_v46 = vpop.permute.xlu0 %6777  ;;  %v6785_v58 = vunpack.i.h.bf16 %v6783_v25  ;;  %v6784_v27 = vunpack.i.l.bf16 %v6783_v25  ;;  %v1345_v42 = vsel %vm10570_vm11, %v1336_v0, %v6774_v63  ;;  %v1346_v2 = vsel %vm10570_vm11, %v1337_v55, %v6775_v47 }
 0x18c   : > { %v6780_v61 = vunpack.i.h.bf16 %v6778_v46  ;;  %v6779_v17 = vunpack.i.l.bf16 %v6778_v46  ;;  %7072 = vrot.lane.b32.xlu1 %v7071_v13, %s10644_s22  ;;  %v7111_v4 = vpack.i.bf16 %v9060_v33, %v9334_v43 }
 0x18d   : > { %7067 = vrot.lane.b32.xlu0 %v7066_v38, %s10588_s26 }
 0x18e   : > { %v1354_v36 = vsel %vm10569_vm12, %v1345_v42, %v6779_v17  ;;  %v1355_v20 = vsel %vm10569_vm12, %v1346_v2, %v6780_v61  ;;  %v6793_v56 = vpop.permute.xlu1 %6792  ;;  %v7390_v42 = vld [vmem:[%s7585_s29 + $0x50] sm:$0xff] }
 0x18f   : > { %v6788_v22 = vpop.permute.xlu0 %6787  ;;  %v6795_v7 = vunpack.i.h.bf16 %v6793_v56  ;;  %v6794_v21 = vunpack.i.l.bf16 %v6793_v56  ;;  %v1363_v29 = vsel %vm10568_vm13, %v1354_v36, %v6784_v27  ;;  %v1364_v28 = vsel %vm10568_vm13, %v1355_v20, %v6785_v58 }
 0x190   : > { %v6790_v49 = vunpack.i.h.bf16 %v6788_v22  ;;  %v6789_v52 = vunpack.i.l.bf16 %v6788_v22  ;;  %7082 = vrot.lane.b32.xlu1 %v7081_v62, %s10583_s20 }
 0x191   : > { %7077 = vrot.lane.b32.xlu0 %v7076_v57, %s10656_s15  ;;  %v362_v57 = vld [vmem:[%s7585_s29 + $0x40] sm:$0xff] }
 0x192   : > { %v1372_v44 = vsel %vm10567_vm15, %v1363_v29, %v6789_v52  ;;  %v1373_v1 = vsel %vm10567_vm15, %v1364_v28, %v6790_v49  ;;  %v6803_v39 = vpop.permute.xlu1 %6802  ;;  %vm10726_vm15 = vcmask 23552  }
 0x193   : > { %v6805_v60 = vunpack.i.h.bf16 %v6803_v39  ;;  %v6804_v23 = vunpack.i.l.bf16 %v6803_v39  ;;  %v6798_v35 = vpop.permute.xlu0 %6797  ;;  %v2677_v8 = vsel %vm10566_vm14, %v1372_v44, %v6794_v21  ;;  %v2678_v16 = vsel %vm10566_vm14, %v1373_v1, %v6795_v7  ;;  %vm10727_vm13 = vmmov %vm10726_vm15 }
 0x194   : > { %v6800_v24 = vunpack.i.h.bf16 %v6798_v35  ;;  %v6799_v48 = vunpack.i.l.bf16 %v6798_v35  ;;  %7092 = vrot.lane.b32.xlu1 %v7091_v54, %s10674_s24 }
 0x195   : > { %7087 = vrot.lane.b32.xlu0 %v7086_v37, %s10662_s19  ;;  %s5861_s19 = sshll.u32 %s7553_s17, 4  ;;  %s7476_s17 = smov [#allocation2]  }
 0x196   : > { %v2686_v38 = vsel %vm10565_vm0, %v2677_v8, %v6799_v48  ;;  %v2687_v18 = vsel %vm10565_vm0, %v2678_v16, %v6800_v24  ;;  %v6813_v51 = vpop.permute.xlu1 %6812  ;;  %vm10724_vm0 = vcmask 15360   ;;  %s10425_s18 = scalar_lea.hbm %s10796_s12, %s5861_s19 }
 0x197   : > { %v6808_v26 = vpop.permute.xlu0 %6807  ;;  %v2695_v11 = vsel %vm10564_vm1, %v2686_v38, %v6804_v23  ;;  %v2696_v6 = vsel %vm10564_vm1, %v2687_v18, %v6805_v60  ;;  %v6815_v58 = vunpack.i.h.bf16 %v6813_v51  ;;  %v6814_v27 = vunpack.i.l.bf16 %v6813_v51  ;;  %vm10725_vm14 = vmmov %vm10724_vm0 }
 0x198   : > { %v2702_v30 = vpack.c.bf16 %v2696_v6, %v2695_v11  ;;  %7102 = vrot.lane.b32.xlu1 %v7101_v12, %s10602_s21  ;;  %v6810_v59 = vunpack.i.h.bf16 %v6808_v26  ;;  %v6809_v61 = vunpack.i.l.bf16 %v6808_v26  ;;  %s7472_s21 = smov 64  }
 0x199   : > { %7097 = vrot.lane.b32.xlu0 %v7096_v15, %s10599_s25  ;;  %s7395_s25 = sshll.u32 %s7476_s17, 4  ;;  %s7396_s25 = int_to_ptr.vmem [resolvable:$false] %s7395_s25 }
 0x19a   : > { %5670 = vmatmul.mubr.msk.bf16.gmra.mxu0 %vm10563_vm2, %v2702_v30  ;;  %v6823_v47 = vpop.permute.xlu1 %6822  ;;  %vm10722_vm2 = vcmask 7168   ;;  %s7397_s26 = scalar_lea.vmem %s7396_s25, 32 }
 0x19b   : > { %v6818_v63 = vpop.permute.xlu0 %6817  ;;  %2821 = vmatprep.mubr.bf16.mxu0 %v10721_v5  ;;  %v1248_v53 = vsel %vm10722_vm2, %v362_v57, %v6809_v61  ;;  %vm10723_vm1 = vmmov %vm10722_vm2  ;;  %v6825_v56 = vunpack.i.h.bf16 %v6823_v47  ;;  %v6824_v62 = vunpack.i.l.bf16 %v6823_v47  ;;  %vm10730_vm2 = vcmask 121856  }
 0x19c   : > { %7112 = vrot.lane.b32.xlu1 %v7111_v4, %s10608_s28  ;;  %v1249_v2 = vsel %vm10723_vm1, %v7390_v42, %v6810_v59  ;;  %v6820_v32 = vunpack.i.h.bf16 %v6818_v63  ;;  %v6819_v36 = vunpack.i.l.bf16 %v6818_v63  ;;  %v1257_v22 = vsel %vm10724_vm0, %v1248_v53, %v6814_v27 }
 0x19d   : > { %7107 = vrot.lane.b32.xlu0 %v7106_v10, %s10605_s27  ;;  %v1258_v19 = vsel %vm10725_vm14, %v1249_v2, %v6815_v58  ;;  %vm10728_vm0 = vcmask 113664   ;;  %vm10732_vm14 = vcmask 130048  }
 0x19e   : > { %v6833_v0 = vpop.permute.xlu1 %6832  ;;  %v1266_v52 = vsel %vm10726_vm15, %v1257_v22, %v6819_v36  ;;  %v1267_v37 = vsel %vm10727_vm13, %v1258_v19, %v6820_v32  ;;  %vm10729_vm1 = vmmov %vm10728_vm0 }
 0x19f   : > { %v6828_v40 = vpop.permute.xlu0 %6827  ;;  %v6835_v28 = vunpack.i.h.bf16 %v6833_v0  ;;  %v6834_v44 = vunpack.i.l.bf16 %v6833_v0  ;;  %v1275_v1 = vsel %vm1270_vm3, %v1266_v52, %v6824_v62  ;;  %v1276_v39 = vsel %vm1270_vm3, %v1267_v37, %v6825_v56  ;;  %vm10731_vm13 = vmmov %vm10730_vm2 }
 0x1a0   : > { %v6830_v7 = vunpack.i.h.bf16 %v6828_v40  ;;  %v6829_v21 = vunpack.i.l.bf16 %v6828_v40  ;;  %vm10733_vm15 = vmmov %vm10732_vm14 }
 0x1a1   : > { %7117 = vrot.lane.b32.xlu0 %v7116_v3, %s10624_s0 }
 0x1a2   : > { %v6843_v55 = vpop.permute.xlu1 %6842  ;;  %v1284_v50 = vsel %vm1279_vm4, %v1275_v1, %v6829_v21  ;;  %v1285_v60 = vsel %vm1279_vm4, %v1276_v39, %v6830_v7 }
 0x1a3   : > { %v6838_v25 = vpop.permute.xlu0 %6837  ;;  %v6845_v24 = vunpack.i.h.bf16 %v6843_v55  ;;  %v6844_v48 = vunpack.i.l.bf16 %v6843_v55  ;;  %v1293_v8 = vsel %vm1288_vm5, %v1284_v50, %v6834_v44  ;;  %v1294_v16 = vsel %vm1288_vm5, %v1285_v60, %v6835_v28 }
 0x1a4   : > { %v6840_v23 = vunpack.i.h.bf16 %v6838_v25  ;;  %v6839_v35 = vunpack.i.l.bf16 %v6838_v25 }
 0x1a6   : > { %v6853_v13 = vpop.permute.xlu1 %6852  ;;  %v1302_v38 = vsel %vm1297_vm6, %v1293_v8, %v6839_v35  ;;  %v1303_v18 = vsel %vm1297_vm6, %v1294_v16, %v6840_v23 }
 0x1a7   : > { %v6848_v33 = vpop.permute.xlu0 %6847  ;;  %v6855_v26 = vunpack.i.h.bf16 %v6853_v13  ;;  %v6854_v11 = vunpack.i.l.bf16 %v6853_v13  ;;  %v1311_v6 = vsel %vm1306_vm7, %v1302_v38, %v6844_v48  ;;  %v1312_v30 = vsel %vm1306_vm7, %v1303_v18, %v6845_v24 }
 0x1a8   : > { %v6850_v51 = vunpack.i.h.bf16 %v6848_v33  ;;  %v6849_v12 = vunpack.i.l.bf16 %v6848_v33 }
 0x1aa   : > { %v9348_v46 = vpop.permute.xlu1 %6862  ;;  %v1320_v47 = vsel %vm1315_vm8, %v1311_v6, %v6849_v12  ;;  %v1321_v4 = vsel %vm1315_vm8, %v1312_v30, %v6850_v51 }
 0x1ab   : > { %v6858_v17 = vpop.permute.xlu0 %6857  ;;  %v6865_v40 = vunpack.i.h.bf16 %v9348_v46  ;;  %v6864_v55 = vunpack.i.l.bf16 %v9348_v46  ;;  %v1329_v25 = vsel %vm1324_vm9, %v1320_v47, %v6854_v11  ;;  %v1330_v13 = vsel %vm1324_vm9, %v1321_v4, %v6855_v26  ;;  %v5531_v4 = vld [vmem:[%s7585_s29 + $0x82] sm:$0xff] }
 0x1ac   : > { %v6860_v63 = vunpack.i.h.bf16 %v6858_v17  ;;  %v6859_v3 = vunpack.i.l.bf16 %v6858_v17 }
 0x1ae   : > { %v9351_v9 = vpop.permute.xlu1 %6872  ;;  %v1338_v33 = vsel %vm1333_vm10, %v1329_v25, %v6859_v3  ;;  %v1339_v59 = vsel %vm1333_vm10, %v1330_v13, %v6860_v63 }
 0x1af   : > { %v6868_v20 = vpop.permute.xlu0 %6867  ;;  %v6875_v17 = vunpack.i.h.bf16 %v9351_v9  ;;  %v6874_v53 = vunpack.i.l.bf16 %v9351_v9  ;;  %v1347_v42 = vsel %vm10570_vm11, %v1338_v33, %v6864_v55  ;;  %v1348_v46 = vsel %vm10570_vm11, %v1339_v59, %v6865_v40 }
 0x1b0   : > { %v6870_v61 = vunpack.i.h.bf16 %v6868_v20  ;;  %v6869_v57 = vunpack.i.l.bf16 %v6868_v20 }
 0x1b2   : > { %v9358_v49 = vpop.permute.xlu1 %6882  ;;  %v1356_v2 = vsel %vm10569_vm12, %v1347_v42, %v6869_v57  ;;  %v1357_v32 = vsel %vm10569_vm12, %v1348_v46, %v6870_v61  ;;  %vm10734_vm12 = vcmask 261120  }
 0x1b3   : > { %v9362_v29 = vpop.permute.xlu0 %6877  ;;  %v6885_v36 = vunpack.i.h.bf16 %v9358_v49  ;;  %v6884_v56 = vunpack.i.l.bf16 %v9358_v49  ;;  %v1365_v37 = vsel %vm10728_vm0, %v1356_v2, %v6874_v53  ;;  %v1366_v7 = vsel %vm10729_vm1, %v1357_v32, %v6875_v17  ;;  %vm10735_vm11 = vmmov %vm10734_vm12 }
 0x1b4   : > { %vm10736_vm0 = vcmask 392192   ;;  %v6880_v12 = vunpack.i.h.bf16 %v9362_v29  ;;  %v6879_v26 = vunpack.i.l.bf16 %v9362_v29 }
 0x1b5   : > { %v1374_v21 = vsel %vm10730_vm2, %v1365_v37, %v6884_v56  ;;  %v1375_v28 = vsel %vm10731_vm13, %v1366_v7, %v6885_v36  ;;  %vm10737_vm1 = vmmov %vm10736_vm0  ;;  %vm10738_vm2 = vcmask 400384  }
 0x1b6   : > { %v9366_v54 = vpop.permute.xlu1 %6892 }
 0x1b7   : > { %v9370_v41 = vpop.permute.xlu0 %6887  ;;  %v6895_v11 = vunpack.i.h.bf16 %v9366_v54  ;;  %v6894_v30 = vunpack.i.l.bf16 %v9366_v54 }
 0x1b8   : > { %v6890_v63 = vunpack.i.h.bf16 %v9370_v41  ;;  %v6889_v3 = vunpack.i.l.bf16 %v9370_v41 }
 0x1ba   : > { %v9374_v15 = vpop.permute.xlu1 %6902 }
 0x1bb   : > { %v9378_v34 = vpop.permute.xlu0 %6897  ;;  %v6904_v40 = vunpack.i.l.bf16 %v9374_v15 }
 0x1bc   : > { %v6900_v25 = vunpack.i.h.bf16 %v9378_v34  ;;  %v6899_v13 = vunpack.i.l.bf16 %v9378_v34 }
 0x1be   : > { %v9382_v10 = vpop.permute.xlu1 %6912 }
 0x1bf   : > { %v6908_v0 = vpop.permute.xlu0 %6907  ;;  %v6915_v59 = vunpack.i.h.bf16 %v9382_v10 }
 0x1c0   : > { %v6910_v62 = vunpack.i.h.bf16 %v6908_v0  ;;  %v6909_v22 = vunpack.i.l.bf16 %v6908_v0  ;;  %v6905_v0 = vunpack.i.h.bf16 %v9374_v15  ;;  %v6914_v15 = vunpack.i.l.bf16 %v9382_v10 }
 0x1c2   : > { %v6923_v27 = vpop.permute.xlu1 %6922  ;;  %v2679_v1 = vsel %vm10732_vm14, %v1374_v21, %v6909_v22  ;;  %v2680_v49 = vsel %vm10733_vm15, %v1375_v28, %v6910_v62  ;;  %vm10743_vm15 = vcmask 15360  }
 0x1c3   : > { %v9392_v58 = vpop.permute.xlu0 %6917  ;;  %v6925_v52 = vunpack.i.h.bf16 %v6923_v27  ;;  %v6924_v9 = vunpack.i.l.bf16 %v6923_v27 }
 0x1c4   : > { %v6920_v27 = vunpack.i.h.bf16 %v9392_v58 }
 0x1c5   : > { %v2688_v23 = vsel %vm10734_vm12, %v2679_v1, %v6924_v9  ;;  %v2689_v35 = vsel %vm10735_vm11, %v2680_v49, %v6925_v52  ;;  %vm10739_vm11 = vcmask 7168  }
 0x1c6   : > { %v9404_v19 = vpop.permute.xlu1 %6932  ;;  %v1865_v29 = vsel %vm10739_vm11, %v9088_v31, %v6880_v12  ;;  %vm10740_vm12 = vmmov %vm10739_vm11  ;;  %v6919_v31 = vunpack.i.l.bf16 %v9392_v58 }
 0x1c7   : > { %v9402_v20 = vpop.permute.xlu0 %6927  ;;  %v1864_v55 = vsel %vm10740_vm12, %v9170_v14, %v6879_v26  ;;  %vm10741_vm13 = vmmov %vm10739_vm11  ;;  %v6934_v10 = vunpack.i.l.bf16 %v9404_v19  ;;  %v6935_v2 = vunpack.i.h.bf16 %v9404_v19 }
 0x1c8   : > { %v2465_v54 = vsel %vm10741_vm13, %v9105_v45, %v6895_v11  ;;  %vm10742_vm14 = vmmov %vm10739_vm11  ;;  %v1872_v14 = vsel %vm10743_vm15, %v1864_v55, %v6889_v3  ;;  %v6930_v17 = vunpack.i.h.bf16 %v9402_v20  ;;  %v6929_v53 = vunpack.i.l.bf16 %v9402_v20 }
 0x1c9   : > { %v2464_v41 = vsel %vm10742_vm14, %v5531_v4, %v6894_v30  ;;  %vm10747_vm11 = vcmask 23552  }
 0x1ca   : > { %v9412_v60 = vpop.permute.xlu1 %6942  ;;  %v1880_v42 = vsel %vm10747_vm11, %v1872_v14, %v6899_v13  ;;  %vm10748_vm12 = vmmov %vm10747_vm11 }
 0x1cb   : > { %v6938_v44 = vpop.permute.xlu0 %6937  ;;  %v6944_v32 = vunpack.i.l.bf16 %v9412_v60  ;;  %v1888_v56 = vsel %vm1270_vm3, %v1880_v42, %v6914_v15  ;;  %vm10749_vm13 = vmmov %vm10747_vm11  ;;  %v6945_v20 = vunpack.i.h.bf16 %v9412_v60 }
 0x1cc   : > { %v6940_v39 = vunpack.i.h.bf16 %v6938_v44  ;;  %v6939_v50 = vunpack.i.l.bf16 %v6938_v44  ;;  %vm10750_vm14 = vmmov %vm10747_vm11  ;;  %v1896_v21 = vsel %vm1279_vm4, %v1888_v56, %v6929_v53  ;;  %vm10755_vm11 = vcmask 113664  }
 0x1cd   : > { %v1904_v49 = vsel %vm1288_vm5, %v1896_v21, %v6944_v32 }
 0x1ce   : > { %v2697_v24 = vsel %vm10736_vm0, %v2688_v23, %v6939_v50  ;;  %v2698_v48 = vsel %vm10737_vm1, %v2689_v35, %v6940_v39  ;;  %v9420_v38 = vpop.permute.xlu1 %6952  ;;  %vm10744_vm0 = vmmov %vm10743_vm15  ;;  %vm10751_vm15 = vcmask 97280  }
 0x1cf   : > { %v2703_v8 = vpack.c.bf16 %v2698_v48, %v2697_v24  ;;  %v9418_v16 = vpop.permute.xlu0 %6947  ;;  %v1873_v45 = vsel %vm10744_vm0, %v1865_v29, %v6890_v63  ;;  %vm10745_vm1 = vmmov %vm10744_vm0  ;;  %v6955_v37 = vunpack.i.h.bf16 %v9420_v38  ;;  %v6954_v19 = vunpack.i.l.bf16 %v9420_v38 }
 0x1d0   : > { %v2472_v57 = vsel %vm10745_vm1, %v2464_v41, %v6904_v40  ;;  %v1881_v46 = vsel %vm10748_vm12, %v1873_v45, %v6900_v25  ;;  %v6950_v52 = vunpack.i.h.bf16 %v9418_v16  ;;  %v6949_v9 = vunpack.i.l.bf16 %v9418_v16  ;;  %vm10756_vm12 = vmmov %vm10755_vm11 }
 0x1d1   : > { %5671 = vmatmul.mubr.msk.bf16.gmra.mxu0 %vm10738_vm2, %v2703_v8  ;;  %vm10746_vm2 = vmmov %vm10744_vm0  ;;  %v1889_v58 = vsel %vm1270_vm3, %v1881_v46, %v6915_v59  ;;  %v2480_v62 = vsel %vm10749_vm13, %v2472_v57, %v6919_v31  ;;  %v1912_v12 = vsel %vm1297_vm6, %v1904_v49, %v6954_v19  ;;  %vm10753_vm1 = vcmask 105472  }
 0x1d2   : > { %2831 = vmatprep.mubr.bf16.mxu0 %v10721_v5  ;;  %v9426_v51 = vpop.permute.xlu1 %6962  ;;  %v2473_v34 = vsel %vm10746_vm2, %v2465_v54, %v6905_v0  ;;  %v1897_v28 = vsel %vm1279_vm4, %v1889_v58, %v6930_v17  ;;  %v2488_v44 = vsel %vm1270_vm3, %v2480_v62, %v6934_v10  ;;  %vm10752_vm0 = vmmov %vm10751_vm15 }
 0x1d3   : > { %v9424_v18 = vpop.permute.xlu0 %6957  ;;  %v2481_v7 = vsel %vm10750_vm14, %v2473_v34, %v6920_v27  ;;  %v1905_v23 = vsel %vm1288_vm5, %v1897_v28, %v6945_v20  ;;  %v6965_v35 = vunpack.i.h.bf16 %v9426_v51  ;;  %v6964_v24 = vunpack.i.l.bf16 %v9426_v51  ;;  %vm10754_vm2 = vmmov %vm10753_vm1 }
 0x1d4   : > { %v2489_v1 = vsel %vm1270_vm3, %v2481_v7, %v6935_v2  ;;  %v6960_v39 = vunpack.i.h.bf16 %v9424_v18  ;;  %v6959_v50 = vunpack.i.l.bf16 %v9424_v18  ;;  %v2496_v16 = vsel %vm1279_vm4, %v2488_v44, %v6949_v9  ;;  %vm10757_vm13 = vmmov %vm10752_vm0 }
 0x1d5   : > { %v2497_v38 = vsel %vm1279_vm4, %v2489_v1, %v6950_v52  ;;  %v1913_v26 = vsel %vm1297_vm6, %v1905_v23, %v6955_v37  ;;  %v1920_v29 = vsel %vm1306_vm7, %v1912_v12, %v6964_v24  ;;  %vm10758_vm14 = vcmask 121856  }
 0x1d6   : > { %v9434_v47 = vpop.permute.xlu1 %6972  ;;  %v2504_v51 = vsel %vm1288_vm5, %v2496_v16, %v6959_v50  ;;  %v2505_v63 = vsel %vm1288_vm5, %v2497_v38, %v6960_v39  ;;  %v1921_v55 = vsel %vm1306_vm7, %v1913_v26, %v6965_v35 }
 0x1d7   : > { %v9431_v6 = vpop.permute.xlu0 %6967  ;;  %v6975_v11 = vunpack.i.h.bf16 %v9434_v47  ;;  %v6974_v30 = vunpack.i.l.bf16 %v9434_v47 }
 0x1d8   : > { %v6969_v48 = vunpack.i.l.bf16 %v9431_v6  ;;  %v6970_v18 = vunpack.i.h.bf16 %v9431_v6 }
 0x1d9   : > { %v1928_v15 = vsel %vm1315_vm8, %v1920_v29, %v6974_v30  ;;  %v1929_v31 = vsel %vm1315_vm8, %v1921_v55, %v6975_v11  ;;  %v5659_v11 = vld [vmem:[%s7585_s29 + $0x93] sm:$0xff]  ;;  %v5660_v30 = vld [vmem:[%s7585_s29 + $0xa3] sm:$0xff] }
 0x1da   : > { %v9455_v61 = vpop.permute.xlu1 %6982  ;;  %v2512_v6 = vsel %vm1297_vm6, %v2504_v51, %v6969_v48 }
 0x1db   : > { %v9449_v33 = vpop.permute.xlu0 %6977  ;;  %v6984_v0 = vunpack.i.l.bf16 %v9455_v61  ;;  %v6985_v54 = vunpack.i.h.bf16 %v9455_v61 }
 0x1dc   : > { %v6979_v4 = vunpack.i.l.bf16 %v9449_v33  ;;  %v6980_v3 = vunpack.i.h.bf16 %v9449_v33  ;;  %v2513_v33 = vsel %vm1297_vm6, %v2505_v63, %v6970_v18 }
 0x1dd   : > { %v1936_v57 = vsel %vm1324_vm9, %v1928_v15, %v6984_v0  ;;  %v1937_v17 = vsel %vm1324_vm9, %v1929_v31, %v6985_v54  ;;  %v7198_v15 = vld [vmem:[%s10464_s4 + $0x38] sm:$0xff]  }
 0x1de   : > { %v6993_v22 = vpop.permute.xlu1 %6992  ;;  %v2520_v14 = vsel %vm1306_vm7, %v2512_v6, %v6979_v4  ;;  %v2521_v45 = vsel %vm1306_vm7, %v2513_v33, %v6980_v3  ;;  %v7197_v33 = vld [vmem:[%s10464_s4 + $0x78] sm:$0xff]  }
 0x1df   : > { %v9469_v36 = vpop.permute.xlu0 %6987  ;;  %v6995_v41 = vunpack.i.h.bf16 %v6993_v22  ;;  %v6994_v59 = vunpack.i.l.bf16 %v6993_v22  ;;  %v7199_v31 = vld [vmem:[%s10464_s4 + $0xf8] sm:$0xff]   ;;  %5864 = vmatprep.subr.bf16.mxu1 %v7197_v33 }
 0x1e0   : > { %v6990_v25 = vunpack.i.h.bf16 %v9469_v36  ;;  %v6989_v13 = vunpack.i.l.bf16 %v9469_v36  ;;  %5886 = vmatprep.subr.bf16.mxu0 %v7199_v31  ;;  %5865 = vmatpush3.bf16.msra.mxu1 %v7198_v15 }
 0x1e1   : > { %v1944_v36 = vsel %vm1333_vm10, %v1936_v57, %v6994_v59  ;;  %v1945_v56 = vsel %vm1333_vm10, %v1937_v17, %v6995_v41  ;;  %v7203_v57 = vld [vmem:[%s10464_s4 + $0xf0] sm:$0xff]   ;;  %v2844_v17 = vlaneseq }
 0x1e2   : > { %v7003_v8 = vpop.permute.xlu1 %7002  ;;  %v2528_v2 = vsel %vm1315_vm8, %v2520_v14, %v6989_v13  ;;  %v2529_v32 = vsel %vm1315_vm8, %v2521_v45, %v6990_v25  ;;  %v7131_v25 = vpack.i.bf16 %v5660_v30, %v5659_v11  ;;  %v7200_v14 = vld [vmem:[%s10464_s4 + $0xb8] sm:$0xff]   ;;  %v7201_v45 = vld [vmem:[%s10464_s4 + $0x70] sm:$0xff]  }
 0x1e3   : > { %v9487_v60 = vpop.permute.xlu0 %6997  ;;  %v7005_v61 = vunpack.i.h.bf16 %v7003_v8  ;;  %v7004_v34 = vunpack.i.l.bf16 %v7003_v8  ;;  %5887 = vmatpush3.bf16.msra.mxu0 %v7200_v14  ;;  %5866 = vmatprep.subr.bf16.mxu1 %v7201_v45 }
 0x1e4   : > { %v6999_v53 = vunpack.i.l.bf16 %v9487_v60  ;;  %v7000_v58 = vunpack.i.h.bf16 %v9487_v60  ;;  %5888 = vmatprep.subr.bf16.mxu0 %v7203_v57 }
 0x1e5   : > { %v1952_v52 = vsel %vm10751_vm15, %v1944_v36, %v7004_v34  ;;  %v1953_v9 = vsel %vm10752_vm0, %v1945_v56, %v7005_v61  ;;  %vm10759_vm15 = vmmov %vm10758_vm14  ;;  %v7202_v61 = vld [vmem:[%s10464_s4 + $0x30] sm:$0xff]  }
 0x1e6   : > { %v7013_v47 = vpop.permute.xlu1 %7012  ;;  %v2536_v21 = vsel %vm1324_vm9, %v2528_v2, %v6999_v53  ;;  %v2537_v35 = vsel %vm1324_vm9, %v2529_v32, %v7000_v58  ;;  %v7204_v34 = vld [vmem:[%s10464_s4 + $0xb0] sm:$0xff]   ;;  %5867 = vmatpush3.bf16.msra.mxu1 %v7202_v61  ;;  %v2845_v32 = vshrl.u32 %v2844_v17, 7 }
 0x1e7   : > { %v7008_v40 = vpop.permute.xlu0 %7007  ;;  %v7015_v10 = vunpack.i.h.bf16 %v7013_v47  ;;  %v7014_v42 = vunpack.i.l.bf16 %v7013_v47  ;;  %5889 = vmatpush3.bf16.msra.mxu0 %v7204_v34 }
 0x1e8   : > { %v7009_v62 = vunpack.i.l.bf16 %v7008_v40  ;;  %v7010_v37 = vunpack.i.h.bf16 %v7008_v40 }
 0x1e9   : > { %v1960_v28 = vsel %vm10753_vm1, %v1952_v52, %v7014_v42  ;;  %v1961_v44 = vsel %vm10754_vm2, %v1953_v9, %v7015_v10  ;;  %vm10760_vm2 = vmmov %vm10753_vm1  ;;  %v364_v42 = vld [vmem:[%s7585_s29 + $0x60] sm:$0xff]  ;;  %v2846_v9 = vsub.s32 0, %v2845_v32 }
 0x1ea   : > { %v7023_v46 = vpop.permute.xlu1 %7022  ;;  %v2544_v24 = vsel %vm1333_vm10, %v2536_v21, %v7009_v62  ;;  %v2545_v16 = vsel %vm1333_vm10, %v2537_v35, %v7010_v37 }
 0x1eb   : > { %v7018_v27 = vpop.permute.xlu0 %7017  ;;  %v7025_v20 = vunpack.i.h.bf16 %v7023_v46  ;;  %v7024_v22 = vunpack.i.l.bf16 %v7023_v46 }
 0x1ec   : > { %v7019_v19 = vunpack.i.l.bf16 %v7018_v27  ;;  %v7020_v1 = vunpack.i.h.bf16 %v7018_v27 }
 0x1ed   : > { %v1968_v48 = vsel %vm10755_vm11, %v1960_v28, %v7024_v22  ;;  %v1969_v8 = vsel %vm10756_vm12, %v1961_v44, %v7025_v20  ;;  %vm10761_vm12 = vmmov %vm10755_vm11  ;;  %v2850_v28 = vsub.s32 1, %v2845_v32 }
 0x1ee   : > { %v7033_v49 = vpop.permute.xlu1 %7032  ;;  %v2552_v38 = vsel %vm10757_vm13, %v2544_v24, %v7019_v19  ;;  %v2553_v4 = vsel %vm10752_vm0, %v2545_v16, %v7020_v1  ;;  %vm10762_vm13 = vmmov %vm10758_vm14 }
 0x1ef   : > { %v7028_v7 = vpop.permute.xlu0 %7027  ;;  %v7035_v60 = vunpack.i.h.bf16 %v7033_v49  ;;  %v7034_v23 = vunpack.i.l.bf16 %v7033_v49 }
 0x1f0   : > { %v7030_v39 = vunpack.i.h.bf16 %v7028_v7  ;;  %v7029_v50 = vunpack.i.l.bf16 %v7028_v7  ;;  %v2842_v7 = vld [vmem:[%s10462_s2] sm:$0x3] }
 0x1f1   : > { %v1976_v12 = vsel %vm10758_vm14, %v1968_v48, %v7034_v23  ;;  %v1977_v26 = vsel %vm10759_vm15, %v1969_v8, %v7035_v60  ;;  %vm10763_vm14 = vmmov %vm10762_vm13  ;;  %vm10764_vm15 = vcmask 7168   ;;  %v9592_v48 = vrot.slane %v2842_v7, %v2850_v28 }
 0x1f2   : > { %v7121_v51 = vpack.i.bf16 %v1977_v26, %v1976_v12  ;;  %v7043_v0 = vpop.permute.xlu1 %7042  ;;  %v2560_v40 = vsel %vm10753_vm1, %v2552_v38, %v7029_v50  ;;  %v2561_v29 = vsel %vm10760_vm2, %v2553_v4, %v7030_v39  ;;  %vm10765_vm0 = vmmov %vm10764_vm15  ;;  %vm10766_vm1 = vcmask 15360  }
 0x1f3   : > { %v7038_v18 = vpop.permute.xlu0 %7037  ;;  %v7045_v55 = vunpack.i.h.bf16 %v7043_v0  ;;  %v7044_v6 = vunpack.i.l.bf16 %v7043_v0  ;;  %vm10767_vm2 = vmmov %vm10766_vm1  ;;  %v9587_v50 = vrot.slane %v2842_v7, %v2846_v9 }
 0x1f4   : > { %v7040_v63 = vunpack.i.h.bf16 %v7038_v18  ;;  %v7039_v3 = vunpack.i.l.bf16 %v7038_v18  ;;  %7122 = vrot.lane.b32.xlu1 %v7121_v51, %s7469_s10  ;;  %s350_s10 = sand.u32 1, %s7443_s14  }
 0x1f5   : > { %s351_s22 = scalar_lea.vmem [#allocation2], %s350_s10  ;;  %s5229_s20 = scalar_lea.sflag [#allocation3], %s350_s10 }
 0x1f6   : > { %v2568_v54 = vsel %vm10755_vm11, %v2560_v40, %v7039_v3  ;;  %v2569_v47 = vsel %vm10761_vm12, %v2561_v29, %v7040_v63  ;;  %v7053_v46 = vpop.permute.xlu1 %7052  ;;  %vm10768_vm11 = vcmask 23552   ;;  %s5241_s24 = sshll.u32 %s351_s22, 4  ;;  %s5242_s24 = int_to_ptr.vmem [resolvable:$true] %s5241_s24 }
 0x1f7   : > { %v2576_v13 = vsel %vm10762_vm13, %v2568_v54, %v7044_v6  ;;  %v2577_v41 = vsel %vm10763_vm14, %v2569_v47, %v7045_v55  ;;  %v7048_v27 = vpop.permute.xlu0 %7047  ;;  %v7054_v2 = vunpack.i.l.bf16 %v7053_v46  ;;  %v7055_v56 = vunpack.i.h.bf16 %v7053_v46  ;;  %vm10769_vm12 = vmmov %vm10768_vm11  ;;  %p7398_p0 = scmp.lt.s32.totalorder %s5242_s24, %s7396_s25 }
 0x1f8   : > { %v7126_v59 = vpack.i.bf16 %v2577_v41, %v2576_v13  ;;  %7132 = vrot.lane.b32.xlu1 %v7131_v25, %s7471_s13  ;;  %v7049_v53 = vunpack.i.l.bf16 %v7048_v27  ;;  %v7050_v10 = vunpack.i.h.bf16 %v7048_v27  ;;  %vm10772_vm14 = vcmask 105472  }
 0x1fa   : > { %7127 = vrot.lane.b32.xlu0 %v7126_v59, %s7470_s23  ;;  %v1250_v36 = vsel %vm10764_vm15, %v364_v42, %v7049_v53  ;;  %v1251_v58 = vsel %vm10765_vm0, %v9334_v43, %v7050_v10  ;;  %v7063_v19 = vpop.permute.xlu1 %7062  ;;  %v2870_v43 = vld [vmem:[%s10463_s3] sm:$0x3]  ;;  %vm10773_vm15 = vmmov %vm10772_vm14 }
 0x1fb   : > { %v7058_v62 = vpop.permute.xlu0 %7057  ;;  %v1259_v22 = vsel %vm10766_vm1, %v1250_v36, %v7054_v2  ;;  %v1260_v37 = vsel %vm10767_vm2, %v1251_v58, %v7055_v56  ;;  %v7064_v21 = vunpack.i.l.bf16 %v7063_v19  ;;  %v7065_v1 = vunpack.i.h.bf16 %v7063_v19 }
 0x1fc   : > { %v7059_v20 = vunpack.i.l.bf16 %v7058_v62  ;;  %v7060_v52 = vunpack.i.h.bf16 %v7058_v62  ;;  %v9590_v24 = vrot.slane %v2870_v43, %v2846_v9  ;;  %v9596_v18 = vrot.slane %v2870_v43, %v2850_v28  ;;  %v7206_v9 = vld [vmem:[%s10464_s4 + $0x28] sm:$0xff]  }
 0x1fd   : > { %v7208_v28 = vld [vmem:[%s10464_s4 + $0xa8] sm:$0xff]   ;;  %vm10774_vm1 = vcmask 113664  }
 0x1fe   : > { %v1268_v44 = vsel %vm10768_vm11, %v1259_v22, %v7059_v20  ;;  %v1269_v49 = vsel %vm10769_vm12, %v1260_v37, %v7060_v52  ;;  %v7073_v16 = vpop.permute.xlu1 %7072  ;;  %v7205_v20 = vld [vmem:[%s10464_s4 + $0x68] sm:$0xff]   ;;  %vm10775_vm2 = vmmov %vm10774_vm1  ;;  %vm10776_vm11 = vcmask 121856   ;;  %vm10777_vm12 = vcmask 1040384  }
 0x1ff   : > { %v7068_v39 = vpop.permute.xlu0 %7067  ;;  %v1277_v23 = vsel %vm1270_vm3, %v1268_v44, %v7064_v21  ;;  %v1278_v8 = vsel %vm1270_vm3, %v1269_v49, %v7065_v1  ;;  %v7074_v12 = vunpack.i.l.bf16 %v7073_v16  ;;  %v7075_v30 = vunpack.i.h.bf16 %v7073_v16  ;;  %v7207_v37 = vld [vmem:[%s10464_s4 + $0xe8] sm:$0xff]   ;;  %5868 = vmatprep.subr.bf16.mxu1 %v7205_v20 }
 0x200   : > { %v7069_v60 = vunpack.i.l.bf16 %v7068_v39  ;;  %v7070_v35 = vunpack.i.h.bf16 %v7068_v39  ;;  %5869 = vmatpush3.bf16.msra.mxu1 %v7206_v9  ;;  %5890 = vmatprep.subr.bf16.mxu0 %v7207_v37  ;;  %v7220_v9 = vld [vmem:[%s10464_s4 + $0x90] sm:$0xff]  }
 0x201   : > { %5891 = vmatpush3.bf16.msra.mxu0 %v7208_v28 }
 0x202   : > { %v1286_v11 = vsel %vm1279_vm4, %v1277_v23, %v7069_v60  ;;  %v1287_v51 = vsel %vm1279_vm4, %v1278_v8, %v7070_v35  ;;  %v7083_v41 = vpop.permute.xlu1 %7082  ;;  %v7209_v23 = vld [vmem:[%s10464_s4 + $0x60] sm:$0xff]  }
 0x203   : > { %v7078_v3 = vpop.permute.xlu0 %7077  ;;  %v1295_v55 = vsel %vm1288_vm5, %v1286_v11, %v7074_v12  ;;  %v1296_v25 = vsel %vm1288_vm5, %v1287_v51, %v7075_v30  ;;  %v7084_v15 = vunpack.i.l.bf16 %v7083_v41  ;;  %v7085_v61 = vunpack.i.h.bf16 %v7083_v41  ;;  %v7211_v12 = vld [vmem:[%s10464_s4 + $0xe0] sm:$0xff]   ;;  %5870 = vmatprep.subr.bf16.mxu1 %v7209_v23 }
 0x204   : > { %v7079_v40 = vunpack.i.l.bf16 %v7078_v3  ;;  %v7080_v13 = vunpack.i.h.bf16 %v7078_v3  ;;  %v7213_v3 = vld [vmem:[%s10464_s4 + $0x58] sm:$0xff]   ;;  %5892 = vmatprep.subr.bf16.mxu0 %v7211_v12  ;;  %v7473_v23 = vmov 0.0  }
 0x206   : > { %v1304_v14 = vsel %vm1297_vm6, %v1295_v55, %v7079_v40  ;;  %v1305_v17 = vsel %vm1297_vm6, %v1296_v25, %v7080_v13  ;;  %v7093_v62 = vpop.permute.xlu1 %7092  ;;  %v7214_v55 = vld [vmem:[%s10464_s4 + $0x18] sm:$0xff]   ;;  %v7217_v13 = vld [vmem:[%s10464_s4 + $0x50] sm:$0xff]  }
 0x207   : > { %v7088_v27 = vpop.permute.xlu0 %7087  ;;  %v1313_v42 = vsel %vm1306_vm7, %v1304_v14, %v7084_v15  ;;  %v1314_v52 = vsel %vm1306_vm7, %v1305_v17, %v7085_v61  ;;  %v7094_v21 = vunpack.i.l.bf16 %v7093_v62  ;;  %v7095_v43 = vunpack.i.h.bf16 %v7093_v62  ;;  %v7216_v25 = vld [vmem:[%s10464_s4 + $0x98] sm:$0xff]   ;;  %v7219_v14 = vld [vmem:[%s10464_s4 + $0xd0] sm:$0xff]  }
 0x208   : > { %v7090_v2 = vunpack.i.h.bf16 %v7088_v27  ;;  %v7089_v32 = vunpack.i.l.bf16 %v7088_v27  ;;  %vm10770_vm7 = vcmask 97280  }
 0x20a   : > { %v1322_v44 = vsel %vm1315_vm8, %v1313_v42, %v7089_v32  ;;  %v1323_v60 = vsel %vm1315_vm8, %v1314_v52, %v7090_v2 }
 0x20b   : > { %v7098_v49 = vpop.permute.xlu0 %7097  ;;  %v1331_v11 = vsel %vm1324_vm9, %v1322_v44, %v7094_v21  ;;  %v1332_v40 = vsel %vm1324_vm9, %v1323_v60, %v7095_v43  ;;  %vm10771_vm9 = vmmov %vm10770_vm7 }
 0x20c   : > { %v7099_v16 = vunpack.i.l.bf16 %v7098_v49  ;;  %v7100_v30 = vunpack.i.h.bf16 %v7098_v49  ;;  %v7221_v49 = vld [vmem:[%s10464_s4 + $0x48] sm:$0xff]  }
 0x20e   : > { %v1340_v41 = vsel %vm1333_vm10, %v1331_v11, %v7099_v16  ;;  %v7223_v16 = vld [vmem:[%s10464_s4 + $0xc8] sm:$0xff]  }
 0x247   : > { %v2803_v38 = vpop.f32.mrf.mxu0 }
 0x248   : > { %v2854_v26 = vmul.f32 %v9587_v50, %v2803_v38  ;;  %v7210_v38 = vld [vmem:[%s10464_s4 + $0x20] sm:$0xff]  }
 0x249   : > { %v2805_v4 = vpop.f32.mrf.mxu0  ;;  %5871 = vmatpush3.bf16.msra.mxu1 %v7210_v38 }
 0x24a   : > { %v2882_v63 = vadd.f32 %v9590_v24, %v2854_v26  ;;  %v2855_v0 = vmul.f32 %v9592_v48, %v2805_v4  ;;  %v7103_v4 = vpop.permute.xlu1 %7102  ;;  %5872 = vmatprep.subr.bf16.mxu1 %v7213_v3 }
 0x24b   : > { %v2807_v29 = vpop.f32.mrf.mxu0 }
 0x24c   : > { %v2914_v6 = vmul.f32 0.01, %v2882_v63  ;;  %v2883_v54 = vadd.f32 %v9596_v18, %v2855_v0  ;;  %v2856_v47 = vmul.f32 %v9587_v50, %v2807_v29  ;;  %vm2898_vm3 = vcmp.gt.f32.partialorder %v2882_v63, 0.0 }
 0x24d   : > { %v2809_v59 = vpop.f32.mrf.mxu0  ;;  %5873 = vmatpush3.bf16.msra.mxu1 %v7214_v55 }
 0x24e   : > { %vm2899_vm4 = vcmp.gt.f32.partialorder %v2883_v54, 0.0  ;;  %v2915_v33 = vmul.f32 0.01, %v2883_v54  ;;  %v2884_v31 = vadd.f32 %v9590_v24, %v2856_v47  ;;  %v2857_v45 = vmul.f32 %v9592_v48, %v2809_v59  ;;  %v7108_v59 = vpop.permute.xlu0 %7107  ;;  %v7113_v32 = vpop.permute.xlu1 %7112  ;;  %5874 = vmatprep.subr.bf16.mxu1 %v7217_v13 }
 0x24f   : > { %v2930_v57 = vsel %vm2898_vm3, %v2882_v63, %v2914_v6  ;;  %v7212_v63 = vld [vmem:[%s10464_s4 + $0xa0] sm:$0xff]   ;;  %v7215_v6 = vld [vmem:[%s10464_s4 + $0xd8] sm:$0xff]   ;;  %v7109_v2 = vunpack.i.l.bf16 %v7108_v59  ;;  %v7115_v37 = vunpack.i.h.bf16 %v7113_v32  ;;  %vm10778_vm3 = vmmov %vm10776_vm11 }
 0x250   : > { %vm2900_vm13 = vcmp.gt.f32.partialorder %v2884_v31, 0.0  ;;  %v2916_v34 = vmul.f32 0.01, %v2884_v31  ;;  %v2931_v53 = vsel %vm2899_vm4, %v2883_v54, %v2915_v33  ;;  %v2885_v10 = vadd.f32 %v9596_v18, %v2857_v45  ;;  %5893 = vmatpush3.bf16.msra.mxu0 %v7212_v63 }
 0x251   : > { %v2948_v36 = vrot.slane %v2930_v57, 1  ;;  %v2949_v22 = vrot.slane %v2931_v53, 1  ;;  %v7104_v54 = vunpack.i.l.bf16 %v7103_v4  ;;  %5894 = vmatprep.subr.bf16.mxu0 %v7215_v6  ;;  %v1341_v45 = vsel %vm1333_vm10, %v1332_v40, %v7100_v30  ;;  %v7224_v30 = vld [vmem:[%s10464_s4 + $0x88] sm:$0xff]  }
 0x252   : > { %v2932_v46 = vsel %vm2900_vm13, %v2884_v31, %v2916_v34  ;;  %vm2901_vm5 = vcmp.gt.f32.partialorder %v2885_v10, 0.0  ;;  %v2917_v58 = vmul.f32 0.01, %v2885_v10  ;;  %vm3441_vm4 = vcmask 1041408  }
 0x253   : > { %v2956_v56 = vrot.slane %v2932_v46, 1  ;;  %v2952_v39 = vmax.f32 %v2930_v57, %v2948_v36  ;;  %v2953_v35 = vmax.f32 %v2931_v53, %v2949_v22  ;;  %v7105_v57 = vunpack.i.h.bf16 %v7103_v4 }
 0x254   : > { %v2933_v7 = vsel %vm2901_vm5, %v2885_v10, %v2917_v58  ;;  %v7218_v10 = vld [vmem:[%s10464_s4 + $0x10] sm:$0xff]   ;;  %v1349_v42 = vsel %vm10770_vm7, %v1340_v41, %v7104_v54  ;;  %5895 = vmatpush3.bf16.msra.mxu0 %v7216_v25  ;;  %v7225_v54 = vld [vmem:[%s10464_s4 + $0x40] sm:$0xff]   ;;  %vm10779_vm13 = vcmask 130048  }
 0x255   : > { %v2960_v19 = vmax.f32 %v2932_v46, %v2956_v56  ;;  %v2957_v1 = vrot.slane %v2933_v7, 1  ;;  %v7110_v46 = vunpack.i.h.bf16 %v7108_v59  ;;  %5896 = vmatprep.subr.bf16.mxu0 %v7219_v14  ;;  %v1350_v22 = vsel %vm10771_vm9, %v1341_v45, %v7105_v57  ;;  %5875 = vmatpush3.bf16.msra.mxu1 %v7218_v10  ;;  %v7226_v41 = vld [vmem:[%s10464_s4] sm:$0xff]   ;;  %vm10780_vm5 = vmmov %vm10779_vm13 }
 0x256   : > { %v1358_v28 = vsel %vm10772_vm14, %v1349_v42, %v7109_v2  ;;  %5876 = vmatprep.subr.bf16.mxu1 %v7221_v49  ;;  %v7227_v59 = vld [vmem:[%s10464_s4 + $0xc0] sm:$0xff]   ;;  %vm10785_vm14 = vcmask 400384  }
 0x257   : > { %v2961_v8 = vmax.f32 %v2933_v7, %v2957_v1  ;;  %v9636_v26 = vmax.f32 %v2952_v39, %v2960_v19  ;;  %v7114_v19 = vunpack.i.l.bf16 %v7113_v32  ;;  %v7118_v7 = vpop.permute.xlu0 %7117  ;;  %v1359_v39 = vsel %vm10773_vm15, %v1350_v22, %v7110_v46  ;;  %v7228_v14 = vld [vmem:[%s10464_s4 + $0x80] sm:$0xff]   ;;  %vm10786_vm15 = vmmov %vm10777_vm12 }
 0x258   : > { %5897 = vmatpush3.bf16.msra.mxu0 %v7220_v9  ;;  %v7119_v38 = vunpack.i.l.bf16 %v7118_v7  ;;  %v1368_v3 = vsel %vm10775_vm2, %v1359_v39, %v7115_v37  ;;  %v7229_v37 = vld [vmem:[%s10464_s4 + $0x178] sm:$0xff]  }
 0x259   : > { %v9645_v0 = vmax.f32 %v2953_v35, %v2961_v8  ;;  %v3238_v34 = vrot.slane %v9636_v26, 2  ;;  %v3348_v35 = vrot.slane %v7473_v23, 7  ;;  %v7222_v8 = vld [vmem:[%s10464_s4 + $0x8] sm:$0xff]   ;;  %v1367_v4 = vsel %vm10774_vm1, %v1358_v28, %v7114_v19  ;;  %5898 = vmatprep.subr.bf16.mxu0 %v7223_v16  ;;  %v7234_v39 = vld [vmem:[%s10464_s4 + $0x1f8] sm:$0xff]  }
 0x25a   : > { %v2813_v51 = vpop.f32.mrf.mxu0  ;;  %5877 = vmatpush3.bf16.msra.mxu1 %v7222_v8 }
 0x25b   : > { %v2858_v29 = vmul.f32 %v9587_v50, %v2813_v51  ;;  %v3239_v31 = vrot.slane %v9645_v0, 2  ;;  %v7120_v51 = vunpack.i.h.bf16 %v7118_v7  ;;  %5878 = vmatprep.subr.bf16.mxu1 %v7225_v54 }
 0x25c   : > { %v2815_v47 = vpop.f32.mrf.mxu0  ;;  %5899 = vmatpush3.bf16.msra.mxu0 %v7224_v30 }
 0x25d   : > { %v2886_v33 = vadd.f32 %v9590_v24, %v2858_v29  ;;  %v2859_v15 = vmul.f32 %v9592_v48, %v2815_v47  ;;  %v7141_v56 = vpack.i.bf16 %v3239_v31, %v3238_v34  ;;  %v9715_v31 = vsel %vm10777_vm12, 0.0, %v3348_v35  ;;  %5900 = vmatprep.subr.bf16.mxu0 %v7227_v59 }
 0x25e   : > { %v2817_v61 = vpop.f32.mrf.mxu0  ;;  %v1377_v45 = vsel %vm10778_vm3, %v1368_v3, %v7120_v51  ;;  %5879 = vmatpush3.bf16.msra.mxu1 %v7226_v41  ;;  %vm3244_vm3 = vcmask 523264  }
 0x25f   : > { %vm2902_vm6 = vcmp.gt.f32.partialorder %v2886_v33, 0.0  ;;  %v2918_v27 = vmul.f32 0.01, %v2886_v33  ;;  %v2887_v17 = vadd.f32 %v9596_v18, %v2859_v15  ;;  %v2860_v53 = vmul.f32 %v9587_v50, %v2817_v61  ;;  %7142 = vrot.lane.b32.xlu1 %v7141_v56, %s7472_s21  ;;  %5908 = vmatprep.subr.bf16.mxu1 %v7229_v37 }
 0x260   : > { %v2819_v36 = vpop.f32.mrf.mxu0  ;;  %5901 = vmatpush3.bf16.msra.mxu0 %v7228_v14 }
 0x261   : > { %v2934_v58 = vsel %vm2902_vm6, %v2886_v33, %v2918_v27  ;;  %vm2903_vm8 = vcmp.gt.f32.partialorder %v2887_v17, 0.0  ;;  %v2919_v62 = vmul.f32 0.01, %v2887_v17  ;;  %v2888_v20 = vadd.f32 %v9590_v24, %v2860_v53  ;;  %5930 = vmatprep.subr.bf16.mxu0 %v7234_v39 }
 0x262   : > { %v2861_v52 = vmul.f32 %v9592_v48, %v2819_v36  ;;  %v2966_v44 = vrot.slane %v2934_v58, 1  ;;  %v1376_v33 = vsel %vm10776_vm11, %v1367_v4, %v7119_v38  ;;  %vm10781_vm6 = vcmask 261120  }
 0x263   : > { %vm2904_vm10 = vcmp.gt.f32.partialorder %v2888_v20, 0.0  ;;  %v2920_v21 = vmul.f32 0.01, %v2888_v20  ;;  %v2935_v1 = vsel %vm2903_vm8, %v2887_v17, %v2919_v62  ;;  %vm10782_vm7 = vmmov %vm10781_vm6  ;;  %vm10783_vm8 = vcmask 392192  }
 0x264   : > { %v2889_v43 = vadd.f32 %v9596_v18, %v2861_v52  ;;  %v2967_v63 = vrot.slane %v2935_v1, 1  ;;  %v2970_v40 = vmax.f32 %v2934_v58, %v2966_v44  ;;  %vm10784_vm9 = vmmov %vm10783_vm8  ;;  %v9797_v39 = vrot.slane %v7473_v23, 6 }
 0x265   : > { %v2936_v60 = vsel %vm2904_vm10, %v2888_v20, %v2920_v21  ;;  %vm3456_vm10 = vcmask 1042432  }
 0x266   : > { %v2974_v12 = vrot.slane %v2936_v60, 1  ;;  %vm2905_vm0 = vcmp.gt.f32.partialorder %v2889_v43, 0.0  ;;  %v2921_v11 = vmul.f32 0.01, %v2889_v43  ;;  %v7123_v6 = vpop.permute.xlu1 %7122  ;;  %v2971_v57 = vmax.f32 %v2935_v1, %v2967_v63 }
 0x267   : > { %v7125_v25 = vunpack.i.h.bf16 %v7123_v6  ;;  %v7124_v13 = vunpack.i.l.bf16 %v7123_v6 }
 0x268   : > { %v2978_v29 = vmax.f32 %v2936_v60, %v2974_v12  ;;  %v2937_v55 = vsel %vm2905_vm0, %v2889_v43, %v2921_v11 }
 0x269   : > { %v2975_v47 = vrot.slane %v2937_v55, 1  ;;  %v2681_v34 = vsel %vm10779_vm13, %v1376_v33, %v7124_v13  ;;  %v2682_v27 = vsel %vm10780_vm5, %v1377_v45, %v7125_v25  ;;  %vm10787_vm13 = vmmov %vm10777_vm12 }
 0x26a   : > { %v9712_v15 = vmax.f32 %v2970_v40, %v2978_v29  ;;  %v7133_v53 = vpop.permute.xlu1 %7132  ;;  %vm10788_vm5 = vmmov %vm10777_vm12 }
 0x26b   : > { %v2979_v61 = vmax.f32 %v2937_v55, %v2975_v47  ;;  %v7135_v36 = vunpack.i.h.bf16 %v7133_v53  ;;  %v7134_v56 = vunpack.i.l.bf16 %v7133_v53 }
 0x26c   : > { %v7128_v17 = vpop.permute.xlu0 %7127  ;;  %v9724_v10 = vrot.slane %v9712_v15, 2  ;;  %v3274_v42 = vrot.slane %v9712_v15, 4  ;;  %v5674_v19 = vrot.slane %v9712_v15, 13 }
 0x26d   : > { %v9727_v46 = vmax.f32 %v2971_v57, %v2979_v61  ;;  %v7130_v2 = vunpack.i.h.bf16 %v7128_v17  ;;  %v7129_v32 = vunpack.i.l.bf16 %v7128_v17 }
 0x26e   : > { %v7136_v58 = vpack.i.bf16 %v9724_v10, %v9712_v15  ;;  %v3377_v62 = vrot.slane %v9724_v10, 6  ;;  %v3405_v20 = vrot.slane %v3274_v42, 7  ;;  %v9758_v60 = vsel %vm10786_vm15, %v9724_v10, %v5674_v19  ;;  %vm10790_vm15 = vmmov %vm10788_vm5 }
 0x26f   : > { %v2690_v22 = vsel %vm10781_vm6, %v2681_v34, %v7129_v32  ;;  %v2691_v52 = vsel %vm10782_vm7, %v2682_v27, %v7130_v2  ;;  %v9737_v9 = vrot.slane %v9727_v46, 2  ;;  %v5673_v34 = vrot.slane %v9636_v26, 11  ;;  %vm10789_vm6 = vmmov %vm10788_vm5 }
 0x270   : > { %v2699_v7 = vsel %vm10783_vm8, %v2690_v22, %v7134_v56  ;;  %v2700_v21 = vsel %vm10784_vm9, %v2691_v52, %v7135_v36  ;;  %7137 = vrot.lane.b32.xlu0 %v7136_v58, %s7472_s21  ;;  %v3445_v28 = vsel %vm3441_vm4, %v9715_v31, %v3377_v62  ;;  %v3267_v52 = vrot.slane %v9645_v0, 6 }
 0x271   : > { %v2704_v44 = vpack.c.bf16 %v2700_v21, %v2699_v7  ;;  %v7151_v1 = vpack.i.bf16 %v9737_v9, %v9727_v46  ;;  %v3460_v43 = vsel %vm3456_vm10, %v3445_v28, %v3405_v20  ;;  %v3433_v56 = vsel %vm10777_vm12, %v9636_v26, %v5673_v34  ;;  %v7233_v34 = vld [vmem:[%s10464_s4 + $0x168] sm:$0xff]  }
 0x272   : > { %v3474_v49 = vpack.c.bf16 %v3460_v43, %v3460_v43  ;;  %v3266_v7 = vrot.slane %v9636_v26, 6  ;;  %v3275_v21 = vrot.slane %v9727_v46, 4 }
 0x273   : > { %7152 = vrot.lane.b32.xlu1 %v7151_v1, %s7472_s21  ;;  %5672 = vmatmul.mubr.msk.bf16.gmra.mxu0 %vm10785_vm14, %v2704_v44 }
 0x274   : > { %4208 = vmatprep.mubr.bf16.mxu0 %v3474_v49  ;;  %v7156_v28 = vpack.i.bf16 %v3267_v52, %v3266_v7  ;;  %v7171_v1 = vpack.i.bf16 %v3275_v21, %v3274_v42  ;;  %v7250_v52 = vld [vmem:[%s10464_s4 + $0x1d8] sm:$0xff]   ;;  %v7245_v7 = vld [vmem:[%s10464_s4 + $0x150] sm:$0xff]  }
 0x291   : > { %v2823_v35 = vpop.f32.mrf.mxu0 }
 0x292   : > { %v2862_v8 = vmul.f32 %v9587_v50, %v2823_v35 }
 0x293   : > { %v2825_v16 = vpop.f32.mrf.mxu0 }
 0x294   : > { %v2890_v38 = vadd.f32 %v9590_v24, %v2862_v8  ;;  %v2863_v12 = vmul.f32 %v9592_v48, %v2825_v16 }
 0x295   : > { %v2827_v11 = vpop.f32.mrf.mxu0 }
 0x296   : > { %vm2906_vm0 = vcmp.gt.f32.partialorder %v2890_v38, 0.0  ;;  %v2922_v30 = vmul.f32 0.01, %v2890_v38  ;;  %v2891_v4 = vadd.f32 %v9596_v18, %v2863_v12  ;;  %v2864_v51 = vmul.f32 %v9587_v50, %v2827_v11 }
 0x297   : > { %v2829_v63 = vpop.f32.mrf.mxu0 }
 0x298   : > { %v2938_v3 = vsel %vm2906_vm0, %v2890_v38, %v2922_v30  ;;  %vm2907_vm1 = vcmp.gt.f32.partialorder %v2891_v4, 0.0  ;;  %v2923_v40 = vmul.f32 0.01, %v2891_v4  ;;  %v2892_v29 = vadd.f32 %v9590_v24, %v2864_v51  ;;  %vm10791_vm0 = vmmov %vm10788_vm5 }
 0x299   : > { %v2865_v55 = vmul.f32 %v9592_v48, %v2829_v63  ;;  %v2984_v54 = vrot.slane %v2938_v3, 1  ;;  %v3402_v38 = vrot.slane %v9712_v15, 7  ;;  %v3442_v30 = vsel %vm3441_vm4, %v9715_v31, %v9797_v39 }
 0x29a   : > { %vm2908_vm2 = vcmp.gt.f32.partialorder %v2892_v29, 0.0  ;;  %v2924_v6 = vmul.f32 0.01, %v2892_v29  ;;  %v2939_v47 = vsel %vm2907_vm1, %v2891_v4, %v2923_v40  ;;  %vm10792_vm1 = vmmov %vm10791_vm0 }
 0x29b   : > { %v2893_v25 = vadd.f32 %v9596_v18, %v2865_v55  ;;  %v2985_v33 = vrot.slane %v2939_v47, 1  ;;  %v2988_v14 = vmax.f32 %v2938_v3, %v2984_v54  ;;  %v3457_v55 = vsel %vm3456_vm10, %v3442_v30, %v3402_v38  ;;  %v7258_v38 = vld [vmem:[%s10464_s4 + $0x188] sm:$0xff]   ;;  %v7261_v30 = vld [vmem:[%s10464_s4 + $0x278] sm:$0xff]  }
 0x29c   : > { %v2940_v13 = vsel %vm2908_vm2, %v2892_v29, %v2924_v6  ;;  %vm10793_vm2 = vmmov %vm10791_vm0 }
 0x29d   : > { %v2992_v41 = vrot.slane %v2940_v13, 1  ;;  %vm2909_vm11 = vcmp.gt.f32.partialorder %v2893_v25, 0.0  ;;  %v2925_v59 = vmul.f32 0.01, %v2893_v25  ;;  %v2989_v17 = vmax.f32 %v2939_v47, %v2985_v33  ;;  %v7231_v33 = vld [vmem:[%s10464_s4 + $0x170] sm:$0xff]  }
 0x29f   : > { %v2996_v45 = vmax.f32 %v2940_v13, %v2992_v41  ;;  %v2941_v57 = vsel %vm2909_vm11, %v2893_v25, %v2925_v59  ;;  %v7230_v13 = vld [vmem:[%s10464_s4 + $0x138] sm:$0xff]   ;;  %v3471_v59 = vpack.c.bf16 %v3457_v55, %v3457_v55  ;;  %vm10794_vm11 = vmmov %vm10791_vm0 }
 0x2a0   : > { %v2993_v61 = vrot.slane %v2941_v57, 1 }
 0x2a1   : > { %v2998_v27 = vmax.f32 %v2988_v14, %v2996_v45  ;;  %v7236_v45 = vld [vmem:[%s10464_s4 + $0x1b8] sm:$0xff]  }
 0x2a2   : > { %v2997_v53 = vmax.f32 %v2941_v57, %v2993_v61  ;;  %v7238_v61 = vld [vmem:[%s10464_s4 + $0x1f0] sm:$0xff]  }
 0x2a3   : > { %v3289_v2 = vrot.slane %v2998_v27, 2  ;;  %v3379_v32 = vrot.slane %v2998_v27, 6  ;;  %v3324_v43 = vrot.slane %v2998_v27, 4 }
 0x2a4   : > { %v9769_v36 = vmax.f32 %v2989_v17, %v2997_v53  ;;  %v7242_v17 = vld [vmem:[%s10464_s4 + $0x1e8] sm:$0xff]  }
 0x2a5   : > { %v3408_v58 = vrot.slane %v3289_v2, 7  ;;  %v3448_v62 = vsel %vm3441_vm4, %v3433_v56, %v3379_v32  ;;  %v7235_v53 = vld [vmem:[%s10464_s4 + $0x128] sm:$0xff]   ;;  %v7246_v56 = vld [vmem:[%s10464_s4 + $0x1e0] sm:$0xff]  }
 0x2a6   : > { %v7146_v20 = vpack.i.bf16 %v9769_v36, %v2998_v27  ;;  %v3290_v22 = vrot.slane %v9769_v36, 2  ;;  %v3325_v44 = vrot.slane %v9769_v36, 4  ;;  %v7240_v27 = vld [vmem:[%s10464_s4 + $0x1b0] sm:$0xff]   ;;  %v7244_v32 = vld [vmem:[%s10464_s4 + $0x1a8] sm:$0xff]  }
 0x2a7   : > { %v9778_v37 = vsel %vm3456_vm10, %v3448_v62, %v3408_v58  ;;  %v7239_v58 = vld [vmem:[%s10464_s4 + $0x120] sm:$0xff]   ;;  %v7241_v62 = vld [vmem:[%s10464_s4 + $0x158] sm:$0xff]  }
 0x2a8   : > { %7147 = vrot.lane.b32.xlu0 %v7146_v20, %s7472_s21  ;;  %v7161_v19 = vpack.i.bf16 %v3290_v22, %v3289_v2  ;;  %v7166_v49 = vpack.i.bf16 %v3325_v44, %v3324_v43  ;;  %v7237_v2 = vld [vmem:[%s10464_s4 + $0x160] sm:$0xff]   ;;  %v7254_v44 = vld [vmem:[%s10464_s4 + $0x1d0] sm:$0xff]   ;;  %v7249_v43 = vld [vmem:[%s10464_s4 + $0x148] sm:$0xff]  }
 0x2a9   : > { %v7248_v20 = vld [vmem:[%s10464_s4 + $0x1a0] sm:$0xff]  }
 0x2aa   : > { %7162 = vrot.lane.b32.xlu1 %v7161_v19, %s7472_s21  ;;  %v7243_v19 = vld [vmem:[%s10464_s4 + $0x118] sm:$0xff]  }
 0x2ac   : > { %7157 = vrot.lane.b32.xlu0 %v7156_v28, %s7472_s21  ;;  %v7252_v28 = vld [vmem:[%s10464_s4 + $0x198] sm:$0xff]  }
 0x2ae   : > { %7172 = vrot.lane.b32.xlu1 %v7171_v1, %s7472_s21  ;;  %v7247_v1 = vld [vmem:[%s10464_s4 + $0x110] sm:$0xff]  }
 0x2b0   : > { %7167 = vrot.lane.b32.xlu0 %v7166_v49, %s7472_s21  ;;  %v7256_v49 = vld [vmem:[%s10464_s4 + $0x190] sm:$0xff]  }
 0x2d1   : > { %v9794_v26 = vpop.permute.xlu1 %7142 }
 0x2e2   : > { %v7138_v35 = vpop.permute.xlu0 %7137 }
 0x2e3   : > { %v7140_v8 = vunpack.i.h.bf16 %v7138_v35  ;;  %v7139_v16 = vunpack.i.l.bf16 %v7138_v35  ;;  %v7257_v35 = vld [vmem:[%s10464_s4 + $0x1c8] sm:$0xff]  }
 0x2e5   : > { %v9801_v12 = vsel %vm3244_vm3, 0.0, %v7139_v16  ;;  %v7153_v42 = vpop.permute.xlu1 %7152  ;;  %v3340_v11 = vsel %vm3244_vm3, %v9727_v46, %v7140_v8 }
 0x2e6   : > { %v3375_v4 = vrot.slane %v9801_v12, 6  ;;  %v7155_v51 = vunpack.i.h.bf16 %v7153_v42  ;;  %v7154_v63 = vunpack.i.l.bf16 %v7153_v42  ;;  %v3403_v3 = vrot.slane %v3340_v11, 7  ;;  %v7259_v42 = vld [vmem:[%s10464_s4 + $0x1c0] sm:$0xff]  }
 0x2e7   : > { %v7255_v11 = vld [vmem:[%s10464_s4 + $0x100] sm:$0xff]  }
 0x2e8   : > { %v3314_v40 = vsel %vm3244_vm3, %v7140_v8, %v7155_v51  ;;  %v9811_v15 = vsel %vm3244_vm3, %v7139_v16, %v7154_v63  ;;  %v3443_v29 = vsel %vm3441_vm4, %v9715_v31, %v3375_v4  ;;  %v7251_v8 = vld [vmem:[%s10464_s4 + $0x108] sm:$0xff]   ;;  %v7253_v16 = vld [vmem:[%s10464_s4 + $0x140] sm:$0xff]   ;;  %v7289_v51 = vld [vmem:[%s10464_s4 + $0x2f8] sm:$0xff]   ;;  %v7145_v63 = vunpack.i.h.bf16 %v9794_v26 }
 0x2e9   : > { %v3404_v6 = vrot.slane %v3314_v40, 7  ;;  %v3376_v54 = vrot.slane %v9811_v15, 6  ;;  %v3458_v47 = vsel %vm3456_vm10, %v3443_v29, %v3403_v3  ;;  %v7260_v4 = vld [vmem:[%s10464_s4 + $0x180] sm:$0xff]   ;;  %v7144_v3 = vunpack.i.l.bf16 %v9794_v26 }
 0x2ea   : > { %v3472_v25 = vpack.c.bf16 %v3458_v47, %v3458_v47  ;;  %v3307_v47 = vsel %vm3244_vm3, %v9737_v9, 0.0 }
 0x2eb   : > { %v3444_v41 = vsel %vm3441_vm4, %v9715_v31, %v3376_v54  ;;  %v7232_v31 = vld [vmem:[%s10464_s4 + $0x130] sm:$0xff]   ;;  %v9920_v40 = vsel %vm3244_vm3, %v7144_v3, %v7145_v63  ;;  %v3284_v29 = vsel %vm3244_vm3, 0.0, %v7144_v3  ;;  %v7268_v63 = vld [vmem:[%s10464_s4 + $0x220] sm:$0xff]  }
 0x2ec   : > { %v3459_v14 = vsel %vm3456_vm10, %v3444_v41, %v3404_v6  ;;  %4168 = vmatprep.mubr.bf16.mxu1 %v3472_v25  ;;  %v3349_v55 = vrot.slane %v3284_v29, 7  ;;  %v3350_v6 = vrot.slane %v9920_v40, 7  ;;  %v7293_v29 = vld [vmem:[%s10464_s4 + $0x2e8] sm:$0xff]  }
 0x2ed   : > { %v3473_v57 = vpack.c.bf16 %v3459_v14, %v3459_v14  ;;  %4169 = vmatmul.mubr.bf16.vlgmr.msra.gmra.mxu1 %v3471_v59 }
 0x2ee   : > { %5909 = vmatpush3.bf16.msra.mxu1 %v7230_v13  ;;  %v3431_v41 = vsel %vm10787_vm13, 0.0, %v3349_v55  ;;  %v3432_v26 = vsel %vm10788_vm5, 0.0, %v3350_v6  ;;  %v7270_v55 = vld [vmem:[%s10464_s4 + $0x218] sm:$0xff]  }
 0x2ef   : > { %4209 = vmatmul.mubr.bf16.vlgmr.msra.gmra.mxu0 %v3473_v57  ;;  %5910 = vmatprep.subr.bf16.mxu1 %v7231_v33 }
 0x2f0   : > { %5931 = vmatpush3.bf16.msra.mxu0 %v7236_v45  ;;  %v3378_v45 = vrot.slane %v3307_v47, 6  ;;  %v7294_v47 = vld [vmem:[%s10464_s4 + $0x2a8] sm:$0xff]  }
 0x2f1   : > { %5932 = vmatprep.subr.bf16.mxu0 %v7238_v61 }
 0x2f2   : > { %5911 = vmatpush3.bf16.msra.mxu1 %v7232_v31 }
 0x2f3   : > { %5912 = vmatprep.subr.bf16.mxu1 %v7233_v34 }
 0x2f4   : > { %5933 = vmatpush3.bf16.msra.mxu0 %v7240_v27  ;;  %v3264_v27 = vrot.slane %v9645_v0, 4 }
 0x2f5   : > { %5934 = vmatprep.subr.bf16.mxu0 %v7242_v17 }
 0x2f6   : > { %5913 = vmatpush3.bf16.msra.mxu1 %v7235_v53  ;;  %v3447_v53 = vsel %vm3441_vm4, %v3432_v26, %v9797_v39  ;;  %v7296_v26 = vld [vmem:[%s10464_s4 + $0x2a0] sm:$0xff]  }
 0x2f7   : > { %5914 = vmatprep.subr.bf16.mxu1 %v7237_v2  ;;  %v3446_v2 = vsel %vm3441_vm4, %v3431_v41, %v3378_v45  ;;  %v7272_v45 = vld [vmem:[%s10464_s4 + $0x210] sm:$0xff]  }
 0x2f8   : > { %5935 = vmatpush3.bf16.msra.mxu0 %v7244_v32 }
 0x2f9   : > { %5936 = vmatprep.subr.bf16.mxu0 %v7246_v56 }
 0x2fa   : > { %5915 = vmatpush3.bf16.msra.mxu1 %v7239_v58 }
 0x2fb   : > { %5916 = vmatprep.subr.bf16.mxu1 %v7241_v62 }
 0x2fc   : > { %5937 = vmatpush3.bf16.msra.mxu0 %v7248_v20 }
 0x2fd   : > { %5938 = vmatprep.subr.bf16.mxu0 %v7250_v52 }
 0x2fe   : > { %5917 = vmatpush3.bf16.msra.mxu1 %v7243_v19 }
 0x2ff   : > { %5918 = vmatprep.subr.bf16.mxu1 %v7245_v7  ;;  %v7262_v7 = vld [vmem:[%s10464_s4 + $0x238] sm:$0xff]  }
 0x300   : > { %5939 = vmatpush3.bf16.msra.mxu0 %v7252_v28  ;;  %v3261_v28 = vsel %vm3244_vm3, %v9645_v0, %v7144_v3  ;;  %v7264_v0 = vld [vmem:[%s10464_s4 + $0x230] sm:$0xff]   ;;  %v7269_v3 = vld [vmem:[%s10464_s4 + $0x258] sm:$0xff]  }
 0x301   : > { %5940 = vmatprep.subr.bf16.mxu0 %v7254_v44 }
 0x302   : > { %5919 = vmatpush3.bf16.msra.mxu1 %v7247_v1  ;;  %v7263_v1 = vld [vmem:[%s10464_s4 + $0x270] sm:$0xff]  }
 0x303   : > { %5920 = vmatprep.subr.bf16.mxu1 %v7249_v43 }
 0x304   : > { %5941 = vmatpush3.bf16.msra.mxu0 %v7256_v49 }
 0x305   : > { %5942 = vmatprep.subr.bf16.mxu0 %v7257_v35 }
 0x306   : > { %5921 = vmatpush3.bf16.msra.mxu1 %v7251_v8 }
 0x307   : > { %5922 = vmatprep.subr.bf16.mxu1 %v7253_v16 }
 0x308   : > { %5943 = vmatpush3.bf16.msra.mxu0 %v7258_v38  ;;  %v7265_v38 = vld [vmem:[%s10464_s4 + $0x268] sm:$0xff]  }
 0x309   : > { %5944 = vmatprep.subr.bf16.mxu0 %v7259_v42 }
 0x30a   : > { %5923 = vmatpush3.bf16.msra.mxu1 %v7255_v11 }
 0x30b   : > { %5952 = vmatprep.subr.bf16.mxu1 %v7261_v30  ;;  %v7266_v30 = vld [vmem:[%s10464_s4 + $0x228] sm:$0xff]  }
 0x30c   : > { %5945 = vmatpush3.bf16.msra.mxu0 %v7260_v4  ;;  %v7291_v4 = vld [vmem:[%s10464_s4 + $0x2f0] sm:$0xff]  }
 0x30d   : > { %5974 = vmatprep.subr.bf16.mxu0 %v7289_v51  ;;  %v7267_v51 = vld [vmem:[%s10464_s4 + $0x260] sm:$0xff]  }
 0x31a   : > { %v7148_v54 = vpop.permute.xlu0 %7147 }
 0x31b   : > { %v7150_v25 = vunpack.i.h.bf16 %v7148_v54  ;;  %v7149_v13 = vunpack.i.l.bf16 %v7148_v54  ;;  %v7271_v54 = vld [vmem:[%s10464_s4 + $0x250] sm:$0xff]  }
 0x31c   : > { %v9927_v59 = vpop.permute.xlu1 %7162 }
 0x31d   : > { %v3321_v33 = vsel %vm3244_vm3, %v7149_v13, %v7150_v25  ;;  %v3341_v14 = vsel %vm3244_vm3, %v3275_v21, %v7149_v13  ;;  %v7164_v31 = vunpack.i.l.bf16 %v9927_v59  ;;  %v7295_v13 = vld [vmem:[%s10464_s4 + $0x2e0] sm:$0xff]  }
 0x31e   : > { %v3406_v57 = vrot.slane %v3341_v14, 7  ;;  %v3407_v61 = vrot.slane %v3321_v33, 7  ;;  %v9935_v34 = vpop.permute.xlu0 %7157 }
 0x31f   : > { %v7159_v17 = vunpack.i.l.bf16 %v9935_v34  ;;  %v3308_v58 = vsel %vm3244_vm3, %v9769_v36, %v7164_v31  ;;  %v7290_v36 = vld [vmem:[%s10464_s4 + $0x2b8] sm:$0xff]  }
 0x320   : > { %v3462_v32 = vsel %vm3456_vm10, %v3447_v53, %v3407_v61  ;;  %v3461_v21 = vsel %vm3456_vm10, %v3446_v2, %v3406_v57  ;;  %v3380_v49 = vrot.slane %v3308_v58, 6  ;;  %v7297_v57 = vld [vmem:[%s10464_s4 + $0x2d8] sm:$0xff]   ;;  %v7160_v61 = vunpack.i.h.bf16 %v9935_v34  ;;  %v7273_v53 = vld [vmem:[%s10464_s4 + $0x248] sm:$0xff]  }
 0x321   : > { %v3285_v56 = vsel %vm3244_vm3, %v3264_v27, %v7159_v17  ;;  %v3476_v52 = vpack.c.bf16 %v3462_v32, %v3462_v32  ;;  %v3475_v19 = vpack.c.bf16 %v3461_v21, %v3461_v21  ;;  %v7298_v58 = vld [vmem:[%s10464_s4 + $0x298] sm:$0xff]  }
 0x322   : > { %v3352_v62 = vrot.slane %v3285_v56, 7  ;;  %v9951_v20 = vpop.permute.xlu0 %7167 }
 0x323   : > { %v7169_v44 = vunpack.i.l.bf16 %v9951_v20  ;;  %4248 = vmatprep.mubr.bf16.mxu1 %v3476_v52 }
 0x324   : > { %v3434_v43 = vsel %vm10789_vm6, %v3261_v28, %v3352_v62  ;;  %4249 = vmatmul.mubr.bf16.vlgmr.msra.gmra.mxu1 %v3475_v19  ;;  %v3272_v28 = vsel %vm3244_vm3, %v7159_v17, %v7160_v61  ;;  %v7277_v61 = vld [vmem:[%s10464_s4 + $0x338] sm:$0xff]  }
 0x325   : > { %v3342_v35 = vsel %vm3244_vm3, %v3290_v22, %v7169_v44  ;;  %5953 = vmatpush3.bf16.msra.mxu1 %v7262_v7  ;;  %v3449_v16 = vsel %vm3441_vm4, %v3434_v43, %v3380_v49  ;;  %v3477_v22 = vpack.c.bf16 %v9778_v37, %v9778_v37  ;;  %v7292_v37 = vld [vmem:[%s10464_s4 + $0x2b0] sm:$0xff]   ;;  %v7274_v7 = vld [vmem:[%s10464_s4 + $0x208] sm:$0xff]   ;;  %v7165_v49 = vunpack.i.h.bf16 %v9927_v59 }
 0x326   : > { %v3409_v8 = vrot.slane %v3342_v35, 7  ;;  %5954 = vmatprep.subr.bf16.mxu1 %v7263_v1  ;;  %v7170_v1 = vunpack.i.h.bf16 %v9951_v20  ;;  %v3353_v17 = vrot.slane %v3272_v28, 7  ;;  %v7302_v59 = vld [vmem:[%s10464_s4 + $0x288] sm:$0xff]   ;;  %v7282_v28 = vld [vmem:[%s10464_s4 + $0x310] sm:$0xff]  }
 0x328   : > { %v3464_v42 = vsel %vm3456_vm10, %v3449_v16, %v3409_v8  ;;  %v3435_v20 = vsel %vm10790_vm15, %v9920_v40, %v3353_v17 }
 0x329   : > { %v3478_v11 = vpack.c.bf16 %v3464_v42, %v3464_v42  ;;  %5955 = vmatpush3.bf16.msra.mxu1 %v7264_v0  ;;  %v3330_v42 = vsel %vm3244_vm3, %v7169_v44, %v7170_v1  ;;  %v7283_v1 = vld [vmem:[%s10464_s4 + $0x308] sm:$0xff]  }
 0x32a   : > { %5956 = vmatprep.subr.bf16.mxu1 %v7265_v38  ;;  %v3354_v38 = vrot.slane %v9724_v10, 7  ;;  %v3410_v44 = vrot.slane %v3330_v42, 7 }
 0x32b   : > { %4288 = vmatprep.mubr.bf16.mxu0 %v3478_v11 }
 0x32c   : > { %4289 = vmatmul.mubr.bf16.vlgmr.msra.gmra.mxu0 %v3477_v22  ;;  %v3295_v22 = vsel %vm3244_vm3, %v7164_v31, %v7165_v49  ;;  %v7303_v31 = vld [vmem:[%s10464_s4 + $0x2c0] sm:$0xff]   ;;  %v3436_v40 = vsel %vm10791_vm0, 0.0, %v3354_v38  ;;  %v7286_v49 = vld [vmem:[%s10464_s4 + $0x350] sm:$0xff]   ;;  %v7305_v38 = vld [vmem:[%s10467_s7 + $0x78] sm:$0xff]  }
 0x32d   : > { %5975 = vmatpush3.bf16.msra.mxu0 %v7290_v36  ;;  %5957 = vmatpush3.bf16.msra.mxu1 %v7266_v30 }
 0x32e   : > { %5976 = vmatprep.subr.bf16.mxu0 %v7291_v4  ;;  %5958 = vmatprep.subr.bf16.mxu1 %v7267_v51 }
 0x331   : > { %5977 = vmatpush3.bf16.msra.mxu0 %v7292_v37  ;;  %5959 = vmatpush3.bf16.msra.mxu1 %v7268_v63  ;;  %v7301_v63 = vld [vmem:[%s10464_s4 + $0x2c8] sm:$0xff]  }
 0x332   : > { %5978 = vmatprep.subr.bf16.mxu0 %v7293_v29  ;;  %5960 = vmatprep.subr.bf16.mxu1 %v7269_v3  ;;  %v3381_v3 = vrot.slane %v3295_v22, 6 }
 0x333   : > { %v2833_v6 = vpop.f32.mrf.mxu0 }
 0x334   : > { %v2866_v25 = vmul.f32 %v9587_v50, %v2833_v6 }
 0x335   : > { %v2835_v41 = vpop.f32.mrf.mxu0  ;;  %5979 = vmatpush3.bf16.msra.mxu0 %v7294_v47  ;;  %5961 = vmatpush3.bf16.msra.mxu1 %v7270_v55  ;;  %v3450_v47 = vsel %vm3441_vm4, %v3435_v20, %v3381_v3 }
 0x336   : > { %v2894_v33 = vadd.f32 %v9590_v24, %v2866_v25  ;;  %v2867_v14 = vmul.f32 %v9592_v48, %v2835_v41  ;;  %5980 = vmatprep.subr.bf16.mxu0 %v7295_v13  ;;  %5962 = vmatprep.subr.bf16.mxu1 %v7271_v54  ;;  %v7304_v25 = vld [vmem:[%s10464_s4 + $0x280] sm:$0xff]   ;;  %v3451_v41 = vsel %vm3441_vm4, %v3436_v40, %v9797_v39 }
 0x337   : > { %v2837_v27 = vpop.f32.mrf.mxu0 }
 0x338   : > { %vm2910_vm7 = vcmp.gt.f32.partialorder %v2894_v33, 0.0  ;;  %v2926_v2 = vmul.f32 0.01, %v2894_v33  ;;  %v2895_v32 = vadd.f32 %v9596_v18, %v2867_v14  ;;  %v2868_v21 = vmul.f32 %v9587_v50, %v2837_v27  ;;  %v7299_v50 = vld [vmem:[%s10464_s4 + $0x2d0] sm:$0xff]  }
 0x339   : > { %v2839_v56 = vpop.f32.mrf.mxu0  ;;  %5981 = vmatpush3.bf16.msra.mxu0 %v7296_v26  ;;  %5963 = vmatpush3.bf16.msra.mxu1 %v7272_v45  ;;  %v3465_v26 = vsel %vm3456_vm10, %v3450_v47, %v3410_v44  ;;  %v5675_v14 = vrot.slane %v9727_v46, 13 }
 0x33a   : > { %v2942_v62 = vsel %vm2910_vm7, %v2894_v33, %v2926_v2  ;;  %vm2911_vm8 = vcmp.gt.f32.partialorder %v2895_v32, 0.0  ;;  %v2927_v52 = vmul.f32 0.01, %v2895_v32  ;;  %v2896_v19 = vadd.f32 %v9590_v24, %v2868_v21  ;;  %5982 = vmatprep.subr.bf16.mxu0 %v7297_v57  ;;  %5964 = vmatprep.subr.bf16.mxu1 %v7273_v53  ;;  %v7275_v24 = vld [vmem:[%s10464_s4 + $0x240] sm:$0xff]  }
 0x33b   : > { %v2869_v43 = vmul.f32 %v9592_v48, %v2839_v56  ;;  %v3002_v8 = vrot.slane %v2942_v62, 1  ;;  %v7276_v48 = vld [vmem:[%s10464_s4 + $0x200] sm:$0xff]   ;;  %v3479_v39 = vpack.c.bf16 %v3465_v26, %v3465_v26  ;;  %v3440_v21 = vsel %vm10792_vm1, %v9737_v9, %v5675_v14  ;;  %v7278_v56 = vld [vmem:[%s10464_s4 + $0x330] sm:$0xff]  }
 0x33c   : > { %vm2912_vm9 = vcmp.gt.f32.partialorder %v2896_v19, 0.0  ;;  %v2928_v35 = vmul.f32 0.01, %v2896_v19  ;;  %v2943_v0 = vsel %vm2911_vm8, %v2895_v32, %v2927_v52 }
 0x33d   : > { %v2897_v34 = vadd.f32 %v9596_v18, %v2869_v43  ;;  %5983 = vmatpush3.bf16.msra.mxu0 %v7298_v58  ;;  %5965 = vmatpush3.bf16.msra.mxu1 %v7274_v7  ;;  %v7300_v18 = vld [vmem:[%s10464_s4 + $0x290] sm:$0xff]   ;;  %v3003_v30 = vrot.slane %v2943_v0, 1  ;;  %v3006_v4 = vmax.f32 %v2942_v62, %v3002_v8  ;;  %v7280_v7 = vld [vmem:[%s10464_s4 + $0x320] sm:$0xff]   ;;  %v7287_v8 = vld [vmem:[%s10464_s4 + $0x348] sm:$0xff]  }
 0x33e   : > { %v2944_v16 = vsel %vm2912_vm9, %v2896_v19, %v2928_v35  ;;  %5984 = vmatprep.subr.bf16.mxu0 %v7299_v50  ;;  %5966 = vmatprep.subr.bf16.mxu1 %v7275_v24  ;;  %v7279_v19 = vld [vmem:[%s10464_s4 + $0x328] sm:$0xff]   ;;  %v7281_v50 = vld [vmem:[%s10464_s4 + $0x318] sm:$0xff]   ;;  %v7284_v43 = vld [vmem:[%s10464_s4 + $0x300] sm:$0xff]  }
 0x33f   : > { %v3010_v11 = vrot.slane %v2944_v16, 1  ;;  %vm2913_vm14 = vcmp.gt.f32.partialorder %v2897_v34, 0.0  ;;  %v2929_v36 = vmul.f32 0.01, %v2897_v34  ;;  %v3007_v55 = vmax.f32 %v2943_v0, %v3003_v30  ;;  %v7285_v24 = vld [vmem:[%s10464_s4 + $0x358] sm:$0xff]   ;;  %v7173_v30 = vpop.permute.xlu1 %7172 }
 0x340   : > { %v7174_v20 = vunpack.i.l.bf16 %v7173_v30 }
 0x341   : > { %v3014_v10 = vmax.f32 %v2944_v16, %v3010_v11  ;;  %v2945_v51 = vsel %vm2913_vm14, %v2897_v34, %v2929_v36  ;;  %5985 = vmatpush3.bf16.msra.mxu0 %v7300_v18  ;;  %5967 = vmatpush3.bf16.msra.mxu1 %v7276_v48  ;;  %v7288_v34 = vld [vmem:[%s10464_s4 + $0x340] sm:$0xff]  }
 0x342   : > { %v3011_v37 = vrot.slane %v2945_v51, 1  ;;  %4376 = vmatprep.subr.bf16.mxu1 %v10721_v5  ;;  %5986 = vmatprep.subr.bf16.mxu0 %v7301_v63  ;;  %v3286_v63 = vsel %vm3244_vm3, %v9737_v9, %v7174_v20 }
 0x343   : > { %v10077_v29 = vmax.f32 %v3006_v4, %v3014_v10 }
 0x344   : > { %v3015_v6 = vmax.f32 %v2945_v51, %v3011_v37  ;;  %v7175_v37 = vunpack.i.h.bf16 %v7173_v30  ;;  %v7325_v30 = vld [vmem:[%s10467_s7 + $0xe8] sm:$0xff]  }
 0x345   : > { %v3411_v54 = vrot.slane %v10077_v29, 7  ;;  %5987 = vmatpush3.bf16.msra.mxu0 %v7302_v59  ;;  %v3305_v27 = vrot.slane %v10077_v29, 2  ;;  %v5676_v17 = vrot.slane %v10077_v29, 11 }
 0x346   : > { %v10086_v13 = vmax.f32 %v3007_v55, %v3015_v6  ;;  %5988 = vmatprep.subr.bf16.mxu0 %v7303_v31  ;;  %v3280_v59 = vsel %vm3244_vm3, %v7174_v20, %v7175_v37  ;;  %v3355_v31 = vrot.slane %v3286_v63, 7 }
 0x347   : > { %v3466_v33 = vsel %vm3456_vm10, %v3451_v41, %v3411_v54  ;;  %v3384_v35 = vrot.slane %v3305_v27, 6 }
 0x348   : > { %v7176_v45 = vpack.i.bf16 %v10086_v13, %v10077_v29  ;;  %v3480_v57 = vpack.c.bf16 %v3466_v33, %v3466_v33  ;;  %v3306_v53 = vrot.slane %v10086_v13, 2  ;;  %v5677_v46 = vrot.slane %v10086_v13, 11 }
 0x349   : > { %5989 = vmatpush3.bf16.msra.mxu0 %v7304_v25  ;;  %v3454_v0 = vsel %vm3441_vm4, %v9758_v60, %v3384_v35  ;;  %v3356_v29 = vrot.slane %v3280_v59, 7  ;;  %v3437_v26 = vsel %vm10793_vm2, %v9801_v12, %v3355_v31  ;;  %v7316_v35 = vld [vmem:[%s10467_s7 + $0x10] sm:$0xff]   ;;  %v7328_v59 = vld [vmem:[%s10467_s7 + $0xa0] sm:$0xff]  }
 0x34a   : > { %7177 = vrot.lane.b32.xlu0 %v7176_v45, %s7472_s21  ;;  %4328 = vmatprep.mubr.bf16.mxu1 %v3480_v57  ;;  %v7181_v2 = vpack.i.bf16 %v3306_v53, %v3305_v27  ;;  %v3385_v32 = vrot.slane %v3306_v53, 6  ;;  %v3469_v16 = vsel %vm3456_vm10, %v3454_v0, %v5676_v17  ;;  %v7318_v0 = vld [vmem:[%s10467_s7 + $0x8] sm:$0xff]   ;;  %v7320_v17 = vld [vmem:[%s10467_s7] sm:$0xff]  }
 0x34b   : > { %4329 = vmatmul.mubr.bf16.vlgmr.msra.gmra.mxu1 %v3479_v39  ;;  %v3483_v48 = vpack.c.bf16 %v3469_v16, %v3469_v16  ;;  %5996 = vmatprep.subr.bf16.mxu0 %v7305_v38  ;;  %v3438_v57 = vsel %vm10794_vm11, %v9811_v15, %v3356_v29  ;;  %v7307_v15 = vld [vmem:[%s10467_s7 + $0x70] sm:$0xff]   ;;  %v7321_v16 = vld [vmem:[%s10467_s7 + $0xf8] sm:$0xff]  }
 0x34c   : > { %4377 = vmatpush1.bf16.msra.mxu1 %v7277_v61  ;;  %7182 = vrot.lane.b32.xlu1 %v7181_v2, %s7472_s21  ;;  %v3455_v58 = vsel %vm3441_vm4, %v3440_v21, %v3385_v32  ;;  %v7474_v2 = vmov 0.0|0.0   ;;  %v7322_v38 = vld [vmem:[%s10467_s7 + $0xb8] sm:$0xff]   ;;  %s7391_s21 = scalar_lea.vmem %s5242_s24, 16 }
 0x34d   : > { %4378 = vmatprep.subr.bf16.mxu1 %v10721_v5  ;;  %v3470_v62 = vsel %vm3456_vm10, %v3455_v58, %v5677_v46  ;;  %v7309_v58 = vld [vmem:[%s10467_s7 + $0x68] sm:$0xff]   ;;  %v7330_v29 = vld [vmem:[%s10467_s7 + $0x98] sm:$0xff]   ;;  %p7392_p11 = scmp.ne.s32.totalorder %s5242_s24, %s7391_s21  ;;  %p7399_p1 = scmp.lt.s32.totalorder %s7397_s26, %s7391_s21 }
 0x34e   : > { %v3484_v52 = vpack.c.bf16 %v3470_v62, %v3470_v62  ;;  %v7337_v62 = vld [vmem:[%s10467_s7 + $0x178] sm:$0xff]  }
 0x34f   : > { %p7393_p12 = pnand %p7392_p11, %p7570_p5  ;;  %p7400_p2 = por %p7399_p1, %p7398_p0 }
 0x350   : > { %4379 = vmatpush1.bf16.msra.mxu1 %v7278_v56  ;;  %5786 = vmatprep.mubr.msk.bf16.mxu1 %vm3244_vm3, %v3484_v52  ;;  %v7308_v56 = vld [vmem:[%s10467_s7 + $0x30] sm:$0xff]   ;;  %v7338_v52 = vld [vmem:[%s10467_s7 + $0x138] sm:$0xff]  }
 0x351   : > { %4380 = vmatprep.subr.bf16.mxu1 %v10721_v5  ;;  %p7394_p13 = pneg %p7393_p12 }
 0x353   : > { %p7401_p3 = pnand %p7400_p2, %p7394_p13 }
 0x354   : > { %4381 = vmatpush1.bf16.msra.mxu1 %v7279_v19  ;;  %v7340_v19 = vld [vmem:[%s10467_s7 + $0x170] sm:$0xff]  }
 0x355   : > { %4382 = vmatprep.subr.bf16.mxu1 %v10721_v5 }
 0x358   : > { %4383 = vmatpush1.bf16.msra.mxu1 %v7280_v7  ;;  %v7310_v7 = vld [vmem:[%s10467_s7 + $0x28] sm:$0xff]  }
 0x359   : > { %4384 = vmatprep.subr.bf16.mxu1 %v10721_v5 }
 0x35c   : > { %4385 = vmatpush1.bf16.msra.mxu1 %v7281_v50  ;;  %v7342_v50 = vld [vmem:[%s10467_s7 + $0x130] sm:$0xff]  }
 0x35d   : > { %4386 = vmatprep.subr.bf16.mxu1 %v10721_v5 }
 0x360   : > { %4387 = vmatpush1.bf16.msra.mxu1 %v7282_v28  ;;  %v7311_v28 = vld [vmem:[%s10467_s7 + $0x60] sm:$0xff]  }
 0x361   : > { %4388 = vmatprep.subr.bf16.mxu1 %v10721_v5 }
 0x364   : > { %4389 = vmatpush1.bf16.msra.mxu1 %v7283_v1  ;;  %v7312_v1 = vld [vmem:[%s10467_s7 + $0x20] sm:$0xff]  }
 0x365   : > { %4390 = vmatprep.subr.bf16.mxu1 %v10721_v5 }
 0x368   : > { %4391 = vmatpush1.bf16.msra.mxu1 %v7284_v43  ;;  %v7313_v43 = vld [vmem:[%s10467_s7 + $0x58] sm:$0xff]  }
 0x369   : > { %4400 = vmatprep.subr.bf16.mxu1 %v10721_v5 }
 0x36c   : > { %4401 = vmatpush2.bf16.msra.mxu1 %v7285_v24  ;;  %v7314_v24 = vld [vmem:[%s10467_s7 + $0x18] sm:$0xff]  }
 0x36d   : > { %4402 = vmatprep.subr.bf16.mxu1 %v10721_v5 }
 0x370   : > { %4403 = vmatpush2.bf16.msra.mxu1 %v7286_v49  ;;  %v7315_v49 = vld [vmem:[%s10467_s7 + $0x50] sm:$0xff]  }
 0x371   : > { %4404 = vmatprep.subr.bf16.mxu1 %v10721_v5 }
 0x374   : > { %4405 = vmatpush2.bf16.msra.mxu1 %v7287_v8  ;;  %v7317_v8 = vld [vmem:[%s10467_s7 + $0x48] sm:$0xff]  }
 0x375   : > { %4406 = vmatprep.subr.bf16.mxu1 %v10721_v5 }
 0x378   : > { %4407 = vmatpush2.bf16.msra.mxu1 %v7288_v34  ;;  %v7319_v34 = vld [vmem:[%s10467_s7 + $0x40] sm:$0xff]  }
 0x379   : > { %6040 = vmatprep.subr.bf16.mxu1 %v7337_v62  ;;  %v7354_v62 = vld [vmem:[%s10467_s7 + $0x118] sm:$0xff]  }
 0x37b   : > { %4409 = vmatmul.mubr.bf16.vlgmr.msra.gmra.mxu1 %v3483_v48 }
 0x37c   : > { %5133 = vmatprep.mubr.bf16.mxu1 %v7474_v2  ;;  %6041 = vmatpush3.bf16.msra.mxu1 %v7338_v52  ;;  %v7355_v52 = vld [vmem:[%s10467_s7 + $0x1d8] sm:$0xff]  }
 0x37d   : > { %6042 = vmatprep.subr.bf16.mxu1 %v7340_v19  ;;  %v7356_v19 = vld [vmem:[%s10467_s7 + $0x150] sm:$0xff]  }
 0x380   : > { %6043 = vmatpush3.bf16.msra.mxu1 %v7342_v50  ;;  %v7358_v50 = vld [vmem:[%s10467_s7 + $0x110] sm:$0xff]  }
 0x3ad   : > { %v5880_v60 = vpop.f32.mrf.mxu1 }
 0x3af   : > { %v5902_v42 = vpop.f32.mrf.mxu0  ;;  %v5881_v11 = vpop.f32.mrf.mxu1 }
 0x3b0   : > { %v5882_v36 = vadd.f32 %v5881_v11, %v5880_v60  ;;  %v7323_v60 = vld [vmem:[%s10467_s7 + $0xf0] sm:$0xff]  }
 0x3b1   : > { %v5903_v18 = vpop.f32.mrf.mxu0  ;;  %v5883_v22 = vpop.f32.mrf.mxu1 }
 0x3b2   : > { %v5904_v4 = vadd.f32 %v5903_v18, %v5902_v42  ;;  %v7324_v18 = vld [vmem:[%s10467_s7 + $0xb0] sm:$0xff]  }
 0x3b3   : > { %v5905_v10 = vpop.f32.mrf.mxu0  ;;  %v5884_v5 = vpop.f32.mrf.mxu1 }
 0x3b4   : > { %v10159_v51 = vadd.f32 %v5904_v4, %v5882_v36  ;;  %v7326_v5 = vld [vmem:[%s10467_s7 + $0xa8] sm:$0xff]  }
 0x3b5   : > { %v5906_v44 = vpop.f32.mrf.mxu0 }
 0x3b6   : > { %v7327_v44 = vld [vmem:[%s10467_s7 + $0xe0] sm:$0xff]  }
 0x3bc   : > { %v7178_v3 = vpop.permute.xlu0 %7177 }
 0x3bd   : > { %v7180_v40 = vunpack.i.h.bf16 %v7178_v3  ;;  %v7179_v55 = vunpack.i.l.bf16 %v7178_v3  ;;  %v7329_v3 = vld [vmem:[%s10467_s7 + $0xd8] sm:$0xff]  }
 0x3be   : > { %v7183_v6 = vpop.permute.xlu1 %7182 }
 0x3bf   : > { %v3303_v54 = vsel %vm3244_vm3, %v7179_v55, %v7180_v40  ;;  %v3309_v47 = vsel %vm3244_vm3, 0.0, %v7179_v55  ;;  %v7185_v25 = vunpack.i.h.bf16 %v7183_v6  ;;  %v7184_v41 = vunpack.i.l.bf16 %v7183_v6  ;;  %v7331_v40 = vld [vmem:[%s10467_s7 + $0xd0] sm:$0xff]   ;;  %v7333_v6 = vld [vmem:[%s10467_s7 + $0xc8] sm:$0xff]  }
 0x3c0   : > { %v3382_v33 = vrot.slane %v3309_v47, 6  ;;  %v3383_v14 = vrot.slane %v3303_v54, 6  ;;  %v7332_v55 = vld [vmem:[%s10467_s7 + $0x90] sm:$0xff]   ;;  %v7334_v54 = vld [vmem:[%s10467_s7 + $0x88] sm:$0xff]   ;;  %v7335_v47 = vld [vmem:[%s10467_s7 + $0xc0] sm:$0xff]  }
 0x3c1   : > { %v3336_v9 = vsel %vm3244_vm3, %v7184_v41, %v7185_v25  ;;  %v3343_v45 = vsel %vm3244_vm3, %v10086_v13, %v7184_v41  ;;  %v7306_v13 = vld [vmem:[%s10467_s7 + $0x38] sm:$0xff]   ;;  %v7336_v25 = vld [vmem:[%s10467_s7 + $0x80] sm:$0xff]   ;;  %vm5226_vm3 = vcmask 516096  }
 0x3c2   : > { %v3452_v61 = vsel %vm3441_vm4, %v3437_v26, %v3382_v33  ;;  %v3412_v27 = vrot.slane %v3343_v45, 7  ;;  %v3413_v53 = vrot.slane %v3336_v9, 7  ;;  %v3453_v39 = vsel %vm3441_vm4, %v3438_v57, %v3383_v14  ;;  %v7339_v41 = vld [vmem:[%s10467_s7 + $0x1f8] sm:$0xff]   ;;  %v7343_v33 = vld [vmem:[%s10467_s7 + $0x1f0] sm:$0xff]   ;;  %v7344_v14 = vld [vmem:[%s10467_s7 + $0x168] sm:$0xff]  }
 0x3c3   : > { %v7341_v26 = vld [vmem:[%s10467_s7 + $0x1b8] sm:$0xff]   ;;  %v7345_v9 = vld [vmem:[%s10467_s7 + $0x1b0] sm:$0xff]   ;;  %6044 = vmatprep.subr.bf16.mxu1 %v7344_v14  ;;  %v7346_v57 = vld [vmem:[%s10467_s7 + $0x128] sm:$0xff]  }
 0x3c4   : > { %v3468_v12 = vsel %vm3456_vm10, %v3453_v39, %v3413_v53  ;;  %v3467_v32 = vsel %vm3456_vm10, %v3452_v61, %v3412_v27  ;;  %6045 = vmatpush3.bf16.msra.mxu1 %v7346_v57  ;;  %v7347_v53 = vld [vmem:[%s10467_s7 + $0x1e8] sm:$0xff]   ;;  %vm7475_vm10 = vmmov 0   ;;  %v7373_v14 = vld [vmem:[%s10467_s7 + $0x218] sm:$0xff]   ;;  %v7376_v57 = vld [vmem:[%s10467_s7 + $0x200] sm:$0xff]  }
 0x3c5   : > { %v3482_v46 = vpack.c.bf16 %v3468_v12, %v3468_v12  ;;  %v3481_v21 = vpack.c.bf16 %v3467_v32, %v3467_v32  ;;  %v7348_v12 = vld [vmem:[%s10467_s7 + $0x160] sm:$0xff]   ;;  %v7349_v32 = vld [vmem:[%s10467_s7 + $0x1a8] sm:$0xff]  }
 0x3c6   : > { %6046 = vmatprep.subr.bf16.mxu1 %v7348_v12 }
 0x3c7   : > { %4368 = vmatprep.mubr.bf16.mxu0 %v3482_v46 }
 0x3c8   : > { %4369 = vmatmul.mubr.bf16.vlgmr.msra.gmra.mxu0 %v3481_v21  ;;  %v7350_v21 = vld [vmem:[%s10467_s7 + $0x120] sm:$0xff]  }
 0x3c9   : > { %5997 = vmatpush3.bf16.msra.mxu0 %v7306_v13  ;;  %5053 = vmatprep.mubr.bf16.mxu0 %v7474_v2 }
 0x3ca   : > { %5998 = vmatprep.subr.bf16.mxu0 %v7307_v15  ;;  %6047 = vmatpush3.bf16.msra.mxu1 %v7350_v21  ;;  %v7351_v15 = vld [vmem:[%s10467_s7 + $0x1e0] sm:$0xff]  }
 0x3cd   : > { %5999 = vmatpush3.bf16.msra.mxu0 %v7308_v56  ;;  %v7352_v56 = vld [vmem:[%s10467_s7 + $0x158] sm:$0xff]  }
 0x3ce   : > { %6000 = vmatprep.subr.bf16.mxu0 %v7309_v58  ;;  %v7353_v58 = vld [vmem:[%s10467_s7 + $0x1a0] sm:$0xff]   ;;  %6048 = vmatprep.subr.bf16.mxu1 %v7352_v56 }
 0x3cf   : > { %6049 = vmatpush3.bf16.msra.mxu1 %v7354_v62 }
 0x3d0   : > { %6050 = vmatprep.subr.bf16.mxu1 %v7356_v19 }
 0x3d1   : > { %6001 = vmatpush3.bf16.msra.mxu0 %v7310_v7  ;;  %v7357_v7 = vld [vmem:[%s10467_s7 + $0x198] sm:$0xff]  }
 0x3d2   : > { %6002 = vmatprep.subr.bf16.mxu0 %v7311_v28  ;;  %v7359_v28 = vld [vmem:[%s10467_s7 + $0x1d0] sm:$0xff]  }
 0x3d3   : > { %6051 = vmatpush3.bf16.msra.mxu1 %v7358_v50  ;;  %v4585_v50 = vld [vmem:[%s10468_s8] sm:$0x1] }
 0x3d5   : > { %6003 = vmatpush3.bf16.msra.mxu0 %v7312_v1  ;;  %v7360_v1 = vld [vmem:[%s10467_s7 + $0x148] sm:$0xff]  }
 0x3d6   : > { %6004 = vmatprep.subr.bf16.mxu0 %v7313_v43  ;;  %v7361_v43 = vld [vmem:[%s10467_s7 + $0x190] sm:$0xff]   ;;  %6052 = vmatprep.subr.bf16.mxu1 %v7360_v1 }
 0x3d9   : > { %6005 = vmatpush3.bf16.msra.mxu0 %v7314_v24  ;;  %v7362_v24 = vld [vmem:[%s10467_s7 + $0x108] sm:$0xff]  }
 0x3da   : > { %6006 = vmatprep.subr.bf16.mxu0 %v7315_v49  ;;  %v7363_v49 = vld [vmem:[%s10467_s7 + $0x1c8] sm:$0xff]   ;;  %6053 = vmatpush3.bf16.msra.mxu1 %v7362_v24 }
 0x3dd   : > { %6007 = vmatpush3.bf16.msra.mxu0 %v7316_v35  ;;  %v7364_v35 = vld [vmem:[%s10467_s7 + $0x140] sm:$0xff]  }
 0x3de   : > { %6008 = vmatprep.subr.bf16.mxu0 %v7317_v8  ;;  %v7365_v8 = vld [vmem:[%s10467_s7 + $0x188] sm:$0xff]   ;;  %6054 = vmatprep.subr.bf16.mxu1 %v7364_v35 }
 0x3e1   : > { %6009 = vmatpush3.bf16.msra.mxu0 %v7318_v0  ;;  %v7366_v0 = vld [vmem:[%s10467_s7 + $0x100] sm:$0xff]  }
 0x3e2   : > { %6010 = vmatprep.subr.bf16.mxu0 %v7319_v34  ;;  %v7367_v34 = vld [vmem:[%s10467_s7 + $0x1c0] sm:$0xff]   ;;  %6055 = vmatpush3.bf16.msra.mxu1 %v7366_v0 }
 0x3e3   : > { %6093 = vmatprep.subr.bf16.mxu1 %v7473_v23 }
 0x3e4   : > { %v5924_v48 = vpop.f32.mrf.mxu1 }
 0x3e5   : > { %6011 = vmatpush3.bf16.msra.mxu0 %v7320_v17  ;;  %v7368_v17 = vld [vmem:[%s10467_s7 + $0x180] sm:$0xff]  }
 0x3e6   : > { %6018 = vmatprep.subr.bf16.mxu0 %v7321_v16  ;;  %v5925_v42 = vpop.f32.mrf.mxu1 }
 0x3e7   : > { %v5926_v11 = vadd.f32 %v5925_v42, %v5924_v48 }
 0x3e8   : > { %5054 = vmatmul.mubr.bf16.vlgmr.msra.gmra.mxu0 %v7474_v2  ;;  %v5927_v36 = vpop.f32.mrf.mxu1 }
 0x3e9   : > { %6019 = vmatpush3.bf16.msra.mxu0 %v7322_v38  ;;  %5093 = vmatprep.mubr.bf16.mxu0 %v7474_v2  ;;  %v4251_v22 = vadd.f32 %v5926_v11, %v10159_v51 }
 0x3ea   : > { %6020 = vmatprep.subr.bf16.mxu0 %v7323_v60  ;;  %v5928_v4 = vpop.f32.mrf.mxu1 }
 0x3ec   : > { %v5946_v10 = vpop.f32.mrf.mxu0 }
 0x3ed   : > { %6021 = vmatpush3.bf16.msra.mxu0 %v7324_v18 }
 0x3ee   : > { %v5947_v20 = vpop.f32.mrf.mxu0  ;;  %6022 = vmatprep.subr.bf16.mxu0 %v7325_v30  ;;  %v5787_v30 = vld [vmem:[%s10465_s5] ss:$0 sm:$0xff] }
 0x3ef   : > { %v5948_v37 = vadd.f32 %v5947_v20, %v5946_v10 }
 0x3f0   : > { %v5949_v51 = vpop.f32.mrf.mxu0 }
 0x3f1   : > { %v4291_v63 = vadd.f32 %v5948_v37, %v4251_v22  ;;  %6023 = vmatpush3.bf16.msra.mxu0 %v7326_v5  ;;  %v5788_v5 = vld [vmem:[%s10466_s6] ss:$0 sm:$0xff] }
 0x3f2   : > { %v5950_v31 = vpop.f32.mrf.mxu0  ;;  %6024 = vmatprep.subr.bf16.mxu0 %v7327_v44 }
 0x3f5   : > { %6025 = vmatpush3.bf16.msra.mxu0 %v7328_v59 }
 0x3f6   : > { %6026 = vmatprep.subr.bf16.mxu0 %v7329_v3 }
 0x3f9   : > { %6027 = vmatpush3.bf16.msra.mxu0 %v7330_v29  ;;  %v7369_v29 = vld [vmem:[%s10467_s7 + $0x238] sm:$0xff]  }
 0x3fa   : > { %6028 = vmatprep.subr.bf16.mxu0 %v7331_v40 }
 0x3fd   : > { %6029 = vmatpush3.bf16.msra.mxu0 %v7332_v55  ;;  %v7370_v55 = vld [vmem:[%s10467_s7 + $0x230] sm:$0xff]  }
 0x3fe   : > { %6030 = vmatprep.subr.bf16.mxu0 %v7333_v6  ;;  %v7371_v6 = vld [vmem:[%s10467_s7 + $0x228] sm:$0xff]  }
 0x401   : > { %6031 = vmatpush3.bf16.msra.mxu0 %v7334_v54 }
 0x402   : > { %6032 = vmatprep.subr.bf16.mxu0 %v7335_v47 }
 0x405   : > { %6033 = vmatpush3.bf16.msra.mxu0 %v7336_v25  ;;  %v7372_v25 = vld [vmem:[%s10467_s7 + $0x220] sm:$0xff]  }
 0x406   : > { %6062 = vmatprep.subr.bf16.mxu0 %v7339_v41 }
 0x408   : > { %5094 = vmatmul.mubr.bf16.vlgmr.msra.gmra.mxu0 %v7474_v2 }
 0x409   : > { %6063 = vmatpush3.bf16.msra.mxu0 %v7341_v26  ;;  %5173 = vmatprep.mubr.bf16.mxu0 %v7474_v2 }
 0x40a   : > { %6064 = vmatprep.subr.bf16.mxu0 %v7343_v33 }
 0x40b   : > { %v5968_v45 = vpop.f32.mrf.mxu1 }
 0x40d   : > { %v5969_v61 = vpop.f32.mrf.mxu1  ;;  %6065 = vmatpush3.bf16.msra.mxu0 %v7345_v9  ;;  %v7374_v9 = vld [vmem:[%s10467_s7 + $0x210] sm:$0xff]  }
 0x40e   : > { %v5970_v27 = vadd.f32 %v5969_v61, %v5968_v45  ;;  %6066 = vmatprep.subr.bf16.mxu0 %v7347_v53  ;;  %v7375_v45 = vld [vmem:[%s10467_s7 + $0x208] sm:$0xff]  }
 0x40f   : > { %v5971_v39 = vpop.f32.mrf.mxu1 }
 0x410   : > { %v4331_v46 = vadd.f32 %v5970_v27, %v4291_v63 }
 0x411   : > { %v5972_v13 = vpop.f32.mrf.mxu1  ;;  %6067 = vmatpush3.bf16.msra.mxu0 %v7349_v32 }
 0x412   : > { %6068 = vmatprep.subr.bf16.mxu0 %v7351_v15 }
 0x415   : > { %6069 = vmatpush3.bf16.msra.mxu0 %v7353_v58 }
 0x416   : > { %6070 = vmatprep.subr.bf16.mxu0 %v7355_v52 }
 0x419   : > { %6071 = vmatpush3.bf16.msra.mxu0 %v7357_v7 }
 0x41a   : > { %6072 = vmatprep.subr.bf16.mxu0 %v7359_v28 }
 0x41d   : > { %6073 = vmatpush3.bf16.msra.mxu0 %v7361_v43  ;;  %v4586_v43 = vld [vmem:[%s10469_s9] sm:$0x1] }
 0x41e   : > { %6074 = vmatprep.subr.bf16.mxu0 %v7363_v49 }
 0x421   : > { %6075 = vmatpush3.bf16.msra.mxu0 %v7365_v8 }
 0x422   : > { %6076 = vmatprep.subr.bf16.mxu0 %v7367_v34 }
 0x425   : > { %6077 = vmatpush3.bf16.msra.mxu0 %v7368_v17 }
 0x428   : > { %5174 = vmatmul.mubr.bf16.vlgmr.msra.gmra.mxu0 %v7474_v2 }
 0x43b   : > { %v4410_v16 = vpop.f32.mrf.mxu1 }
 0x43d   : > { %v4412_v48 = vpop.f32.mrf.mxu1 }
 0x43f   : > { %v4413_v38 = vpop.f32.mrf.mxu1 }
 0x441   : > { %v4414_v60 = vpop.f32.mrf.mxu1 }
 0x488   : > { %v5990_v42 = vpop.f32.mrf.mxu0 }
 0x48a   : > { %v5991_v11 = vpop.f32.mrf.mxu0 }
 0x48b   : > { %v5992_v36 = vadd.f32 %v5991_v11, %v5990_v42 }
 0x48c   : > { %v5993_v18 = vpop.f32.mrf.mxu0 }
 0x48d   : > { %v4371_v22 = vadd.f32 %v5992_v36, %v4331_v46 }
 0x48e   : > { %v5994_v4 = vpop.f32.mrf.mxu0 }
 0x48f   : > { %v4411_v10 = vadd.f32 %v4410_v16, %v4371_v22 }
 0x491   : > { %v4422_v20 = vmul.f32 %v5787_v30, %v4411_v10 }
 0x493   : > { %v4429_v44 = vadd.f32 %v5788_v5, %v4422_v20 }
 0x495   : > { %vm4430_vm4 = vcmp.gt.f32.partialorder %v4429_v44, 0.0  ;;  %v4431_v37 = vmul.f32 0.01, %v4429_v44 }
 0x497   : > { %v4432_v51 = vsel %vm4430_vm4, %v4429_v44, %v4431_v37 }
 0x498   : > { %v4434_v63 = vrot.slane %v4432_v51, 1 }
 0x49a   : > { %v4436_v59 = vmax.f32 %v4432_v51, %v4434_v63 }
 0x49c   : > { %v4438_v31 = vrot.slane %v4436_v59, 2 }
 0x49e   : > { %v4440_v3 = vmax.f32 %v4436_v59, %v4438_v31 }
 0x4a0   : > { %v4588_v40 = vpack.c.bf16 %v4440_v3, %v4440_v3 }
 0x4a2   : > { %5134 = vmatmul.mubr.bf16.vlgmr.msra.gmra.mxu1 %v4588_v40 }
 0x4a3   : > { %6094 = vmatpush3.bf16.msra.mxu1 %v7369_v29  ;;  %6109 = vmatprep.mubr.msk.bf16.mxu1 %vm7475_vm10, %v7473_v23 }
 0x4a4   : > { %6095 = vmatprep.subr.bf16.mxu1 %v7473_v23 }
 0x4a7   : > { %6096 = vmatpush3.bf16.msra.mxu1 %v7370_v55 }
 0x4a8   : > { %6097 = vmatprep.subr.bf16.mxu1 %v7473_v23  ;;  %v6012_v54 = vpop.f32.mrf.mxu0 }
 0x4aa   : > { %v6013_v47 = vpop.f32.mrf.mxu0 }
 0x4ab   : > { %6098 = vmatpush3.bf16.msra.mxu1 %v7371_v6  ;;  %v6014_v41 = vadd.f32 %v6013_v47, %v6012_v54 }
 0x4ac   : > { %6099 = vmatprep.subr.bf16.mxu1 %v7473_v23  ;;  %v6015_v26 = vpop.f32.mrf.mxu0 }
 0x4ae   : > { %v6016_v33 = vpop.f32.mrf.mxu0 }
 0x4af   : > { %6100 = vmatpush3.bf16.msra.mxu1 %v7372_v25 }
 0x4b0   : > { %6101 = vmatprep.subr.bf16.mxu1 %v7473_v23 }
 0x4b3   : > { %6102 = vmatpush3.bf16.msra.mxu1 %v7373_v14 }
 0x4b4   : > { %6103 = vmatprep.subr.bf16.mxu1 %v7473_v23 }
 0x4b7   : > { %6104 = vmatpush3.bf16.msra.mxu1 %v7374_v9 }
 0x4b8   : > { %6105 = vmatprep.subr.bf16.mxu1 %v7473_v23 }
 0x4bb   : > { %6106 = vmatpush3.bf16.msra.mxu1 %v7375_v45 }
 0x4bc   : > { %6107 = vmatprep.subr.bf16.mxu1 %v7473_v23 }
 0x4bf   : > { %6108 = vmatpush3.bf16.msra.mxu1 %v7376_v57 }
 0x4c2   : > { %6110 = vmatmul.mubr.bf16.vlgmr.msra.gmra.mxu1 %v7474_v2 }
 0x4c8   : > { %v6034_v61 = vpop.f32.mrf.mxu0 }
 0x4ca   : > { %v6035_v27 = vpop.f32.mrf.mxu0 }
 0x4cb   : > { %v6036_v53 = vadd.f32 %v6035_v27, %v6034_v61 }
 0x4cc   : > { %v6037_v39 = vpop.f32.mrf.mxu0 }
 0x4cd   : > { %v5096_v12 = vadd.f32 %v6036_v53, %v6014_v41 }
 0x4ce   : > { %v6038_v32 = vpop.f32.mrf.mxu0 }
 0x4e8   : > { %v6078_v46 = vpop.f32.mrf.mxu0 }
 0x4ea   : > { %v6079_v21 = vpop.f32.mrf.mxu0 }
 0x4eb   : > { %v6080_v13 = vadd.f32 %v6079_v21, %v6078_v46 }
 0x4ec   : > { %v6081_v15 = vpop.f32.mrf.mxu0 }
 0x4ee   : > { %v6082_v56 = vpop.f32.mrf.mxu0 }
 0x562   : > { %v6056_v58 = vpop.f32.mrf.mxu1 }
 0x564   : > { %v6057_v62 = vpop.f32.mrf.mxu1 }
 0x565   : > { %v6058_v52 = vadd.f32 %v6057_v62, %v6056_v58 }
 0x566   : > { %v6059_v23 = vpop.f32.mrf.mxu1 }
 0x567   : > { %v5136_v19 = vadd.f32 %v6058_v52, %v5096_v12 }
 0x568   : > { %v6060_v7 = vpop.f32.mrf.mxu1 }
 0x569   : > { %v5176_v2 = vadd.f32 %v6080_v13, %v5136_v19 }
 0x582   : > { %v5215_v28 = vpop.f32.mrf.mxu1 }
 0x583   : > { %v5216_v1 = vadd.f32 %v5215_v28, %v5176_v2 }
 0x584   : > { %v6111_v24 = vpop.f32.mrf.mxu1 }
 0x585   : > { %v5221_v49 = vmul.f32 %v5216_v1, %v4585_v50 }
 0x586   : > { %v5218_v35 = vpop.f32.mrf.mxu1 }
 0x587   : > { %v5222_v8 = vadd.f32 %v5221_v49, %v4586_v43 }
 0x588   : > { %v6112_v0 = vpop.f32.mrf.mxu1 }
 0x589   : > { %v5224_v34 = vmul.f32 0.01, %v5222_v8  ;;  %vm5223_vm12 = vcmp.gt.f32.partialorder %v5222_v8, 0.0 }
 0x58b   : > { %v5225_v17 = vsel %vm5223_vm12, %v5222_v8, %v5224_v34 }
 0x58c   : > { %5227 = vst.msk [vmem:[%s351_s22] sm:$0x1] %vm5226_vm3, %v5225_v17 }
 0x58d   : > { %7404 = shalt.err (!%p7401_p3)
}
 0x58e   : > { %s7405_s27 = scalar_lea.hbm %s10425_s18, 16  ;;  %s7409_s10 = scalar_lea.hbm %s10796_s12, 32 }
 0x58f   : > { %p7406_p4 = scmp.ne.s32.totalorder %s10425_s18, %s7405_s27  ;;  %p7410_p9 = scmp.lt.s32.totalorder %s10425_s18, %s10796_s12 }
 0x590   : > { %p7411_p10 = scmp.lt.s32.totalorder %s7409_s10, %s7405_s27 }
 0x591   : > { %p7407_p7 = pnand %p7406_p4, %p7570_p5 }
 0x592   : > { %p7412_p11 = por %p7411_p10, %p7410_p9 }
 0x593   : > { %p7408_p8 = pneg %p7407_p7 }
 0x595   : > { %p7413_p12 = pnand %p7412_p11, %p7408_p8 }
 0x597   : > { %7416 = shalt.err (!%p7413_p12)
}
 0x598   : > { %6114 = dma.vmem_to_hbm [thread:$0]  (%p7570_p5), %s5242_s24, 16, %s10425_s18, %s5229_s20  }
 0x599 PF: > { %s10797_s13 = sld [smem:[#allocation7_spill]] }
 0x59a   : > { %s10798_s0 = sld [smem:[#allocation5_spill]] }
 0x59f   : > { %p6120_p13 = scmp.ge.s32.totalorder %s10797_s13, 2 }
 0x5a0   : > { %s5253_s22 = sand.u32 1, %s10798_s0  }
 0x5a1   : > { %p6117_p0 = pnand %p6120_p13, %p7574_p6  ;;  %s5254_s30 = scalar_lea.sflag [#allocation3], %s5253_s22 }
 0x5a3   : > { %p6118_p1 = pneg %p6117_p0 }
 0x5a5   : > { %7434 = dma.done.wait (%p6118_p1), %s5254_s30, 16  }
 0x5a6   : > { %7436 = vsyncadd (%p6118_p1), %s5254_s30, 4294967280  ;;  %s10800_s16 = sld [smem:[#allocation8_spill]]  ;;  %s10803_s13 = smov %s7443_s14 }
 0x5a7   : > { %s10801_s11 = sld [smem:[#allocation6_spill]] }
 0x5a8   : > { %s10802_s15 = sld [smem:[#allocation9_spill]] }
 0x5ac   : > { %p20_p2 = scmp.ge.s32.totalorder %s10800_s16, 4  }
 0x5ad   : > { %s10804_s14 = smov %s10801_s11 }
 0x5ae   :  { %22 = sbr.rel (!%p20_p2) target bundleno = 6 (0x6), region = 108 }
 0x5b3   :  { %5258 = vsyncpa [#allocation3], 1 }
 0x5b4   :  { %5260 = vsyncpa [#allocation3 + $0x1], 1 }

</bundles_post_ra>
